<compile_context>
chip_gen: v7x
topology: tpu7x:2x2x1
jax: 0.10.0
libtpu: 0.0.40
codegen_flags: <defaults>
</compile_context>

<pallas_src>
import jax
import jax.numpy as jnp
from jax import lax
from jax.experimental import pallas as pl
from jax.experimental.pallas import tpu as pltpu


def _round_up(x, m):
    return ((x + m - 1) // m) * m


def _pad2d(x, rows, cols):
    r, c = x.shape
    return jnp.pad(x, ((0, rows - r), (0, cols - c)))


def _vmem_specs(n):
    return [pl.BlockSpec(memory_space=pltpu.MemorySpace.VMEM) for _ in range(n)]


# --------------------------------------------------------------------------
# Fully fused kernel: MLP branch + GRU branch + fusion + CE loss.
# --------------------------------------------------------------------------
def make_fused_kernel(num_layers, T, B, Bp, C, Hp, Dp):
    f32 = jnp.float32
    bf16 = jnp.bfloat16

    def kernel(*refs):
        # ---- unpack (inputs..., outputs..., scratch...) ----
        x_static_ref = refs[0]      # bf16 [Bp, Dp]
        x_ts_ref = refs[1]          # bf16 [T*Bp, Fp]   (time-major, row = t*Bp + b)
        onehot_ref = refs[2]        # f32  [Bp, C]
        wdense_ref = refs[3]        # bf16 [7, Dp, Dp]  (MLP fc1..4, head fc1..3)
        bdense_ref = refs[4]        # f32  [7, 1, Dp]
        w_ih0_ref = refs[5]         # bf16 [Fp, 3Hp]
        idx = 6
        if num_layers > 1:
            w_ih_rest_ref = refs[idx]   # bf16 [L-1, Hp, 3Hp]
            idx += 1
        else:
            w_ih_rest_ref = None
        w_hh_ref = refs[idx]        # bf16 [L, Hp, 3Hp]
        bias_ref = refs[idx + 1]    # f32  [L, 2, 3Hp]  row0: input-side (r/z hidden
        idx += 2                    #                    biases folded), row1: (0,0,b_hn)
        x1_ref, x2_ref, avg_ref, loss_ref = refs[idx: idx + 4]
        idx += 4
        gi_scratch, seq_a, seq_b = refs[idx: idx + 3]

        # ---------------- MLP branch ----------------
        # Weight slabs are zero-padded, so padded lanes stay exactly 0 through
        # the ReLU chain and no masking is needed until the final C-slice.
        h = x_static_ref[...]
        for li in range(3):
            h = jnp.maximum(
                jnp.dot(h, wdense_ref[li], preferred_element_type=f32)
                + bdense_ref[li], 0.0).astype(bf16)
        x1_full = (jnp.dot(h, wdense_ref[3], preferred_element_type=f32)
                   + bdense_ref[3])                               # f32 [Bp, Dp]

        # ---------------- GRU branch ----------------
        hstate = jnp.zeros((Bp, Hp), f32)
        for l in range(num_layers):
            if l == 0:
                xin = x_ts_ref[...]                               # bf16 [T*Bp, Fp]
                w_ih_l = w_ih0_ref[...]
            else:
                src = seq_a if (l - 1) % 2 == 0 else seq_b        # ping-pong read
                xin = src[...].astype(bf16)
                w_ih_l = w_ih_rest_ref[l - 1]

            b2 = bias_ref[l]                                      # [2, 3Hp]
            bi = b2[0:1, :]
            # Time-batched input projection for all T steps at once, staged in
            # VMEM scratch (keeps the footprint off vregs).
            gi_scratch[...] = (
                jnp.dot(xin, w_ih_l, preferred_element_type=f32) + bi)

            w_hh_l = w_hh_ref[l]                                  # bf16 [Hp, 3Hp]
            bh = jnp.broadcast_to(b2[1:2, :], (Bp, 3 * Hp))       # hoisted broadcast
            write_ref = None
            if l + 1 < num_layers:
                write_ref = seq_a if l % 2 == 0 else seq_b        # ping-pong write

            def step(t, h_c, w_hh_l=w_hh_l, bh=bh, write_ref=write_ref):
                lo = pl.multiple_of(t * Bp, Bp)
                gi_t = gi_scratch[pl.ds(lo, Bp), :]               # [Bp, 3Hp]
                gh = jnp.dot(h_c.astype(bf16), w_hh_l,
                             preferred_element_type=f32) + bh     # one MXU push
                r = jax.nn.sigmoid(gi_t[:, 0:Hp] + gh[:, 0:Hp])
                z = jax.nn.sigmoid(gi_t[:, Hp:2 * Hp] + gh[:, Hp:2 * Hp])
                n = jnp.tanh(gi_t[:, 2 * Hp:3 * Hp] + r * gh[:, 2 * Hp:3 * Hp])
                h_new = n + z * (h_c - n)                         # == (1-z)*n + z*h
                if write_ref is not None:
                    write_ref[pl.ds(lo, Bp), :] = h_new
                return h_new

            hstate = lax.fori_loop(0, T, step, jnp.zeros((Bp, Hp), f32),
                                   unroll=(T <= 16))

        # GRU head: fc1 -> relu -> fc2 -> relu -> fc3 on final hidden state
        y = hstate.astype(bf16)
        w_head1 = wdense_ref[4][0:Hp, :]
        y = jnp.maximum(jnp.dot(y, w_head1, preferred_element_type=f32)
                        + bdense_ref[4], 0.0).astype(bf16)
        y = jnp.maximum(jnp.dot(y, wdense_ref[5], preferred_element_type=f32)
                        + bdense_ref[5], 0.0).astype(bf16)
        x2_full = (jnp.dot(y, wdense_ref[6], preferred_element_type=f32)
                   + bdense_ref[6])                               # f32 [Bp, Dp]

        # ---------------- fusion + cross-entropy loss ----------------
        x1 = x1_full[:, 0:C]
        x2 = x2_full[:, 0:C]
        avg = (x1 + x2) * 0.5                                     # [Bp, C]
        x1_ref[...] = x1[0:B, :]
        x2_ref[...] = x2[0:B, :]
        avg_ref[...] = avg[0:B, :]

        onehot = onehot_ref[...]                                  # [Bp, C]
        valid = jnp.sum(onehot, axis=-1, keepdims=True)           # 1 valid / 0 pad row
        m = jnp.max(avg, axis=-1, keepdims=True)
        lse = m + jnp.log(jnp.sum(jnp.exp(avg - m), axis=-1, keepdims=True))
        correct = jnp.sum(onehot * avg, axis=-1, keepdims=True)
        per_ex = (lse - correct) * valid
        loss_ref[...] = jnp.sum(per_ex, axis=0, keepdims=True) * (1.0 / B)

    return kernel


# --------------------------------------------------------------------------
# Wrapper: layout plumbing (padding to sublane/lane boundaries, slab packing,
# per-gate lane padding with hidden r/z bias folding) in plain JAX; one launch.
# --------------------------------------------------------------------------
def fusionnet_forward(params, x_static, x_time_series, label, num_classes,
                      gru_hidden_dim):
    mlp, gru_layers, gru_fc = params
    B, T, F = x_time_series.shape
    H = gru_hidden_dim
    C = num_classes
    L = len(gru_layers) // 4
    mlp_in = x_static.shape[1]

    Bp = _round_up(max(B, 8), 8)      # sublane padding
    Hp = _round_up(H, 128)            # lane padding per gate block
    Fp = _round_up(F, 128)
    Dp = _round_up(max(mlp_in, H, 128, C), 128)

    f32, bf16 = jnp.float32, jnp.bfloat16

    # Dense weight slab: MLP fc1..fc4 then GRU-head fc1..fc3, zero-padded.
    dense_pairs = ([(mlp[2 * i], mlp[2 * i + 1]) for i in range(4)]
                   + [(gru_fc[2 * i], gru_fc[2 * i + 1]) for i in range(3)])
    w_dense = jnp.stack([_pad2d(w, Dp, Dp) for w, _ in dense_pairs]).astype(bf16)
    b_dense = jnp.stack([_pad2d(b, 1, Dp) for _, b in dense_pairs]).astype(f32)

    # GRU slabs: each gate block lane-padded to Hp so in-kernel gate slices
    # fall on 128-lane boundaries.
    def gate_pack(w, rows_p):
        return jnp.concatenate(
            [_pad2d(w[:, g * H:(g + 1) * H], rows_p, Hp) for g in range(3)], axis=1)

    w_ih0 = None
    w_ih_rest, w_hh_all, bias_all = [], [], []
    for l in range(L):
        w_ih, w_hh, b_ih, b_hh = gru_layers[4 * l: 4 * l + 4]
        w_ih_p = gate_pack(w_ih, Fp if l == 0 else Hp)
        if l == 0:
            w_ih0 = w_ih_p
        else:
            w_ih_rest.append(w_ih_p)
        w_hh_all.append(gate_pack(w_hh, Hp))
        # Input-side bias with hidden-side r/z biases folded in (exact rewrite;
        # only the n-gate hidden bias must stay inside the r* term).
        bi = jnp.concatenate([
            _pad2d(b_ih[:, 0:H] + b_hh[:, 0:H], 1, Hp),
            _pad2d(b_ih[:, H:2 * H] + b_hh[:, H:2 * H], 1, Hp),
            _pad2d(b_ih[:, 2 * H:3 * H], 1, Hp)], axis=1)
        bh = jnp.concatenate([
            jnp.zeros((1, Hp), f32), jnp.zeros((1, Hp), f32),
            _pad2d(b_hh[:, 2 * H:3 * H], 1, Hp)], axis=1)
        bias_all.append(jnp.concatenate([bi, bh], axis=0))        # [2, 3Hp]
    w_ih0 = w_ih0.astype(bf16)
    w_hh_all = jnp.stack(w_hh_all).astype(bf16)                   # [L, Hp, 3Hp]
    bias_all = jnp.stack(bias_all).astype(f32)                    # [L, 2, 3Hp]

    # Activations: pad batch to Bp sublanes, features to lane boundaries.
    x_static_p = _pad2d(x_static, Bp, Dp).astype(bf16)
    x_ts = jnp.transpose(x_time_series, (1, 0, 2))                # [T, B, F]
    x_ts = jnp.pad(x_ts, ((0, 0), (0, Bp - B), (0, Fp - F)))
    x_ts2d = x_ts.reshape(T * Bp, Fp).astype(bf16)                # row = t*Bp + b
    onehot = jnp.pad(jax.nn.one_hot(label, C, dtype=f32), ((0, Bp - B), (0, 0)))

    args = [x_static_p, x_ts2d, onehot, w_dense, b_dense, w_ih0]
    if L > 1:
        args.append(jnp.stack(w_ih_rest).astype(bf16))            # [L-1, Hp, 3Hp]
    args += [w_hh_all, bias_all]

    kernel = make_fused_kernel(L, T, B, Bp, C, Hp, Dp)

    x1, x2, avg, loss = pl.pallas_call(
        kernel,
        out_shape=(
            jax.ShapeDtypeStruct((B, C), f32),
            jax.ShapeDtypeStruct((B, C), f32),
            jax.ShapeDtypeStruct((B, C), f32),
            jax.ShapeDtypeStruct((1, 1), f32),
        ),
        in_specs=_vmem_specs(len(args)),
        out_specs=tuple(_vmem_specs(4)),
        scratch_shapes=[
            pltpu.VMEM((T * Bp, 3 * Hp), f32),   # time-batched gate pre-activations
            pltpu.VMEM((T * Bp, Hp), f32),       # inter-layer sequence (ping)
            pltpu.VMEM((T * Bp, Hp), f32),       # inter-layer sequence (pong)
        ],
        compiler_params=pltpu.CompilerParams(
            vmem_limit_bytes=32 * 1024 * 1024),  # explicit; fits v7x 64 MiB too
    )(*args)
    return x1, x2, avg, loss[0, 0]


fusionnet_forward_jit = jax.jit(fusionnet_forward, static_argnums=(4, 5))


# --------------------------------------------------------------------------
# Parameter construction (deterministic, synthetic, PyTorch-style storage)
# --------------------------------------------------------------------------
def _linear(key, d_in, d_out):
    kw, kb = jax.random.split(key)
    w = jax.random.normal(kw, (d_in, d_out), jnp.float32) * 0.1
    b = jax.random.normal(kb, (1, d_out), jnp.float32) * 0.1
    return w, b


def init_params(key, mlp_input_dim, gru_input_features, gru_hidden_dim,
                num_layers_gru, num_classes):
    keys = jax.random.split(key, 16)
    mlp = []
    dims = [mlp_input_dim, 128, 64, 32, num_classes]
    for i in range(4):
        w, b = _linear(keys[i], dims[i], dims[i + 1])
        mlp += [w, b]
    gru_layers = []
    for l in range(num_layers_gru):
        f_in = gru_input_features if l == 0 else gru_hidden_dim
        k = jax.random.fold_in(keys[4], l)
        k1, k2, k3, k4 = jax.random.split(k, 4)
        w_ih = jax.random.normal(k1, (f_in, 3 * gru_hidden_dim), jnp.float32) * 0.1
        w_hh = jax.random.normal(k2, (gru_hidden_dim, 3 * gru_hidden_dim), jnp.float32) * 0.1
        b_ih = jax.random.normal(k3, (1, 3 * gru_hidden_dim), jnp.float32) * 0.1
        b_hh = jax.random.normal(k4, (1, 3 * gru_hidden_dim), jnp.float32) * 0.1
        gru_layers += [w_ih, w_hh, b_ih, b_hh]
    gru_fc = []
    dims = [gru_hidden_dim, 64, 32, num_classes]
    for i in range(3):
        w, b = _linear(keys[5 + i], dims[i], dims[i + 1])
        gru_fc += [w, b]
    return mlp, gru_layers, gru_fc


# --------------------------------------------------------------------------
# Pure-JAX f32 reference of the PyTorch forward semantics (for verification)
# --------------------------------------------------------------------------
def fusionnet_reference(params, x_static, x_ts, label, num_classes, H):
    mlp, gru_layers, gru_fc = params
    h = x_static
    for i in range(3):
        h = jnp.maximum(h @ mlp[2 * i] + mlp[2 * i + 1], 0.0)
    x1 = h @ mlp[6] + mlp[7]
    B, T, _ = x_ts.shape
    seq = x_ts
    for l in range(len(gru_layers) // 4):
        w_ih, w_hh, b_ih, b_hh = gru_layers[4 * l: 4 * l + 4]
        hcur = jnp.zeros((B, H), jnp.float32)
        outs = []
        for t in range(T):
            gi = seq[:, t, :] @ w_ih + b_ih
            gh = hcur @ w_hh + b_hh
            r = jax.nn.sigmoid(gi[:, :H] + gh[:, :H])
            z = jax.nn.sigmoid(gi[:, H:2 * H] + gh[:, H:2 * H])
            n = jnp.tanh(gi[:, 2 * H:] + r * gh[:, 2 * H:])
            hcur = (1 - z) * n + z * hcur
            outs.append(hcur)
        seq = jnp.stack(outs, axis=1)
    y = hcur
    y = jnp.maximum(y @ gru_fc[0] + gru_fc[1], 0.0)
    y = jnp.maximum(y @ gru_fc[2] + gru_fc[3], 0.0)
    x2 = y @ gru_fc[4] + gru_fc[5]
    avg = (x1 + x2) / 2
    lse = jax.nn.logsumexp(avg, axis=-1)
    correct = jnp.take_along_axis(avg, label[:, None], axis=-1)[:, 0]
    loss = jnp.mean(lse - correct)
    return x1, x2, avg, loss


if __name__ == "__main__":
    B = 2                 # batch
    MLP_IN = 32           # mlp_input_dim
    GRU_IN = 16           # gru_input_features
    GRU_H = 32            # gru_hidden_dim
    NUM_LAYERS = 2        # num_layers_gru
    C = 4                 # num_classes
    T = 8                 # sequence length

    key = jax.random.PRNGKey(0)
    k_param, k_static, k_ts, k_lbl = jax.random.split(key, 4)

    params = init_params(k_param, MLP_IN, GRU_IN, GRU_H, NUM_LAYERS, C)
    x_static = jax.random.normal(k_static, (B, MLP_IN), jnp.float32)
    x_time_series = jax.random.normal(k_ts, (B, T, GRU_IN), jnp.float32)
    label = jax.random.randint(k_lbl, (B,), 0, C)

    x1, x2, avg, loss = fusionnet_forward_jit(params, x_static, x_time_series,
                                              label, C, GRU_H)
    jax.block_until_ready((x1, x2, avg, loss))

    # Verify against the f32 reference. Kernel matmul operands are bf16 (MXU
    # native, f32 accumulation), so tolerances are bf16-appropriate.
    r1, r2, ravg, rloss = fusionnet_reference(params, x_static, x_time_series,
                                              label, C, GRU_H)
    assert jnp.allclose(x1, r1, rtol=2e-2, atol=2e-2)
    assert jnp.allclose(x2, r2, rtol=2e-2, atol=2e-2)
    assert jnp.allclose(avg, ravg, rtol=2e-2, atol=2e-2)
    assert jnp.allclose(loss, rloss, rtol=2e-2, atol=2e-2)

    print("KERNEL_OK")
</pallas_src>

<mosaic_0001>
module attributes {stable_mosaic.version = 11 : i64} {
  func.func @kernel(%arg0: memref<8x128xbf16, #tpu.memory_space<vmem>>, %arg1: memref<64x128xbf16, #tpu.memory_space<vmem>>, %arg2: memref<8x4xf32, #tpu.memory_space<vmem>>, %arg3: memref<7x128x128xbf16, #tpu.memory_space<vmem>>, %arg4: memref<7x1x128xf32, #tpu.memory_space<vmem>>, %arg5: memref<128x384xbf16, #tpu.memory_space<vmem>>, %arg6: memref<1x128x384xbf16, #tpu.memory_space<vmem>>, %arg7: memref<2x128x384xbf16, #tpu.memory_space<vmem>>, %arg8: memref<2x2x384xf32, #tpu.memory_space<vmem>>, %arg9: memref<2x4xf32, #tpu.memory_space<vmem>>, %arg10: memref<2x4xf32, #tpu.memory_space<vmem>>, %arg11: memref<2x4xf32, #tpu.memory_space<vmem>>, %arg12: memref<1x1xf32, #tpu.memory_space<vmem>>, %arg13: memref<64x384xf32, #tpu.memory_space<vmem>>, %arg14: memref<64x128xf32, #tpu.memory_space<vmem>>, %arg15: memref<64x128xf32, #tpu.memory_space<vmem>>) attributes {dimension_semantics = [], scalar_prefetch = 0 : i64, scratch_operands = 3 : i64, tpu.core_type = #tpu.core_type<tc>} {
    %c0 = arith.constant 0 : index
    %c0_0 = arith.constant 0 : index
    %0 = vector.load %arg0[%c0, %c0_0] : memref<8x128xbf16, #tpu.memory_space<vmem>>, vector<8x128xbf16>
    %c0_1 = arith.constant 0 : index
    %c0_2 = arith.constant 0 : index
    %c0_3 = arith.constant 0 : index
    %1 = vector.load %arg3[%c0_1, %c0_2, %c0_3] : memref<7x128x128xbf16, #tpu.memory_space<vmem>>, vector<1x128x128xbf16>
    %2 = vector.shape_cast %1 : vector<1x128x128xbf16> to vector<128x128xbf16>
    %cst = arith.constant dense<0.000000e+00> : vector<8x128xf32>
    %3 = tpu.matmul %0, %2, %cst {dimension_numbers = #tpu.dot_dimension_numbers<[1], [0], [0], [1], [0, 0, 1, 1], [], []>} : vector<8x128xbf16>, vector<128x128xbf16>, vector<8x128xf32> -> vector<8x128xf32>
    %c0_4 = arith.constant 0 : index
    %c0_5 = arith.constant 0 : index
    %c0_6 = arith.constant 0 : index
    %4 = vector.load %arg4[%c0_4, %c0_5, %c0_6] : memref<7x1x128xf32, #tpu.memory_space<vmem>>, vector<1x1x128xf32>
    %5 = vector.shape_cast %4 : vector<1x1x128xf32> to vector<1x128xf32>
    %6 = vector.broadcast %5 : vector<1x128xf32> to vector<8x128xf32>
    %7 = arith.addf %3, %6 : vector<8x128xf32>
    %cst_7 = arith.constant 0.000000e+00 : f32
    %8 = vector.broadcast %cst_7 : f32 to vector<8x128xf32>
    %9 = arith.maximumf %7, %8 : vector<8x128xf32>
    %10 = arith.truncf %9 : vector<8x128xf32> to vector<8x128xbf16>
    %c1 = arith.constant 1 : index
    %c0_8 = arith.constant 0 : index
    %c0_9 = arith.constant 0 : index
    %11 = vector.load %arg3[%c1, %c0_8, %c0_9] : memref<7x128x128xbf16, #tpu.memory_space<vmem>>, vector<1x128x128xbf16>
    %12 = vector.shape_cast %11 : vector<1x128x128xbf16> to vector<128x128xbf16>
    %cst_10 = arith.constant dense<0.000000e+00> : vector<8x128xf32>
    %13 = tpu.matmul %10, %12, %cst_10 {dimension_numbers = #tpu.dot_dimension_numbers<[1], [0], [0], [1], [0, 0, 1, 1], [], []>} : vector<8x128xbf16>, vector<128x128xbf16>, vector<8x128xf32> -> vector<8x128xf32>
    %c1_11 = arith.constant 1 : index
    %c0_12 = arith.constant 0 : index
    %c0_13 = arith.constant 0 : index
    %14 = vector.load %arg4[%c1_11, %c0_12, %c0_13] : memref<7x1x128xf32, #tpu.memory_space<vmem>>, vector<1x1x128xf32>
    %15 = vector.shape_cast %14 : vector<1x1x128xf32> to vector<1x128xf32>
    %16 = vector.broadcast %15 : vector<1x128xf32> to vector<8x128xf32>
    %17 = arith.addf %13, %16 : vector<8x128xf32>
    %cst_14 = arith.constant 0.000000e+00 : f32
    %18 = vector.broadcast %cst_14 : f32 to vector<8x128xf32>
    %19 = arith.maximumf %17, %18 : vector<8x128xf32>
    %20 = arith.truncf %19 : vector<8x128xf32> to vector<8x128xbf16>
    %c2 = arith.constant 2 : index
    %c0_15 = arith.constant 0 : index
    %c0_16 = arith.constant 0 : index
    %21 = vector.load %arg3[%c2, %c0_15, %c0_16] : memref<7x128x128xbf16, #tpu.memory_space<vmem>>, vector<1x128x128xbf16>
    %22 = vector.shape_cast %21 : vector<1x128x128xbf16> to vector<128x128xbf16>
    %cst_17 = arith.constant dense<0.000000e+00> : vector<8x128xf32>
    %23 = tpu.matmul %20, %22, %cst_17 {dimension_numbers = #tpu.dot_dimension_numbers<[1], [0], [0], [1], [0, 0, 1, 1], [], []>} : vector<8x128xbf16>, vector<128x128xbf16>, vector<8x128xf32> -> vector<8x128xf32>
    %c2_18 = arith.constant 2 : index
    %c0_19 = arith.constant 0 : index
    %c0_20 = arith.constant 0 : index
    %24 = vector.load %arg4[%c2_18, %c0_19, %c0_20] : memref<7x1x128xf32, #tpu.memory_space<vmem>>, vector<1x1x128xf32>
    %25 = vector.shape_cast %24 : vector<1x1x128xf32> to vector<1x128xf32>
    %26 = vector.broadcast %25 : vector<1x128xf32> to vector<8x128xf32>
    %27 = arith.addf %23, %26 : vector<8x128xf32>
    %cst_21 = arith.constant 0.000000e+00 : f32
    %28 = vector.broadcast %cst_21 : f32 to vector<8x128xf32>
    %29 = arith.maximumf %27, %28 : vector<8x128xf32>
    %30 = arith.truncf %29 : vector<8x128xf32> to vector<8x128xbf16>
    %c3 = arith.constant 3 : index
    %c0_22 = arith.constant 0 : index
    %c0_23 = arith.constant 0 : index
    %31 = vector.load %arg3[%c3, %c0_22, %c0_23] : memref<7x128x128xbf16, #tpu.memory_space<vmem>>, vector<1x128x128xbf16>
    %32 = vector.shape_cast %31 : vector<1x128x128xbf16> to vector<128x128xbf16>
    %cst_24 = arith.constant dense<0.000000e+00> : vector<8x128xf32>
    %33 = tpu.matmul %30, %32, %cst_24 {dimension_numbers = #tpu.dot_dimension_numbers<[1], [0], [0], [1], [0, 0, 1, 1], [], []>} : vector<8x128xbf16>, vector<128x128xbf16>, vector<8x128xf32> -> vector<8x128xf32>
    %c3_25 = arith.constant 3 : index
    %c0_26 = arith.constant 0 : index
    %c0_27 = arith.constant 0 : index
    %34 = vector.load %arg4[%c3_25, %c0_26, %c0_27] : memref<7x1x128xf32, #tpu.memory_space<vmem>>, vector<1x1x128xf32>
    %35 = vector.shape_cast %34 : vector<1x1x128xf32> to vector<1x128xf32>
    %36 = vector.broadcast %35 : vector<1x128xf32> to vector<8x128xf32>
    %37 = arith.addf %33, %36 : vector<8x128xf32>
    %c0_28 = arith.constant 0 : index
    %c0_29 = arith.constant 0 : index
    %38 = vector.load %arg1[%c0_28, %c0_29] : memref<64x128xbf16, #tpu.memory_space<vmem>>, vector<64x128xbf16>
    %c0_30 = arith.constant 0 : index
    %c0_31 = arith.constant 0 : index
    %39 = vector.load %arg5[%c0_30, %c0_31] : memref<128x384xbf16, #tpu.memory_space<vmem>>, vector<128x384xbf16>
    %c0_32 = arith.constant 0 : index
    %c0_33 = arith.constant 0 : index
    %c0_34 = arith.constant 0 : index
    %40 = vector.load %arg8[%c0_32, %c0_33, %c0_34] : memref<2x2x384xf32, #tpu.memory_space<vmem>>, vector<1x2x384xf32>
    %41 = vector.shape_cast %40 : vector<1x2x384xf32> to vector<2x384xf32>
    %42 = vector.extract_strided_slice %41 {offsets = [0, 0], sizes = [1, 384], strides = [1, 1]} : vector<2x384xf32> to vector<1x384xf32>
    %cst_35 = arith.constant dense<0.000000e+00> : vector<64x384xf32>
    %43 = tpu.matmul %38, %39, %cst_35 {dimension_numbers = #tpu.dot_dimension_numbers<[1], [0], [0], [1], [0, 0, 1, 1], [], []>} : vector<64x128xbf16>, vector<128x384xbf16>, vector<64x384xf32> -> vector<64x384xf32>
    %44 = vector.broadcast %42 : vector<1x384xf32> to vector<64x384xf32>
    %45 = arith.addf %43, %44 : vector<64x384xf32>
    %c0_36 = arith.constant 0 : index
    %c0_37 = arith.constant 0 : index
    %46 = vector.load %arg13[%c0_36, %c0_37] : memref<64x384xf32, #tpu.memory_space<vmem>>, vector<64x384xf32>
    tpu.vector_store %arg13[%c0_36, %c0_37], %45 {strides = array<i32>} : memref<64x384xf32, #tpu.memory_space<vmem>>, vector<64x384xf32>,
    %c0_38 = arith.constant 0 : index
    %c0_39 = arith.constant 0 : index
    %c0_40 = arith.constant 0 : index
    %47 = vector.load %arg7[%c0_38, %c0_39, %c0_40] : memref<2x128x384xbf16, #tpu.memory_space<vmem>>, vector<1x128x384xbf16>
    %48 = vector.shape_cast %47 : vector<1x128x384xbf16> to vector<128x384xbf16>
    %49 = vector.extract_strided_slice %41 {offsets = [1, 0], sizes = [1, 384], strides = [1, 1]} : vector<2x384xf32> to vector<1x384xf32>
    %50 = vector.shape_cast %49 : vector<1x384xf32> to vector<1x384xf32>
    %51 = vector.broadcast %50 : vector<1x384xf32> to vector<8x384xf32>
    %cst_41 = arith.constant 0.000000e+00 : f32
    %52 = vector.broadcast %cst_41 : f32 to vector<8x128xf32>
    %c0_i32 = arith.constant 0 : i32
    %c8_i32 = arith.constant 8 : i32
    %53 = arith.muli %c0_i32, %c8_i32 : i32
    %54 = tpu.assume_multiple %53, 8 : i32
    %55 = arith.index_cast %54 : i32 to index
    %c0_42 = arith.constant 0 : index
    %56 = vector.load %arg13[%55, %c0_42] : memref<64x384xf32, #tpu.memory_space<vmem>>, vector<8x384xf32>
    %57 = arith.truncf %52 : vector<8x128xf32> to vector<8x128xbf16>
    %cst_43 = arith.constant dense<0.000000e+00> : vector<8x384xf32>
    %58 = tpu.matmul %57, %48, %cst_43 {dimension_numbers = #tpu.dot_dimension_numbers<[1], [0], [0], [1], [0, 0, 1, 1], [], []>} : vector<8x128xbf16>, vector<128x384xbf16>, vector<8x384xf32> -> vector<8x384xf32>
    %59 = arith.addf %58, %51 : vector<8x384xf32>
    %60 = vector.extract_strided_slice %56 {offsets = [0, 0], sizes = [8, 128], strides = [1, 1]} : vector<8x384xf32> to vector<8x128xf32>
    %61 = vector.extract_strided_slice %59 {offsets = [0, 0], sizes = [8, 128], strides = [1, 1]} : vector<8x384xf32> to vector<8x128xf32>
    %62 = arith.addf %60, %61 : vector<8x128xf32>
    %63 = arith.negf %62 : vector<8x128xf32>
    %64 = math.exp %63 : vector<8x128xf32>
    %cst_44 = arith.constant 1.000000e+00 : f32
    %65 = vector.broadcast %cst_44 : f32 to vector<8x128xf32>
    %66 = arith.addf %65, %64 : vector<8x128xf32>
    %67 = arith.divf %65, %66 : vector<8x128xf32>
    %68 = vector.extract_strided_slice %56 {offsets = [0, 128], sizes = [8, 128], strides = [1, 1]} : vector<8x384xf32> to vector<8x128xf32>
    %69 = vector.extract_strided_slice %59 {offsets = [0, 128], sizes = [8, 128], strides = [1, 1]} : vector<8x384xf32> to vector<8x128xf32>
    %70 = arith.addf %68, %69 : vector<8x128xf32>
    %71 = arith.negf %70 : vector<8x128xf32>
    %72 = math.exp %71 : vector<8x128xf32>
    %cst_45 = arith.constant 1.000000e+00 : f32
    %73 = vector.broadcast %cst_45 : f32 to vector<8x128xf32>
    %74 = arith.addf %73, %72 : vector<8x128xf32>
    %75 = arith.divf %73, %74 : vector<8x128xf32>
    %76 = vector.extract_strided_slice %56 {offsets = [0, 256], sizes = [8, 128], strides = [1, 1]} : vector<8x384xf32> to vector<8x128xf32>
    %77 = vector.extract_strided_slice %59 {offsets = [0, 256], sizes = [8, 128], strides = [1, 1]} : vector<8x384xf32> to vector<8x128xf32>
    %78 = arith.mulf %67, %77 : vector<8x128xf32>
    %79 = arith.addf %76, %78 : vector<8x128xf32>
    %80 = math.tanh %79 : vector<8x128xf32>
    %81 = arith.subf %52, %80 : vector<8x128xf32>
    %82 = arith.mulf %75, %81 : vector<8x128xf32>
    %83 = arith.addf %80, %82 : vector<8x128xf32>
    %84 = arith.index_cast %54 : i32 to index
    %c0_46 = arith.constant 0 : index
    %85 = vector.load %arg14[%84, %c0_46] : memref<64x128xf32, #tpu.memory_space<vmem>>, vector<8x128xf32>
    tpu.vector_store %arg14[%84, %c0_46], %83 {strides = array<i32>} : memref<64x128xf32, #tpu.memory_space<vmem>>, vector<8x128xf32>,
    %c1_i32 = arith.constant 1 : i32
    %c8_i32_47 = arith.constant 8 : i32
    %86 = arith.muli %c1_i32, %c8_i32_47 : i32
    %87 = tpu.assume_multiple %86, 8 : i32
    %88 = arith.index_cast %87 : i32 to index
    %c0_48 = arith.constant 0 : index
    %89 = vector.load %arg13[%88, %c0_48] : memref<64x384xf32, #tpu.memory_space<vmem>>, vector<8x384xf32>
    %90 = arith.truncf %83 : vector<8x128xf32> to vector<8x128xbf16>
    %cst_49 = arith.constant dense<0.000000e+00> : vector<8x384xf32>
    %91 = tpu.matmul %90, %48, %cst_49 {dimension_numbers = #tpu.dot_dimension_numbers<[1], [0], [0], [1], [0, 0, 1, 1], [], []>} : vector<8x128xbf16>, vector<128x384xbf16>, vector<8x384xf32> -> vector<8x384xf32>
    %92 = arith.addf %91, %51 : vector<8x384xf32>
    %93 = vector.extract_strided_slice %89 {offsets = [0, 0], sizes = [8, 128], strides = [1, 1]} : vector<8x384xf32> to vector<8x128xf32>
    %94 = vector.extract_strided_slice %92 {offsets = [0, 0], sizes = [8, 128], strides = [1, 1]} : vector<8x384xf32> to vector<8x128xf32>
    %95 = arith.addf %93, %94 : vector<8x128xf32>
    %96 = arith.negf %95 : vector<8x128xf32>
    %97 = math.exp %96 : vector<8x128xf32>
    %cst_50 = arith.constant 1.000000e+00 : f32
    %98 = vector.broadcast %cst_50 : f32 to vector<8x128xf32>
    %99 = arith.addf %98, %97 : vector<8x128xf32>
    %100 = arith.divf %98, %99 : vector<8x128xf32>
    %101 = vector.extract_strided_slice %89 {offsets = [0, 128], sizes = [8, 128], strides = [1, 1]} : vector<8x384xf32> to vector<8x128xf32>
    %102 = vector.extract_strided_slice %92 {offsets = [0, 128], sizes = [8, 128], strides = [1, 1]} : vector<8x384xf32> to vector<8x128xf32>
    %103 = arith.addf %101, %102 : vector<8x128xf32>
    %104 = arith.negf %103 : vector<8x128xf32>
    %105 = math.exp %104 : vector<8x128xf32>
    %cst_51 = arith.constant 1.000000e+00 : f32
    %106 = vector.broadcast %cst_51 : f32 to vector<8x128xf32>
    %107 = arith.addf %106, %105 : vector<8x128xf32>
    %108 = arith.divf %106, %107 : vector<8x128xf32>
    %109 = vector.extract_strided_slice %89 {offsets = [0, 256], sizes = [8, 128], strides = [1, 1]} : vector<8x384xf32> to vector<8x128xf32>
    %110 = vector.extract_strided_slice %92 {offsets = [0, 256], sizes = [8, 128], strides = [1, 1]} : vector<8x384xf32> to vector<8x128xf32>
    %111 = arith.mulf %100, %110 : vector<8x128xf32>
    %112 = arith.addf %109, %111 : vector<8x128xf32>
    %113 = math.tanh %112 : vector<8x128xf32>
    %114 = arith.subf %83, %113 : vector<8x128xf32>
    %115 = arith.mulf %108, %114 : vector<8x128xf32>
    %116 = arith.addf %113, %115 : vector<8x128xf32>
    %117 = arith.index_cast %87 : i32 to index
    %c0_52 = arith.constant 0 : index
    %118 = vector.load %arg14[%117, %c0_52] : memref<64x128xf32, #tpu.memory_space<vmem>>, vector<8x128xf32>
    tpu.vector_store %arg14[%117, %c0_52], %116 {strides = array<i32>} : memref<64x128xf32, #tpu.memory_space<vmem>>, vector<8x128xf32>,
    %c2_i32 = arith.constant 2 : i32
    %c8_i32_53 = arith.constant 8 : i32
    %119 = arith.muli %c2_i32, %c8_i32_53 : i32
    %120 = tpu.assume_multiple %119, 8 : i32
    %121 = arith.index_cast %120 : i32 to index
    %c0_54 = arith.constant 0 : index
    %122 = vector.load %arg13[%121, %c0_54] : memref<64x384xf32, #tpu.memory_space<vmem>>, vector<8x384xf32>
    %123 = arith.truncf %116 : vector<8x128xf32> to vector<8x128xbf16>
    %cst_55 = arith.constant dense<0.000000e+00> : vector<8x384xf32>
    %124 = tpu.matmul %123, %48, %cst_55 {dimension_numbers = #tpu.dot_dimension_numbers<[1], [0], [0], [1], [0, 0, 1, 1], [], []>} : vector<8x128xbf16>, vector<128x384xbf16>, vector<8x384xf32> -> vector<8x384xf32>
    %125 = arith.addf %124, %51 : vector<8x384xf32>
    %126 = vector.extract_strided_slice %122 {offsets = [0, 0], sizes = [8, 128], strides = [1, 1]} : vector<8x384xf32> to vector<8x128xf32>
    %127 = vector.extract_strided_slice %125 {offsets = [0, 0], sizes = [8, 128], strides = [1, 1]} : vector<8x384xf32> to vector<8x128xf32>
    %128 = arith.addf %126, %127 : vector<8x128xf32>
    %129 = arith.negf %128 : vector<8x128xf32>
    %130 = math.exp %129 : vector<8x128xf32>
    %cst_56 = arith.constant 1.000000e+00 : f32
    %131 = vector.broadcast %cst_56 : f32 to vector<8x128xf32>
    %132 = arith.addf %131, %130 : vector<8x128xf32>
    %133 = arith.divf %131, %132 : vector<8x128xf32>
    %134 = vector.extract_strided_slice %122 {offsets = [0, 128], sizes = [8, 128], strides = [1, 1]} : vector<8x384xf32> to vector<8x128xf32>
    %135 = vector.extract_strided_slice %125 {offsets = [0, 128], sizes = [8, 128], strides = [1, 1]} : vector<8x384xf32> to vector<8x128xf32>
    %136 = arith.addf %134, %135 : vector<8x128xf32>
    %137 = arith.negf %136 : vector<8x128xf32>
    %138 = math.exp %137 : vector<8x128xf32>
    %cst_57 = arith.constant 1.000000e+00 : f32
    %139 = vector.broadcast %cst_57 : f32 to vector<8x128xf32>
    %140 = arith.addf %139, %138 : vector<8x128xf32>
    %141 = arith.divf %139, %140 : vector<8x128xf32>
    %142 = vector.extract_strided_slice %122 {offsets = [0, 256], sizes = [8, 128], strides = [1, 1]} : vector<8x384xf32> to vector<8x128xf32>
    %143 = vector.extract_strided_slice %125 {offsets = [0, 256], sizes = [8, 128], strides = [1, 1]} : vector<8x384xf32> to vector<8x128xf32>
    %144 = arith.mulf %133, %143 : vector<8x128xf32>
    %145 = arith.addf %142, %144 : vector<8x128xf32>
    %146 = math.tanh %145 : vector<8x128xf32>
    %147 = arith.subf %116, %146 : vector<8x128xf32>
    %148 = arith.mulf %141, %147 : vector<8x128xf32>
    %149 = arith.addf %146, %148 : vector<8x128xf32>
    %150 = arith.index_cast %120 : i32 to index
    %c0_58 = arith.constant 0 : index
    %151 = vector.load %arg14[%150, %c0_58] : memref<64x128xf32, #tpu.memory_space<vmem>>, vector<8x128xf32>
    tpu.vector_store %arg14[%150, %c0_58], %149 {strides = array<i32>} : memref<64x128xf32, #tpu.memory_space<vmem>>, vector<8x128xf32>,
    %c3_i32 = arith.constant 3 : i32
    %c8_i32_59 = arith.constant 8 : i32
    %152 = arith.muli %c3_i32, %c8_i32_59 : i32
    %153 = tpu.assume_multiple %152, 8 : i32
    %154 = arith.index_cast %153 : i32 to index
    %c0_60 = arith.constant 0 : index
    %155 = vector.load %arg13[%154, %c0_60] : memref<64x384xf32, #tpu.memory_space<vmem>>, vector<8x384xf32>
    %156 = arith.truncf %149 : vector<8x128xf32> to vector<8x128xbf16>
    %cst_61 = arith.constant dense<0.000000e+00> : vector<8x384xf32>
    %157 = tpu.matmul %156, %48, %cst_61 {dimension_numbers = #tpu.dot_dimension_numbers<[1], [0], [0], [1], [0, 0, 1, 1], [], []>} : vector<8x128xbf16>, vector<128x384xbf16>, vector<8x384xf32> -> vector<8x384xf32>
    %158 = arith.addf %157, %51 : vector<8x384xf32>
    %159 = vector.extract_strided_slice %155 {offsets = [0, 0], sizes = [8, 128], strides = [1, 1]} : vector<8x384xf32> to vector<8x128xf32>
    %160 = vector.extract_strided_slice %158 {offsets = [0, 0], sizes = [8, 128], strides = [1, 1]} : vector<8x384xf32> to vector<8x128xf32>
    %161 = arith.addf %159, %160 : vector<8x128xf32>
    %162 = arith.negf %161 : vector<8x128xf32>
    %163 = math.exp %162 : vector<8x128xf32>
    %cst_62 = arith.constant 1.000000e+00 : f32
    %164 = vector.broadcast %cst_62 : f32 to vector<8x128xf32>
    %165 = arith.addf %164, %163 : vector<8x128xf32>
    %166 = arith.divf %164, %165 : vector<8x128xf32>
    %167 = vector.extract_strided_slice %155 {offsets = [0, 128], sizes = [8, 128], strides = [1, 1]} : vector<8x384xf32> to vector<8x128xf32>
    %168 = vector.extract_strided_slice %158 {offsets = [0, 128], sizes = [8, 128], strides = [1, 1]} : vector<8x384xf32> to vector<8x128xf32>
    %169 = arith.addf %167, %168 : vector<8x128xf32>
    %170 = arith.negf %169 : vector<8x128xf32>
    %171 = math.exp %170 : vector<8x128xf32>
    %cst_63 = arith.constant 1.000000e+00 : f32
    %172 = vector.broadcast %cst_63 : f32 to vector<8x128xf32>
    %173 = arith.addf %172, %171 : vector<8x128xf32>
    %174 = arith.divf %172, %173 : vector<8x128xf32>
    %175 = vector.extract_strided_slice %155 {offsets = [0, 256], sizes = [8, 128], strides = [1, 1]} : vector<8x384xf32> to vector<8x128xf32>
    %176 = vector.extract_strided_slice %158 {offsets = [0, 256], sizes = [8, 128], strides = [1, 1]} : vector<8x384xf32> to vector<8x128xf32>
    %177 = arith.mulf %166, %176 : vector<8x128xf32>
    %178 = arith.addf %175, %177 : vector<8x128xf32>
    %179 = math.tanh %178 : vector<8x128xf32>
    %180 = arith.subf %149, %179 : vector<8x128xf32>
    %181 = arith.mulf %174, %180 : vector<8x128xf32>
    %182 = arith.addf %179, %181 : vector<8x128xf32>
    %183 = arith.index_cast %153 : i32 to index
    %c0_64 = arith.constant 0 : index
    %184 = vector.load %arg14[%183, %c0_64] : memref<64x128xf32, #tpu.memory_space<vmem>>, vector<8x128xf32>
    tpu.vector_store %arg14[%183, %c0_64], %182 {strides = array<i32>} : memref<64x128xf32, #tpu.memory_space<vmem>>, vector<8x128xf32>,
    %c4_i32 = arith.constant 4 : i32
    %c8_i32_65 = arith.constant 8 : i32
    %185 = arith.muli %c4_i32, %c8_i32_65 : i32
    %186 = tpu.assume_multiple %185, 8 : i32
    %187 = arith.index_cast %186 : i32 to index
    %c0_66 = arith.constant 0 : index
    %188 = vector.load %arg13[%187, %c0_66] : memref<64x384xf32, #tpu.memory_space<vmem>>, vector<8x384xf32>
    %189 = arith.truncf %182 : vector<8x128xf32> to vector<8x128xbf16>
    %cst_67 = arith.constant dense<0.000000e+00> : vector<8x384xf32>
    %190 = tpu.matmul %189, %48, %cst_67 {dimension_numbers = #tpu.dot_dimension_numbers<[1], [0], [0], [1], [0, 0, 1, 1], [], []>} : vector<8x128xbf16>, vector<128x384xbf16>, vector<8x384xf32> -> vector<8x384xf32>
    %191 = arith.addf %190, %51 : vector<8x384xf32>
    %192 = vector.extract_strided_slice %188 {offsets = [0, 0], sizes = [8, 128], strides = [1, 1]} : vector<8x384xf32> to vector<8x128xf32>
    %193 = vector.extract_strided_slice %191 {offsets = [0, 0], sizes = [8, 128], strides = [1, 1]} : vector<8x384xf32> to vector<8x128xf32>
    %194 = arith.addf %192, %193 : vector<8x128xf32>
    %195 = arith.negf %194 : vector<8x128xf32>
    %196 = math.exp %195 : vector<8x128xf32>
    %cst_68 = arith.constant 1.000000e+00 : f32
    %197 = vector.broadcast %cst_68 : f32 to vector<8x128xf32>
    %198 = arith.addf %197, %196 : vector<8x128xf32>
    %199 = arith.divf %197, %198 : vector<8x128xf32>
    %200 = vector.extract_strided_slice %188 {offsets = [0, 128], sizes = [8, 128], strides = [1, 1]} : vector<8x384xf32> to vector<8x128xf32>
    %201 = vector.extract_strided_slice %191 {offsets = [0, 128], sizes = [8, 128], strides = [1, 1]} : vector<8x384xf32> to vector<8x128xf32>
    %202 = arith.addf %200, %201 : vector<8x128xf32>
    %203 = arith.negf %202 : vector<8x128xf32>
    %204 = math.exp %203 : vector<8x128xf32>
    %cst_69 = arith.constant 1.000000e+00 : f32
    %205 = vector.broadcast %cst_69 : f32 to vector<8x128xf32>
    %206 = arith.addf %205, %204 : vector<8x128xf32>
    %207 = arith.divf %205, %206 : vector<8x128xf32>
    %208 = vector.extract_strided_slice %188 {offsets = [0, 256], sizes = [8, 128], strides = [1, 1]} : vector<8x384xf32> to vector<8x128xf32>
    %209 = vector.extract_strided_slice %191 {offsets = [0, 256], sizes = [8, 128], strides = [1, 1]} : vector<8x384xf32> to vector<8x128xf32>
    %210 = arith.mulf %199, %209 : vector<8x128xf32>
    %211 = arith.addf %208, %210 : vector<8x128xf32>
    %212 = math.tanh %211 : vector<8x128xf32>
    %213 = arith.subf %182, %212 : vector<8x128xf32>
    %214 = arith.mulf %207, %213 : vector<8x128xf32>
    %215 = arith.addf %212, %214 : vector<8x128xf32>
    %216 = arith.index_cast %186 : i32 to index
    %c0_70 = arith.constant 0 : index
    %217 = vector.load %arg14[%216, %c0_70] : memref<64x128xf32, #tpu.memory_space<vmem>>, vector<8x128xf32>
    tpu.vector_store %arg14[%216, %c0_70], %215 {strides = array<i32>} : memref<64x128xf32, #tpu.memory_space<vmem>>, vector<8x128xf32>,
    %c5_i32 = arith.constant 5 : i32
    %c8_i32_71 = arith.constant 8 : i32
    %218 = arith.muli %c5_i32, %c8_i32_71 : i32
    %219 = tpu.assume_multiple %218, 8 : i32
    %220 = arith.index_cast %219 : i32 to index
    %c0_72 = arith.constant 0 : index
    %221 = vector.load %arg13[%220, %c0_72] : memref<64x384xf32, #tpu.memory_space<vmem>>, vector<8x384xf32>
    %222 = arith.truncf %215 : vector<8x128xf32> to vector<8x128xbf16>
    %cst_73 = arith.constant dense<0.000000e+00> : vector<8x384xf32>
    %223 = tpu.matmul %222, %48, %cst_73 {dimension_numbers = #tpu.dot_dimension_numbers<[1], [0], [0], [1], [0, 0, 1, 1], [], []>} : vector<8x128xbf16>, vector<128x384xbf16>, vector<8x384xf32> -> vector<8x384xf32>
    %224 = arith.addf %223, %51 : vector<8x384xf32>
    %225 = vector.extract_strided_slice %221 {offsets = [0, 0], sizes = [8, 128], strides = [1, 1]} : vector<8x384xf32> to vector<8x128xf32>
    %226 = vector.extract_strided_slice %224 {offsets = [0, 0], sizes = [8, 128], strides = [1, 1]} : vector<8x384xf32> to vector<8x128xf32>
    %227 = arith.addf %225, %226 : vector<8x128xf32>
    %228 = arith.negf %227 : vector<8x128xf32>
    %229 = math.exp %228 : vector<8x128xf32>
    %cst_74 = arith.constant 1.000000e+00 : f32
    %230 = vector.broadcast %cst_74 : f32 to vector<8x128xf32>
    %231 = arith.addf %230, %229 : vector<8x128xf32>
    %232 = arith.divf %230, %231 : vector<8x128xf32>
    %233 = vector.extract_strided_slice %221 {offsets = [0, 128], sizes = [8, 128], strides = [1, 1]} : vector<8x384xf32> to vector<8x128xf32>
    %234 = vector.extract_strided_slice %224 {offsets = [0, 128], sizes = [8, 128], strides = [1, 1]} : vector<8x384xf32> to vector<8x128xf32>
    %235 = arith.addf %233, %234 : vector<8x128xf32>
    %236 = arith.negf %235 : vector<8x128xf32>
    %237 = math.exp %236 : vector<8x128xf32>
    %cst_75 = arith.constant 1.000000e+00 : f32
    %238 = vector.broadcast %cst_75 : f32 to vector<8x128xf32>
    %239 = arith.addf %238, %237 : vector<8x128xf32>
    %240 = arith.divf %238, %239 : vector<8x128xf32>
    %241 = vector.extract_strided_slice %221 {offsets = [0, 256], sizes = [8, 128], strides = [1, 1]} : vector<8x384xf32> to vector<8x128xf32>
    %242 = vector.extract_strided_slice %224 {offsets = [0, 256], sizes = [8, 128], strides = [1, 1]} : vector<8x384xf32> to vector<8x128xf32>
    %243 = arith.mulf %232, %242 : vector<8x128xf32>
    %244 = arith.addf %241, %243 : vector<8x128xf32>
    %245 = math.tanh %244 : vector<8x128xf32>
    %246 = arith.subf %215, %245 : vector<8x128xf32>
    %247 = arith.mulf %240, %246 : vector<8x128xf32>
    %248 = arith.addf %245, %247 : vector<8x128xf32>
    %249 = arith.index_cast %219 : i32 to index
    %c0_76 = arith.constant 0 : index
    %250 = vector.load %arg14[%249, %c0_76] : memref<64x128xf32, #tpu.memory_space<vmem>>, vector<8x128xf32>
    tpu.vector_store %arg14[%249, %c0_76], %248 {strides = array<i32>} : memref<64x128xf32, #tpu.memory_space<vmem>>, vector<8x128xf32>,
    %c6_i32 = arith.constant 6 : i32
    %c8_i32_77 = arith.constant 8 : i32
    %251 = arith.muli %c6_i32, %c8_i32_77 : i32
    %252 = tpu.assume_multiple %251, 8 : i32
    %253 = arith.index_cast %252 : i32 to index
    %c0_78 = arith.constant 0 : index
    %254 = vector.load %arg13[%253, %c0_78] : memref<64x384xf32, #tpu.memory_space<vmem>>, vector<8x384xf32>
    %255 = arith.truncf %248 : vector<8x128xf32> to vector<8x128xbf16>
    %cst_79 = arith.constant dense<0.000000e+00> : vector<8x384xf32>
    %256 = tpu.matmul %255, %48, %cst_79 {dimension_numbers = #tpu.dot_dimension_numbers<[1], [0], [0], [1], [0, 0, 1, 1], [], []>} : vector<8x128xbf16>, vector<128x384xbf16>, vector<8x384xf32> -> vector<8x384xf32>
    %257 = arith.addf %256, %51 : vector<8x384xf32>
    %258 = vector.extract_strided_slice %254 {offsets = [0, 0], sizes = [8, 128], strides = [1, 1]} : vector<8x384xf32> to vector<8x128xf32>
    %259 = vector.extract_strided_slice %257 {offsets = [0, 0], sizes = [8, 128], strides = [1, 1]} : vector<8x384xf32> to vector<8x128xf32>
    %260 = arith.addf %258, %259 : vector<8x128xf32>
    %261 = arith.negf %260 : vector<8x128xf32>
    %262 = math.exp %261 : vector<8x128xf32>
    %cst_80 = arith.constant 1.000000e+00 : f32
    %263 = vector.broadcast %cst_80 : f32 to vector<8x128xf32>
    %264 = arith.addf %263, %262 : vector<8x128xf32>
    %265 = arith.divf %263, %264 : vector<8x128xf32>
    %266 = vector.extract_strided_slice %254 {offsets = [0, 128], sizes = [8, 128], strides = [1, 1]} : vector<8x384xf32> to vector<8x128xf32>
    %267 = vector.extract_strided_slice %257 {offsets = [0, 128], sizes = [8, 128], strides = [1, 1]} : vector<8x384xf32> to vector<8x128xf32>
    %268 = arith.addf %266, %267 : vector<8x128xf32>
    %269 = arith.negf %268 : vector<8x128xf32>
    %270 = math.exp %269 : vector<8x128xf32>
    %cst_81 = arith.constant 1.000000e+00 : f32
    %271 = vector.broadcast %cst_81 : f32 to vector<8x128xf32>
    %272 = arith.addf %271, %270 : vector<8x128xf32>
    %273 = arith.divf %271, %272 : vector<8x128xf32>
    %274 = vector.extract_strided_slice %254 {offsets = [0, 256], sizes = [8, 128], strides = [1, 1]} : vector<8x384xf32> to vector<8x128xf32>
    %275 = vector.extract_strided_slice %257 {offsets = [0, 256], sizes = [8, 128], strides = [1, 1]} : vector<8x384xf32> to vector<8x128xf32>
    %276 = arith.mulf %265, %275 : vector<8x128xf32>
    %277 = arith.addf %274, %276 : vector<8x128xf32>
    %278 = math.tanh %277 : vector<8x128xf32>
    %279 = arith.subf %248, %278 : vector<8x128xf32>
    %280 = arith.mulf %273, %279 : vector<8x128xf32>
    %281 = arith.addf %278, %280 : vector<8x128xf32>
    %282 = arith.index_cast %252 : i32 to index
    %c0_82 = arith.constant 0 : index
    %283 = vector.load %arg14[%282, %c0_82] : memref<64x128xf32, #tpu.memory_space<vmem>>, vector<8x128xf32>
    tpu.vector_store %arg14[%282, %c0_82], %281 {strides = array<i32>} : memref<64x128xf32, #tpu.memory_space<vmem>>, vector<8x128xf32>,
    %c7_i32 = arith.constant 7 : i32
    %c8_i32_83 = arith.constant 8 : i32
    %284 = arith.muli %c7_i32, %c8_i32_83 : i32
    %285 = tpu.assume_multiple %284, 8 : i32
    %286 = arith.index_cast %285 : i32 to index
    %c0_84 = arith.constant 0 : index
    %287 = vector.load %arg13[%286, %c0_84] : memref<64x384xf32, #tpu.memory_space<vmem>>, vector<8x384xf32>
    %288 = arith.truncf %281 : vector<8x128xf32> to vector<8x128xbf16>
    %cst_85 = arith.constant dense<0.000000e+00> : vector<8x384xf32>
    %289 = tpu.matmul %288, %48, %cst_85 {dimension_numbers = #tpu.dot_dimension_numbers<[1], [0], [0], [1], [0, 0, 1, 1], [], []>} : vector<8x128xbf16>, vector<128x384xbf16>, vector<8x384xf32> -> vector<8x384xf32>
    %290 = arith.addf %289, %51 : vector<8x384xf32>
    %291 = vector.extract_strided_slice %287 {offsets = [0, 0], sizes = [8, 128], strides = [1, 1]} : vector<8x384xf32> to vector<8x128xf32>
    %292 = vector.extract_strided_slice %290 {offsets = [0, 0], sizes = [8, 128], strides = [1, 1]} : vector<8x384xf32> to vector<8x128xf32>
    %293 = arith.addf %291, %292 : vector<8x128xf32>
    %294 = arith.negf %293 : vector<8x128xf32>
    %295 = math.exp %294 : vector<8x128xf32>
    %cst_86 = arith.constant 1.000000e+00 : f32
    %296 = vector.broadcast %cst_86 : f32 to vector<8x128xf32>
    %297 = arith.addf %296, %295 : vector<8x128xf32>
    %298 = arith.divf %296, %297 : vector<8x128xf32>
    %299 = vector.extract_strided_slice %287 {offsets = [0, 128], sizes = [8, 128], strides = [1, 1]} : vector<8x384xf32> to vector<8x128xf32>
    %300 = vector.extract_strided_slice %290 {offsets = [0, 128], sizes = [8, 128], strides = [1, 1]} : vector<8x384xf32> to vector<8x128xf32>
    %301 = arith.addf %299, %300 : vector<8x128xf32>
    %302 = arith.negf %301 : vector<8x128xf32>
    %303 = math.exp %302 : vector<8x128xf32>
    %cst_87 = arith.constant 1.000000e+00 : f32
    %304 = vector.broadcast %cst_87 : f32 to vector<8x128xf32>
    %305 = arith.addf %304, %303 : vector<8x128xf32>
    %306 = arith.divf %304, %305 : vector<8x128xf32>
    %307 = vector.extract_strided_slice %287 {offsets = [0, 256], sizes = [8, 128], strides = [1, 1]} : vector<8x384xf32> to vector<8x128xf32>
    %308 = vector.extract_strided_slice %290 {offsets = [0, 256], sizes = [8, 128], strides = [1, 1]} : vector<8x384xf32> to vector<8x128xf32>
    %309 = arith.mulf %298, %308 : vector<8x128xf32>
    %310 = arith.addf %307, %309 : vector<8x128xf32>
    %311 = math.tanh %310 : vector<8x128xf32>
    %312 = arith.subf %281, %311 : vector<8x128xf32>
    %313 = arith.mulf %306, %312 : vector<8x128xf32>
    %314 = arith.addf %311, %313 : vector<8x128xf32>
    %315 = arith.index_cast %285 : i32 to index
    %c0_88 = arith.constant 0 : index
    %316 = vector.load %arg14[%315, %c0_88] : memref<64x128xf32, #tpu.memory_space<vmem>>, vector<8x128xf32>
    tpu.vector_store %arg14[%315, %c0_88], %314 {strides = array<i32>} : memref<64x128xf32, #tpu.memory_space<vmem>>, vector<8x128xf32>,
    %c8_i32_89 = arith.constant 8 : i32
    %c0_90 = arith.constant 0 : index
    %c0_91 = arith.constant 0 : index
    %317 = vector.load %arg14[%c0_90, %c0_91] : memref<64x128xf32, #tpu.memory_space<vmem>>, vector<64x128xf32>
    %318 = arith.truncf %317 : vector<64x128xf32> to vector<64x128xbf16>
    %c0_92 = arith.constant 0 : index
    %c0_93 = arith.constant 0 : index
    %c0_94 = arith.constant 0 : index
    %319 = vector.load %arg6[%c0_92, %c0_93, %c0_94] : memref<1x128x384xbf16, #tpu.memory_space<vmem>>, vector<1x128x384xbf16>
    %320 = vector.shape_cast %319 : vector<1x128x384xbf16> to vector<128x384xbf16>
    %c1_95 = arith.constant 1 : index
    %c0_96 = arith.constant 0 : index
    %c0_97 = arith.constant 0 : index
    %321 = vector.load %arg8[%c1_95, %c0_96, %c0_97] : memref<2x2x384xf32, #tpu.memory_space<vmem>>, vector<1x2x384xf32>
    %322 = vector.shape_cast %321 : vector<1x2x384xf32> to vector<2x384xf32>
    %323 = vector.extract_strided_slice %322 {offsets = [0, 0], sizes = [1, 384], strides = [1, 1]} : vector<2x384xf32> to vector<1x384xf32>
    %cst_98 = arith.constant dense<0.000000e+00> : vector<64x384xf32>
    %324 = tpu.matmul %318, %320, %cst_98 {dimension_numbers = #tpu.dot_dimension_numbers<[1], [0], [0], [1], [0, 0, 1, 1], [], []>} : vector<64x128xbf16>, vector<128x384xbf16>, vector<64x384xf32> -> vector<64x384xf32>
    %325 = vector.broadcast %323 : vector<1x384xf32> to vector<64x384xf32>
    %326 = arith.addf %324, %325 : vector<64x384xf32>
    %c0_99 = arith.constant 0 : index
    %c0_100 = arith.constant 0 : index
    %327 = vector.load %arg13[%c0_99, %c0_100] : memref<64x384xf32, #tpu.memory_space<vmem>>, vector<64x384xf32>
    tpu.vector_store %arg13[%c0_99, %c0_100], %326 {strides = array<i32>} : memref<64x384xf32, #tpu.memory_space<vmem>>, vector<64x384xf32>,
    %c1_101 = arith.constant 1 : index
    %c0_102 = arith.constant 0 : index
    %c0_103 = arith.constant 0 : index
    %328 = vector.load %arg7[%c1_101, %c0_102, %c0_103] : memref<2x128x384xbf16, #tpu.memory_space<vmem>>, vector<1x128x384xbf16>
    %329 = vector.shape_cast %328 : vector<1x128x384xbf16> to vector<128x384xbf16>
    %330 = vector.extract_strided_slice %322 {offsets = [1, 0], sizes = [1, 384], strides = [1, 1]} : vector<2x384xf32> to vector<1x384xf32>
    %331 = vector.shape_cast %330 : vector<1x384xf32> to vector<1x384xf32>
    %332 = vector.broadcast %331 : vector<1x384xf32> to vector<8x384xf32>
    %cst_104 = arith.constant 0.000000e+00 : f32
    %333 = vector.broadcast %cst_104 : f32 to vector<8x128xf32>
    %c0_i32_105 = arith.constant 0 : i32
    %c8_i32_106 = arith.constant 8 : i32
    %334 = arith.muli %c0_i32_105, %c8_i32_106 : i32
    %335 = tpu.assume_multiple %334, 8 : i32
    %336 = arith.index_cast %335 : i32 to index
    %c0_107 = arith.constant 0 : index
    %337 = vector.load %arg13[%336, %c0_107] : memref<64x384xf32, #tpu.memory_space<vmem>>, vector<8x384xf32>
    %338 = arith.truncf %333 : vector<8x128xf32> to vector<8x128xbf16>
    %cst_108 = arith.constant dense<0.000000e+00> : vector<8x384xf32>
    %339 = tpu.matmul %338, %329, %cst_108 {dimension_numbers = #tpu.dot_dimension_numbers<[1], [0], [0], [1], [0, 0, 1, 1], [], []>} : vector<8x128xbf16>, vector<128x384xbf16>, vector<8x384xf32> -> vector<8x384xf32>
    %340 = arith.addf %339, %332 : vector<8x384xf32>
    %341 = vector.extract_strided_slice %337 {offsets = [0, 0], sizes = [8, 128], strides = [1, 1]} : vector<8x384xf32> to vector<8x128xf32>
    %342 = vector.extract_strided_slice %340 {offsets = [0, 0], sizes = [8, 128], strides = [1, 1]} : vector<8x384xf32> to vector<8x128xf32>
    %343 = arith.addf %341, %342 : vector<8x128xf32>
    %344 = arith.negf %343 : vector<8x128xf32>
    %345 = math.exp %344 : vector<8x128xf32>
    %cst_109 = arith.constant 1.000000e+00 : f32
    %346 = vector.broadcast %cst_109 : f32 to vector<8x128xf32>
    %347 = arith.addf %346, %345 : vector<8x128xf32>
    %348 = arith.divf %346, %347 : vector<8x128xf32>
    %349 = vector.extract_strided_slice %337 {offsets = [0, 128], sizes = [8, 128], strides = [1, 1]} : vector<8x384xf32> to vector<8x128xf32>
    %350 = vector.extract_strided_slice %340 {offsets = [0, 128], sizes = [8, 128], strides = [1, 1]} : vector<8x384xf32> to vector<8x128xf32>
    %351 = arith.addf %349, %350 : vector<8x128xf32>
    %352 = arith.negf %351 : vector<8x128xf32>
    %353 = math.exp %352 : vector<8x128xf32>
    %cst_110 = arith.constant 1.000000e+00 : f32
    %354 = vector.broadcast %cst_110 : f32 to vector<8x128xf32>
    %355 = arith.addf %354, %353 : vector<8x128xf32>
    %356 = arith.divf %354, %355 : vector<8x128xf32>
    %357 = vector.extract_strided_slice %337 {offsets = [0, 256], sizes = [8, 128], strides = [1, 1]} : vector<8x384xf32> to vector<8x128xf32>
    %358 = vector.extract_strided_slice %340 {offsets = [0, 256], sizes = [8, 128], strides = [1, 1]} : vector<8x384xf32> to vector<8x128xf32>
    %359 = arith.mulf %348, %358 : vector<8x128xf32>
    %360 = arith.addf %357, %359 : vector<8x128xf32>
    %361 = math.tanh %360 : vector<8x128xf32>
    %362 = arith.subf %333, %361 : vector<8x128xf32>
    %363 = arith.mulf %356, %362 : vector<8x128xf32>
    %364 = arith.addf %361, %363 : vector<8x128xf32>
    %c1_i32_111 = arith.constant 1 : i32
    %c8_i32_112 = arith.constant 8 : i32
    %365 = arith.muli %c1_i32_111, %c8_i32_112 : i32
    %366 = tpu.assume_multiple %365, 8 : i32
    %367 = arith.index_cast %366 : i32 to index
    %c0_113 = arith.constant 0 : index
    %368 = vector.load %arg13[%367, %c0_113] : memref<64x384xf32, #tpu.memory_space<vmem>>, vector<8x384xf32>
    %369 = arith.truncf %364 : vector<8x128xf32> to vector<8x128xbf16>
    %cst_114 = arith.constant dense<0.000000e+00> : vector<8x384xf32>
    %370 = tpu.matmul %369, %329, %cst_114 {dimension_numbers = #tpu.dot_dimension_numbers<[1], [0], [0], [1], [0, 0, 1, 1], [], []>} : vector<8x128xbf16>, vector<128x384xbf16>, vector<8x384xf32> -> vector<8x384xf32>
    %371 = arith.addf %370, %332 : vector<8x384xf32>
    %372 = vector.extract_strided_slice %368 {offsets = [0, 0], sizes = [8, 128], strides = [1, 1]} : vector<8x384xf32> to vector<8x128xf32>
    %373 = vector.extract_strided_slice %371 {offsets = [0, 0], sizes = [8, 128], strides = [1, 1]} : vector<8x384xf32> to vector<8x128xf32>
    %374 = arith.addf %372, %373 : vector<8x128xf32>
    %375 = arith.negf %374 : vector<8x128xf32>
    %376 = math.exp %375 : vector<8x128xf32>
    %cst_115 = arith.constant 1.000000e+00 : f32
    %377 = vector.broadcast %cst_115 : f32 to vector<8x128xf32>
    %378 = arith.addf %377, %376 : vector<8x128xf32>
    %379 = arith.divf %377, %378 : vector<8x128xf32>
    %380 = vector.extract_strided_slice %368 {offsets = [0, 128], sizes = [8, 128], strides = [1, 1]} : vector<8x384xf32> to vector<8x128xf32>
    %381 = vector.extract_strided_slice %371 {offsets = [0, 128], sizes = [8, 128], strides = [1, 1]} : vector<8x384xf32> to vector<8x128xf32>
    %382 = arith.addf %380, %381 : vector<8x128xf32>
    %383 = arith.negf %382 : vector<8x128xf32>
    %384 = math.exp %383 : vector<8x128xf32>
    %cst_116 = arith.constant 1.000000e+00 : f32
    %385 = vector.broadcast %cst_116 : f32 to vector<8x128xf32>
    %386 = arith.addf %385, %384 : vector<8x128xf32>
    %387 = arith.divf %385, %386 : vector<8x128xf32>
    %388 = vector.extract_strided_slice %368 {offsets = [0, 256], sizes = [8, 128], strides = [1, 1]} : vector<8x384xf32> to vector<8x128xf32>
    %389 = vector.extract_strided_slice %371 {offsets = [0, 256], sizes = [8, 128], strides = [1, 1]} : vector<8x384xf32> to vector<8x128xf32>
    %390 = arith.mulf %379, %389 : vector<8x128xf32>
    %391 = arith.addf %388, %390 : vector<8x128xf32>
    %392 = math.tanh %391 : vector<8x128xf32>
    %393 = arith.subf %364, %392 : vector<8x128xf32>
    %394 = arith.mulf %387, %393 : vector<8x128xf32>
    %395 = arith.addf %392, %394 : vector<8x128xf32>
    %c2_i32_117 = arith.constant 2 : i32
    %c8_i32_118 = arith.constant 8 : i32
    %396 = arith.muli %c2_i32_117, %c8_i32_118 : i32
    %397 = tpu.assume_multiple %396, 8 : i32
    %398 = arith.index_cast %397 : i32 to index
    %c0_119 = arith.constant 0 : index
    %399 = vector.load %arg13[%398, %c0_119] : memref<64x384xf32, #tpu.memory_space<vmem>>, vector<8x384xf32>
    %400 = arith.truncf %395 : vector<8x128xf32> to vector<8x128xbf16>
    %cst_120 = arith.constant dense<0.000000e+00> : vector<8x384xf32>
    %401 = tpu.matmul %400, %329, %cst_120 {dimension_numbers = #tpu.dot_dimension_numbers<[1], [0], [0], [1], [0, 0, 1, 1], [], []>} : vector<8x128xbf16>, vector<128x384xbf16>, vector<8x384xf32> -> vector<8x384xf32>
    %402 = arith.addf %401, %332 : vector<8x384xf32>
    %403 = vector.extract_strided_slice %399 {offsets = [0, 0], sizes = [8, 128], strides = [1, 1]} : vector<8x384xf32> to vector<8x128xf32>
    %404 = vector.extract_strided_slice %402 {offsets = [0, 0], sizes = [8, 128], strides = [1, 1]} : vector<8x384xf32> to vector<8x128xf32>
    %405 = arith.addf %403, %404 : vector<8x128xf32>
    %406 = arith.negf %405 : vector<8x128xf32>
    %407 = math.exp %406 : vector<8x128xf32>
    %cst_121 = arith.constant 1.000000e+00 : f32
    %408 = vector.broadcast %cst_121 : f32 to vector<8x128xf32>
    %409 = arith.addf %408, %407 : vector<8x128xf32>
    %410 = arith.divf %408, %409 : vector<8x128xf32>
    %411 = vector.extract_strided_slice %399 {offsets = [0, 128], sizes = [8, 128], strides = [1, 1]} : vector<8x384xf32> to vector<8x128xf32>
    %412 = vector.extract_strided_slice %402 {offsets = [0, 128], sizes = [8, 128], strides = [1, 1]} : vector<8x384xf32> to vector<8x128xf32>
    %413 = arith.addf %411, %412 : vector<8x128xf32>
    %414 = arith.negf %413 : vector<8x128xf32>
    %415 = math.exp %414 : vector<8x128xf32>
    %cst_122 = arith.constant 1.000000e+00 : f32
    %416 = vector.broadcast %cst_122 : f32 to vector<8x128xf32>
    %417 = arith.addf %416, %415 : vector<8x128xf32>
    %418 = arith.divf %416, %417 : vector<8x128xf32>
    %419 = vector.extract_strided_slice %399 {offsets = [0, 256], sizes = [8, 128], strides = [1, 1]} : vector<8x384xf32> to vector<8x128xf32>
    %420 = vector.extract_strided_slice %402 {offsets = [0, 256], sizes = [8, 128], strides = [1, 1]} : vector<8x384xf32> to vector<8x128xf32>
    %421 = arith.mulf %410, %420 : vector<8x128xf32>
    %422 = arith.addf %419, %421 : vector<8x128xf32>
    %423 = math.tanh %422 : vector<8x128xf32>
    %424 = arith.subf %395, %423 : vector<8x128xf32>
    %425 = arith.mulf %418, %424 : vector<8x128xf32>
    %426 = arith.addf %423, %425 : vector<8x128xf32>
    %c3_i32_123 = arith.constant 3 : i32
    %c8_i32_124 = arith.constant 8 : i32
    %427 = arith.muli %c3_i32_123, %c8_i32_124 : i32
    %428 = tpu.assume_multiple %427, 8 : i32
    %429 = arith.index_cast %428 : i32 to index
    %c0_125 = arith.constant 0 : index
    %430 = vector.load %arg13[%429, %c0_125] : memref<64x384xf32, #tpu.memory_space<vmem>>, vector<8x384xf32>
    %431 = arith.truncf %426 : vector<8x128xf32> to vector<8x128xbf16>
    %cst_126 = arith.constant dense<0.000000e+00> : vector<8x384xf32>
    %432 = tpu.matmul %431, %329, %cst_126 {dimension_numbers = #tpu.dot_dimension_numbers<[1], [0], [0], [1], [0, 0, 1, 1], [], []>} : vector<8x128xbf16>, vector<128x384xbf16>, vector<8x384xf32> -> vector<8x384xf32>
    %433 = arith.addf %432, %332 : vector<8x384xf32>
    %434 = vector.extract_strided_slice %430 {offsets = [0, 0], sizes = [8, 128], strides = [1, 1]} : vector<8x384xf32> to vector<8x128xf32>
    %435 = vector.extract_strided_slice %433 {offsets = [0, 0], sizes = [8, 128], strides = [1, 1]} : vector<8x384xf32> to vector<8x128xf32>
    %436 = arith.addf %434, %435 : vector<8x128xf32>
    %437 = arith.negf %436 : vector<8x128xf32>
    %438 = math.exp %437 : vector<8x128xf32>
    %cst_127 = arith.constant 1.000000e+00 : f32
    %439 = vector.broadcast %cst_127 : f32 to vector<8x128xf32>
    %440 = arith.addf %439, %438 : vector<8x128xf32>
    %441 = arith.divf %439, %440 : vector<8x128xf32>
    %442 = vector.extract_strided_slice %430 {offsets = [0, 128], sizes = [8, 128], strides = [1, 1]} : vector<8x384xf32> to vector<8x128xf32>
    %443 = vector.extract_strided_slice %433 {offsets = [0, 128], sizes = [8, 128], strides = [1, 1]} : vector<8x384xf32> to vector<8x128xf32>
    %444 = arith.addf %442, %443 : vector<8x128xf32>
    %445 = arith.negf %444 : vector<8x128xf32>
    %446 = math.exp %445 : vector<8x128xf32>
    %cst_128 = arith.constant 1.000000e+00 : f32
    %447 = vector.broadcast %cst_128 : f32 to vector<8x128xf32>
    %448 = arith.addf %447, %446 : vector<8x128xf32>
    %449 = arith.divf %447, %448 : vector<8x128xf32>
    %450 = vector.extract_strided_slice %430 {offsets = [0, 256], sizes = [8, 128], strides = [1, 1]} : vector<8x384xf32> to vector<8x128xf32>
    %451 = vector.extract_strided_slice %433 {offsets = [0, 256], sizes = [8, 128], strides = [1, 1]} : vector<8x384xf32> to vector<8x128xf32>
    %452 = arith.mulf %441, %451 : vector<8x128xf32>
    %453 = arith.addf %450, %452 : vector<8x128xf32>
    %454 = math.tanh %453 : vector<8x128xf32>
    %455 = arith.subf %426, %454 : vector<8x128xf32>
    %456 = arith.mulf %449, %455 : vector<8x128xf32>
    %457 = arith.addf %454, %456 : vector<8x128xf32>
    %c4_i32_129 = arith.constant 4 : i32
    %c8_i32_130 = arith.constant 8 : i32
    %458 = arith.muli %c4_i32_129, %c8_i32_130 : i32
    %459 = tpu.assume_multiple %458, 8 : i32
    %460 = arith.index_cast %459 : i32 to index
    %c0_131 = arith.constant 0 : index
    %461 = vector.load %arg13[%460, %c0_131] : memref<64x384xf32, #tpu.memory_space<vmem>>, vector<8x384xf32>
    %462 = arith.truncf %457 : vector<8x128xf32> to vector<8x128xbf16>
    %cst_132 = arith.constant dense<0.000000e+00> : vector<8x384xf32>
    %463 = tpu.matmul %462, %329, %cst_132 {dimension_numbers = #tpu.dot_dimension_numbers<[1], [0], [0], [1], [0, 0, 1, 1], [], []>} : vector<8x128xbf16>, vector<128x384xbf16>, vector<8x384xf32> -> vector<8x384xf32>
    %464 = arith.addf %463, %332 : vector<8x384xf32>
    %465 = vector.extract_strided_slice %461 {offsets = [0, 0], sizes = [8, 128], strides = [1, 1]} : vector<8x384xf32> to vector<8x128xf32>
    %466 = vector.extract_strided_slice %464 {offsets = [0, 0], sizes = [8, 128], strides = [1, 1]} : vector<8x384xf32> to vector<8x128xf32>
    %467 = arith.addf %465, %466 : vector<8x128xf32>
    %468 = arith.negf %467 : vector<8x128xf32>
    %469 = math.exp %468 : vector<8x128xf32>
    %cst_133 = arith.constant 1.000000e+00 : f32
    %470 = vector.broadcast %cst_133 : f32 to vector<8x128xf32>
    %471 = arith.addf %470, %469 : vector<8x128xf32>
    %472 = arith.divf %470, %471 : vector<8x128xf32>
    %473 = vector.extract_strided_slice %461 {offsets = [0, 128], sizes = [8, 128], strides = [1, 1]} : vector<8x384xf32> to vector<8x128xf32>
    %474 = vector.extract_strided_slice %464 {offsets = [0, 128], sizes = [8, 128], strides = [1, 1]} : vector<8x384xf32> to vector<8x128xf32>
    %475 = arith.addf %473, %474 : vector<8x128xf32>
    %476 = arith.negf %475 : vector<8x128xf32>
    %477 = math.exp %476 : vector<8x128xf32>
    %cst_134 = arith.constant 1.000000e+00 : f32
    %478 = vector.broadcast %cst_134 : f32 to vector<8x128xf32>
    %479 = arith.addf %478, %477 : vector<8x128xf32>
    %480 = arith.divf %478, %479 : vector<8x128xf32>
    %481 = vector.extract_strided_slice %461 {offsets = [0, 256], sizes = [8, 128], strides = [1, 1]} : vector<8x384xf32> to vector<8x128xf32>
    %482 = vector.extract_strided_slice %464 {offsets = [0, 256], sizes = [8, 128], strides = [1, 1]} : vector<8x384xf32> to vector<8x128xf32>
    %483 = arith.mulf %472, %482 : vector<8x128xf32>
    %484 = arith.addf %481, %483 : vector<8x128xf32>
    %485 = math.tanh %484 : vector<8x128xf32>
    %486 = arith.subf %457, %485 : vector<8x128xf32>
    %487 = arith.mulf %480, %486 : vector<8x128xf32>
    %488 = arith.addf %485, %487 : vector<8x128xf32>
    %c5_i32_135 = arith.constant 5 : i32
    %c8_i32_136 = arith.constant 8 : i32
    %489 = arith.muli %c5_i32_135, %c8_i32_136 : i32
    %490 = tpu.assume_multiple %489, 8 : i32
    %491 = arith.index_cast %490 : i32 to index
    %c0_137 = arith.constant 0 : index
    %492 = vector.load %arg13[%491, %c0_137] : memref<64x384xf32, #tpu.memory_space<vmem>>, vector<8x384xf32>
    %493 = arith.truncf %488 : vector<8x128xf32> to vector<8x128xbf16>
    %cst_138 = arith.constant dense<0.000000e+00> : vector<8x384xf32>
    %494 = tpu.matmul %493, %329, %cst_138 {dimension_numbers = #tpu.dot_dimension_numbers<[1], [0], [0], [1], [0, 0, 1, 1], [], []>} : vector<8x128xbf16>, vector<128x384xbf16>, vector<8x384xf32> -> vector<8x384xf32>
    %495 = arith.addf %494, %332 : vector<8x384xf32>
    %496 = vector.extract_strided_slice %492 {offsets = [0, 0], sizes = [8, 128], strides = [1, 1]} : vector<8x384xf32> to vector<8x128xf32>
    %497 = vector.extract_strided_slice %495 {offsets = [0, 0], sizes = [8, 128], strides = [1, 1]} : vector<8x384xf32> to vector<8x128xf32>
    %498 = arith.addf %496, %497 : vector<8x128xf32>
    %499 = arith.negf %498 : vector<8x128xf32>
    %500 = math.exp %499 : vector<8x128xf32>
    %cst_139 = arith.constant 1.000000e+00 : f32
    %501 = vector.broadcast %cst_139 : f32 to vector<8x128xf32>
    %502 = arith.addf %501, %500 : vector<8x128xf32>
    %503 = arith.divf %501, %502 : vector<8x128xf32>
    %504 = vector.extract_strided_slice %492 {offsets = [0, 128], sizes = [8, 128], strides = [1, 1]} : vector<8x384xf32> to vector<8x128xf32>
    %505 = vector.extract_strided_slice %495 {offsets = [0, 128], sizes = [8, 128], strides = [1, 1]} : vector<8x384xf32> to vector<8x128xf32>
    %506 = arith.addf %504, %505 : vector<8x128xf32>
    %507 = arith.negf %506 : vector<8x128xf32>
    %508 = math.exp %507 : vector<8x128xf32>
    %cst_140 = arith.constant 1.000000e+00 : f32
    %509 = vector.broadcast %cst_140 : f32 to vector<8x128xf32>
    %510 = arith.addf %509, %508 : vector<8x128xf32>
    %511 = arith.divf %509, %510 : vector<8x128xf32>
    %512 = vector.extract_strided_slice %492 {offsets = [0, 256], sizes = [8, 128], strides = [1, 1]} : vector<8x384xf32> to vector<8x128xf32>
    %513 = vector.extract_strided_slice %495 {offsets = [0, 256], sizes = [8, 128], strides = [1, 1]} : vector<8x384xf32> to vector<8x128xf32>
    %514 = arith.mulf %503, %513 : vector<8x128xf32>
    %515 = arith.addf %512, %514 : vector<8x128xf32>
    %516 = math.tanh %515 : vector<8x128xf32>
    %517 = arith.subf %488, %516 : vector<8x128xf32>
    %518 = arith.mulf %511, %517 : vector<8x128xf32>
    %519 = arith.addf %516, %518 : vector<8x128xf32>
    %c6_i32_141 = arith.constant 6 : i32
    %c8_i32_142 = arith.constant 8 : i32
    %520 = arith.muli %c6_i32_141, %c8_i32_142 : i32
    %521 = tpu.assume_multiple %520, 8 : i32
    %522 = arith.index_cast %521 : i32 to index
    %c0_143 = arith.constant 0 : index
    %523 = vector.load %arg13[%522, %c0_143] : memref<64x384xf32, #tpu.memory_space<vmem>>, vector<8x384xf32>
    %524 = arith.truncf %519 : vector<8x128xf32> to vector<8x128xbf16>
    %cst_144 = arith.constant dense<0.000000e+00> : vector<8x384xf32>
    %525 = tpu.matmul %524, %329, %cst_144 {dimension_numbers = #tpu.dot_dimension_numbers<[1], [0], [0], [1], [0, 0, 1, 1], [], []>} : vector<8x128xbf16>, vector<128x384xbf16>, vector<8x384xf32> -> vector<8x384xf32>
    %526 = arith.addf %525, %332 : vector<8x384xf32>
    %527 = vector.extract_strided_slice %523 {offsets = [0, 0], sizes = [8, 128], strides = [1, 1]} : vector<8x384xf32> to vector<8x128xf32>
    %528 = vector.extract_strided_slice %526 {offsets = [0, 0], sizes = [8, 128], strides = [1, 1]} : vector<8x384xf32> to vector<8x128xf32>
    %529 = arith.addf %527, %528 : vector<8x128xf32>
    %530 = arith.negf %529 : vector<8x128xf32>
    %531 = math.exp %530 : vector<8x128xf32>
    %cst_145 = arith.constant 1.000000e+00 : f32
    %532 = vector.broadcast %cst_145 : f32 to vector<8x128xf32>
    %533 = arith.addf %532, %531 : vector<8x128xf32>
    %534 = arith.divf %532, %533 : vector<8x128xf32>
    %535 = vector.extract_strided_slice %523 {offsets = [0, 128], sizes = [8, 128], strides = [1, 1]} : vector<8x384xf32> to vector<8x128xf32>
    %536 = vector.extract_strided_slice %526 {offsets = [0, 128], sizes = [8, 128], strides = [1, 1]} : vector<8x384xf32> to vector<8x128xf32>
    %537 = arith.addf %535, %536 : vector<8x128xf32>
    %538 = arith.negf %537 : vector<8x128xf32>
    %539 = math.exp %538 : vector<8x128xf32>
    %cst_146 = arith.constant 1.000000e+00 : f32
    %540 = vector.broadcast %cst_146 : f32 to vector<8x128xf32>
    %541 = arith.addf %540, %539 : vector<8x128xf32>
    %542 = arith.divf %540, %541 : vector<8x128xf32>
    %543 = vector.extract_strided_slice %523 {offsets = [0, 256], sizes = [8, 128], strides = [1, 1]} : vector<8x384xf32> to vector<8x128xf32>
    %544 = vector.extract_strided_slice %526 {offsets = [0, 256], sizes = [8, 128], strides = [1, 1]} : vector<8x384xf32> to vector<8x128xf32>
    %545 = arith.mulf %534, %544 : vector<8x128xf32>
    %546 = arith.addf %543, %545 : vector<8x128xf32>
    %547 = math.tanh %546 : vector<8x128xf32>
    %548 = arith.subf %519, %547 : vector<8x128xf32>
    %549 = arith.mulf %542, %548 : vector<8x128xf32>
    %550 = arith.addf %547, %549 : vector<8x128xf32>
    %c7_i32_147 = arith.constant 7 : i32
    %c8_i32_148 = arith.constant 8 : i32
    %551 = arith.muli %c7_i32_147, %c8_i32_148 : i32
    %552 = tpu.assume_multiple %551, 8 : i32
    %553 = arith.index_cast %552 : i32 to index
    %c0_149 = arith.constant 0 : index
    %554 = vector.load %arg13[%553, %c0_149] : memref<64x384xf32, #tpu.memory_space<vmem>>, vector<8x384xf32>
    %555 = arith.truncf %550 : vector<8x128xf32> to vector<8x128xbf16>
    %cst_150 = arith.constant dense<0.000000e+00> : vector<8x384xf32>
    %556 = tpu.matmul %555, %329, %cst_150 {dimension_numbers = #tpu.dot_dimension_numbers<[1], [0], [0], [1], [0, 0, 1, 1], [], []>} : vector<8x128xbf16>, vector<128x384xbf16>, vector<8x384xf32> -> vector<8x384xf32>
    %557 = arith.addf %556, %332 : vector<8x384xf32>
    %558 = vector.extract_strided_slice %554 {offsets = [0, 0], sizes = [8, 128], strides = [1, 1]} : vector<8x384xf32> to vector<8x128xf32>
    %559 = vector.extract_strided_slice %557 {offsets = [0, 0], sizes = [8, 128], strides = [1, 1]} : vector<8x384xf32> to vector<8x128xf32>
    %560 = arith.addf %558, %559 : vector<8x128xf32>
    %561 = arith.negf %560 : vector<8x128xf32>
    %562 = math.exp %561 : vector<8x128xf32>
    %cst_151 = arith.constant 1.000000e+00 : f32
    %563 = vector.broadcast %cst_151 : f32 to vector<8x128xf32>
    %564 = arith.addf %563, %562 : vector<8x128xf32>
    %565 = arith.divf %563, %564 : vector<8x128xf32>
    %566 = vector.extract_strided_slice %554 {offsets = [0, 128], sizes = [8, 128], strides = [1, 1]} : vector<8x384xf32> to vector<8x128xf32>
    %567 = vector.extract_strided_slice %557 {offsets = [0, 128], sizes = [8, 128], strides = [1, 1]} : vector<8x384xf32> to vector<8x128xf32>
    %568 = arith.addf %566, %567 : vector<8x128xf32>
    %569 = arith.negf %568 : vector<8x128xf32>
    %570 = math.exp %569 : vector<8x128xf32>
    %cst_152 = arith.constant 1.000000e+00 : f32
    %571 = vector.broadcast %cst_152 : f32 to vector<8x128xf32>
    %572 = arith.addf %571, %570 : vector<8x128xf32>
    %573 = arith.divf %571, %572 : vector<8x128xf32>
    %574 = vector.extract_strided_slice %554 {offsets = [0, 256], sizes = [8, 128], strides = [1, 1]} : vector<8x384xf32> to vector<8x128xf32>
    %575 = vector.extract_strided_slice %557 {offsets = [0, 256], sizes = [8, 128], strides = [1, 1]} : vector<8x384xf32> to vector<8x128xf32>
    %576 = arith.mulf %565, %575 : vector<8x128xf32>
    %577 = arith.addf %574, %576 : vector<8x128xf32>
    %578 = math.tanh %577 : vector<8x128xf32>
    %579 = arith.subf %550, %578 : vector<8x128xf32>
    %580 = arith.mulf %573, %579 : vector<8x128xf32>
    %581 = arith.addf %578, %580 : vector<8x128xf32>
    %c8_i32_153 = arith.constant 8 : i32
    %582 = arith.truncf %581 : vector<8x128xf32> to vector<8x128xbf16>
    %c4 = arith.constant 4 : index
    %c0_154 = arith.constant 0 : index
    %c0_155 = arith.constant 0 : index
    %583 = vector.load %arg3[%c4, %c0_154, %c0_155] : memref<7x128x128xbf16, #tpu.memory_space<vmem>>, vector<1x128x128xbf16>
    %584 = vector.shape_cast %583 : vector<1x128x128xbf16> to vector<128x128xbf16>
    %cst_156 = arith.constant dense<0.000000e+00> : vector<8x128xf32>
    %585 = tpu.matmul %582, %584, %cst_156 {dimension_numbers = #tpu.dot_dimension_numbers<[1], [0], [0], [1], [0, 0, 1, 1], [], []>} : vector<8x128xbf16>, vector<128x128xbf16>, vector<8x128xf32> -> vector<8x128xf32>
    %c4_157 = arith.constant 4 : index
    %c0_158 = arith.constant 0 : index
    %c0_159 = arith.constant 0 : index
    %586 = vector.load %arg4[%c4_157, %c0_158, %c0_159] : memref<7x1x128xf32, #tpu.memory_space<vmem>>, vector<1x1x128xf32>
    %587 = vector.shape_cast %586 : vector<1x1x128xf32> to vector<1x128xf32>
    %588 = vector.broadcast %587 : vector<1x128xf32> to vector<8x128xf32>
    %589 = arith.addf %585, %588 : vector<8x128xf32>
    %cst_160 = arith.constant 0.000000e+00 : f32
    %590 = vector.broadcast %cst_160 : f32 to vector<8x128xf32>
    %591 = arith.maximumf %589, %590 : vector<8x128xf32>
    %592 = arith.truncf %591 : vector<8x128xf32> to vector<8x128xbf16>
    %c5 = arith.constant 5 : index
    %c0_161 = arith.constant 0 : index
    %c0_162 = arith.constant 0 : index
    %593 = vector.load %arg3[%c5, %c0_161, %c0_162] : memref<7x128x128xbf16, #tpu.memory_space<vmem>>, vector<1x128x128xbf16>
    %594 = vector.shape_cast %593 : vector<1x128x128xbf16> to vector<128x128xbf16>
    %cst_163 = arith.constant dense<0.000000e+00> : vector<8x128xf32>
    %595 = tpu.matmul %592, %594, %cst_163 {dimension_numbers = #tpu.dot_dimension_numbers<[1], [0], [0], [1], [0, 0, 1, 1], [], []>} : vector<8x128xbf16>, vector<128x128xbf16>, vector<8x128xf32> -> vector<8x128xf32>
    %c5_164 = arith.constant 5 : index
    %c0_165 = arith.constant 0 : index
    %c0_166 = arith.constant 0 : index
    %596 = vector.load %arg4[%c5_164, %c0_165, %c0_166] : memref<7x1x128xf32, #tpu.memory_space<vmem>>, vector<1x1x128xf32>
    %597 = vector.shape_cast %596 : vector<1x1x128xf32> to vector<1x128xf32>
    %598 = vector.broadcast %597 : vector<1x128xf32> to vector<8x128xf32>
    %599 = arith.addf %595, %598 : vector<8x128xf32>
    %cst_167 = arith.constant 0.000000e+00 : f32
    %600 = vector.broadcast %cst_167 : f32 to vector<8x128xf32>
    %601 = arith.maximumf %599, %600 : vector<8x128xf32>
    %602 = arith.truncf %601 : vector<8x128xf32> to vector<8x128xbf16>
    %c6 = arith.constant 6 : index
    %c0_168 = arith.constant 0 : index
    %c0_169 = arith.constant 0 : index
    %603 = vector.load %arg3[%c6, %c0_168, %c0_169] : memref<7x128x128xbf16, #tpu.memory_space<vmem>>, vector<1x128x128xbf16>
    %604 = vector.shape_cast %603 : vector<1x128x128xbf16> to vector<128x128xbf16>
    %cst_170 = arith.constant dense<0.000000e+00> : vector<8x128xf32>
    %605 = tpu.matmul %602, %604, %cst_170 {dimension_numbers = #tpu.dot_dimension_numbers<[1], [0], [0], [1], [0, 0, 1, 1], [], []>} : vector<8x128xbf16>, vector<128x128xbf16>, vector<8x128xf32> -> vector<8x128xf32>
    %c6_171 = arith.constant 6 : index
    %c0_172 = arith.constant 0 : index
    %c0_173 = arith.constant 0 : index
    %606 = vector.load %arg4[%c6_171, %c0_172, %c0_173] : memref<7x1x128xf32, #tpu.memory_space<vmem>>, vector<1x1x128xf32>
    %607 = vector.shape_cast %606 : vector<1x1x128xf32> to vector<1x128xf32>
    %608 = vector.broadcast %607 : vector<1x128xf32> to vector<8x128xf32>
    %609 = arith.addf %605, %608 : vector<8x128xf32>
    %610 = vector.extract_strided_slice %37 {offsets = [0, 0], sizes = [8, 4], strides = [1, 1]} : vector<8x128xf32> to vector<8x4xf32>
    %611 = vector.extract_strided_slice %609 {offsets = [0, 0], sizes = [8, 4], strides = [1, 1]} : vector<8x128xf32> to vector<8x4xf32>
    %612 = arith.addf %610, %611 : vector<8x4xf32>
    %cst_174 = arith.constant 5.000000e-01 : f32
    %613 = vector.broadcast %cst_174 : f32 to vector<8x4xf32>
    %614 = arith.mulf %612, %613 : vector<8x4xf32>
    %615 = vector.extract_strided_slice %610 {offsets = [0, 0], sizes = [2, 4], strides = [1, 1]} : vector<8x4xf32> to vector<2x4xf32>
    %c0_175 = arith.constant 0 : index
    %c0_176 = arith.constant 0 : index
    %616 = vector.load %arg9[%c0_175, %c0_176] : memref<2x4xf32, #tpu.memory_space<vmem>>, vector<2x4xf32>
    tpu.vector_store %arg9[%c0_175, %c0_176], %615 {strides = array<i32>} : memref<2x4xf32, #tpu.memory_space<vmem>>, vector<2x4xf32>,
    %617 = vector.extract_strided_slice %611 {offsets = [0, 0], sizes = [2, 4], strides = [1, 1]} : vector<8x4xf32> to vector<2x4xf32>
    %c0_177 = arith.constant 0 : index
    %c0_178 = arith.constant 0 : index
    %618 = vector.load %arg10[%c0_177, %c0_178] : memref<2x4xf32, #tpu.memory_space<vmem>>, vector<2x4xf32>
    tpu.vector_store %arg10[%c0_177, %c0_178], %617 {strides = array<i32>} : memref<2x4xf32, #tpu.memory_space<vmem>>, vector<2x4xf32>,
    %619 = vector.extract_strided_slice %614 {offsets = [0, 0], sizes = [2, 4], strides = [1, 1]} : vector<8x4xf32> to vector<2x4xf32>
    %c0_179 = arith.constant 0 : index
    %c0_180 = arith.constant 0 : index
    %620 = vector.load %arg11[%c0_179, %c0_180] : memref<2x4xf32, #tpu.memory_space<vmem>>, vector<2x4xf32>
    tpu.vector_store %arg11[%c0_179, %c0_180], %619 {strides = array<i32>} : memref<2x4xf32, #tpu.memory_space<vmem>>, vector<2x4xf32>,
    %c0_181 = arith.constant 0 : index
    %c0_182 = arith.constant 0 : index
    %621 = vector.load %arg2[%c0_181, %c0_182] : memref<8x4xf32, #tpu.memory_space<vmem>>, vector<8x4xf32>
    %cst_183 = arith.constant dense<0.000000e+00> : vector<8xf32>
    %622 = vector.multi_reduction <add>, %621, %cst_183 [1] : vector<8x4xf32> to vector<8xf32>
    %623 = vector.shape_cast %622 : vector<8xf32> to vector<8x1xf32>
    %cst_184 = arith.constant dense<0xFF800000> : vector<8xf32>
    %624 = vector.multi_reduction <maximumf>, %614, %cst_184 [1] : vector<8x4xf32> to vector<8xf32>
    %625 = vector.shape_cast %624 : vector<8xf32> to vector<8x1xf32>
    %626 = vector.broadcast %625 : vector<8x1xf32> to vector<8x4xf32>
    %627 = arith.subf %614, %626 : vector<8x4xf32>
    %628 = math.exp %627 : vector<8x4xf32>
    %cst_185 = arith.constant dense<0.000000e+00> : vector<8xf32>
    %629 = vector.multi_reduction <add>, %628, %cst_185 [1] : vector<8x4xf32> to vector<8xf32>
    %630 = vector.shape_cast %629 : vector<8xf32> to vector<8x1xf32>
    %631 = math.log %630 : vector<8x1xf32>
    %632 = arith.addf %625, %631 : vector<8x1xf32>
    %633 = arith.mulf %621, %614 : vector<8x4xf32>
    %cst_186 = arith.constant dense<0.000000e+00> : vector<8xf32>
    %634 = vector.multi_reduction <add>, %633, %cst_186 [1] : vector<8x4xf32> to vector<8xf32>
    %635 = vector.shape_cast %634 : vector<8xf32> to vector<8x1xf32>
    %636 = arith.subf %632, %635 : vector<8x1xf32>
    %637 = arith.mulf %636, %623 : vector<8x1xf32>
    %cst_187 = arith.constant dense<0.000000e+00> : vector<1xf32>
    %638 = vector.multi_reduction <add>, %637, %cst_187 [0] : vector<8x1xf32> to vector<1xf32>
    %639 = vector.shape_cast %638 : vector<1xf32> to vector<1x1xf32>
    %cst_188 = arith.constant 5.000000e-01 : f32
    %640 = vector.broadcast %cst_188 : f32 to vector<1x1xf32>
    %641 = arith.mulf %639, %640 : vector<1x1xf32>
    %c0_189 = arith.constant 0 : index
    %c0_190 = arith.constant 0 : index
    %642 = vector.load %arg12[%c0_189, %c0_190] : memref<1x1xf32, #tpu.memory_space<vmem>>, vector<1x1xf32>
    tpu.vector_store %arg12[%c0_189, %c0_190], %641 {strides = array<i32>} : memref<1x1xf32, #tpu.memory_space<vmem>>, vector<1x1xf32>,
    return
  }
}

</mosaic_0001>

<bundles_post_ra>
// kernel: fusionnet_forward.1
= control target key start
LH: loop header
LB: loop body
LE: loop exit
PB: predicated region body
PF: predicated region fallthrough
CT: control target
= control target key end

     0   :  { %18 = vsyncpa [#allocation6], 0  ;;  %s7233_s0 = inlined_call_operand.vmem [shape: bf16[8,128], index: 0, kind: input, shape index: {}]   ;;  %s7234_s1 = inlined_call_operand.vmem [shape: bf16[64,128], index: 1, kind: input, shape index: {}]   ;;  %s7235_s2 = inlined_call_operand.vmem [shape: f32[8,4], index: 2, kind: input, shape index: {}]   ;;  %s7236_s3 = inlined_call_operand.vmem [shape: bf16[7,128,128], index: 3, kind: input, shape index: {}]   ;;  %s7237_s4 = inlined_call_operand.vmem [shape: f32[7,1,128], index: 4, kind: input, shape index: {}]   ;;  %s7238_s5 = inlined_call_operand.vmem [shape: bf16[128,384], index: 5, kind: input, shape index: {}]   ;;  %s7239_s6 = inlined_call_operand.vmem [shape: bf16[1,128,384], index: 6, kind: input, shape index: {}]   ;;  %s7240_s7 = inlined_call_operand.vmem [shape: bf16[2,128,384], index: 7, kind: input, shape index: {}]   ;;  %s7241_s8 = inlined_call_operand.vmem [shape: f32[2,2,384], index: 8, kind: input, shape index: {}]   ;;  %s7242_s9 = inlined_call_operand.hbm [shape: f32[2,4], index: 9, kind: output, shape index: {0}]   ;;  %s7243_s10 = inlined_call_operand.hbm [shape: f32[2,4], index: 10, kind: output, shape index: {1}]   ;;  %s7244_s11 = inlined_call_operand.hbm [shape: f32[2,4], index: 11, kind: output, shape index: {2}]   ;;  %s7245_s12 = inlined_call_operand.hbm [shape: f32[1,1], index: 12, kind: output, shape index: {3}]  }
   0x1   :  { %19 = vsyncpa [#allocation8], 0  ;;  %v4856_v0 = vld [vmem:[%s7236_s3] sm:$0xff]   ;;  %v7251_v1 = vmov 0.0   ;;  %v4857_v2 = vld [vmem:[%s7236_s3 + $0x8] sm:$0xff]   ;;  %vm5343_vm0 = vmmov 0  }
   0x2   :  { %4341 = vmatprep.subr.bf16.mxu0 %v7251_v1  ;;  %4361 = vmatprep.subr.bf16.mxu1 %v7251_v1  ;;  %v4858_v3 = vld [vmem:[%s7236_s3 + $0x10] sm:$0xff]   ;;  %v4864_v4 = vld [vmem:[%s7236_s3 + $0x40] sm:$0xff]   ;;  %v4859_v5 = vld [vmem:[%s7236_s3 + $0x18] sm:$0xff]  }
   0x3   :  { %4342 = vmatpush3.bf16.msra.mxu0 %v4856_v0  ;;  %4357 = vmatprep.mubr.msk.bf16.mxu0 %vm5343_vm0, %v7251_v1  ;;  %v4865_v6 = vld [vmem:[%s7236_s3 + $0x48] sm:$0xff]   ;;  %v4860_v7 = vld [vmem:[%s7236_s3 + $0x20] sm:$0xff]   ;;  %v4866_v8 = vld [vmem:[%s7236_s3 + $0x50] sm:$0xff]  }
   0x4   :  { %4343 = vmatprep.subr.bf16.mxu0 %v7251_v1  ;;  %4377 = vmatprep.mubr.msk.bf16.mxu1 %vm5343_vm0, %v7251_v1  ;;  %v4861_v9 = vld [vmem:[%s7236_s3 + $0x28] sm:$0xff]   ;;  %v4867_v10 = vld [vmem:[%s7236_s3 + $0x58] sm:$0xff]   ;;  %v4862_v11 = vld [vmem:[%s7236_s3 + $0x30] sm:$0xff]  }
   0x5   :  { %4362 = vmatpush3.bf16.msra.mxu1 %v4864_v4  ;;  %v4868_v12 = vld [vmem:[%s7236_s3 + $0x60] sm:$0xff]   ;;  %v4863_v13 = vld [vmem:[%s7236_s3 + $0x38] sm:$0xff]   ;;  %v4869_v14 = vld [vmem:[%s7236_s3 + $0x68] sm:$0xff]  }
   0x6   :  { %4363 = vmatprep.subr.bf16.mxu1 %v7251_v1  ;;  %v40_v15 = vld [vmem:[%s7233_s0] sm:$0xf] }
   0x7   :  { %4344 = vmatpush3.bf16.msra.mxu0 %v4857_v2 }
   0x8   :  { %4345 = vmatprep.subr.bf16.mxu0 %v7251_v1 }
   0x9   :  { %4364 = vmatpush3.bf16.msra.mxu1 %v4865_v6 }
   0xa   :  { %4365 = vmatprep.subr.bf16.mxu1 %v7251_v1 }
   0xb   :  { %4346 = vmatpush3.bf16.msra.mxu0 %v4858_v3 }
   0xc   :  { %4347 = vmatprep.subr.bf16.mxu0 %v7251_v1 }
   0xd   :  { %4366 = vmatpush3.bf16.msra.mxu1 %v4866_v8 }
   0xe   :  { %4367 = vmatprep.subr.bf16.mxu1 %v7251_v1 }
   0xf   :  { %4348 = vmatpush3.bf16.msra.mxu0 %v4859_v5 }
  0x10   :  { %4349 = vmatprep.subr.bf16.mxu0 %v7251_v1 }
  0x11   :  { %4368 = vmatpush3.bf16.msra.mxu1 %v4867_v10 }
  0x12   :  { %4369 = vmatprep.subr.bf16.mxu1 %v7251_v1 }
  0x13   :  { %4350 = vmatpush3.bf16.msra.mxu0 %v4860_v7 }
  0x14   :  { %4351 = vmatprep.subr.bf16.mxu0 %v7251_v1 }
  0x15   :  { %4370 = vmatpush3.bf16.msra.mxu1 %v4868_v12 }
  0x16   :  { %4371 = vmatprep.subr.bf16.mxu1 %v7251_v1 }
  0x17   :  { %4352 = vmatpush3.bf16.msra.mxu0 %v4861_v9 }
  0x18   :  { %4353 = vmatprep.subr.bf16.mxu0 %v7251_v1 }
  0x19   :  { %4372 = vmatpush3.bf16.msra.mxu1 %v4869_v14 }
  0x1a   :  { %4373 = vmatprep.subr.bf16.mxu1 %v7251_v1 }
  0x1b   :  { %4354 = vmatpush3.bf16.msra.mxu0 %v4862_v11 }
  0x1c   :  { %4355 = vmatprep.subr.bf16.mxu0 %v7251_v1 }
  0x1f   :  { %4356 = vmatpush3.bf16.msra.mxu0 %v4863_v13 }
  0x20   :  { %4381 = vmatprep.subr.bf16.mxu0 %v7251_v1 }
  0x22   :  { %4358 = vmatmul.mubr.bf16.vlgmr.msra.gmra.mrb[0].mxu0 %v40_v15 }
  0x23   :  { %4397 = vmatprep.mubr.msk.bf16.mxu0 %vm5343_vm0, %v7251_v1 }
  0x24   :  { %20 = vsyncpa [#allocation11], 0  ;;  %v4870_v16 = vld [vmem:[%s7236_s3 + $0x70] sm:$0xff]   ;;  %v4871_v17 = vld [vmem:[%s7236_s3 + $0x78] sm:$0xff]   ;;  %v7249_v53 = vmov 0   ;;  %vm3682_vm1 = vcmask 25600  }
  0x25   :  { %4374 = vmatpush3.bf16.msra.mxu1 %v4870_v16  ;;  %v4872_v18 = vld [vmem:[%s7236_s3 + $0x80] sm:$0xff]   ;;  %v4873_v19 = vld [vmem:[%s7236_s3 + $0x88] sm:$0xff]   ;;  %v4874_v20 = vld [vmem:[%s7236_s3 + $0x90] sm:$0xff]   ;;  %vm3687_vm2 = vcmask 31744   ;;  %s5346_s16 = smov [#allocation5]  }
  0x26   :  { %4375 = vmatprep.subr.bf16.mxu1 %v7251_v1  ;;  %4382 = vmatpush3.bf16.msra.mxu0 %v4872_v18  ;;  %v4875_v21 = vld [vmem:[%s7236_s3 + $0x98] sm:$0xff]   ;;  %v4876_v22 = vld [vmem:[%s7236_s3 + $0xa0] sm:$0xff]   ;;  %v4877_v23 = vld [vmem:[%s7236_s3 + $0xa8] sm:$0xff]   ;;  %s3724_s0 = sshll.u32 %s5346_s16, 4  ;;  %s3725_s0 = int_to_ptr.vmem [resolvable:$true] %s3724_s0 }
  0x27   :  { %4383 = vmatprep.subr.bf16.mxu0 %v7251_v1  ;;  %v3780_v24 = vld [vmem:[%s7237_s4] ss:$0 sm:$0xff]  ;;  %v4878_v32 = vld [vmem:[%s7236_s3 + $0xb0] sm:$0xff]   ;;  %v4879_v33 = vld [vmem:[%s7236_s3 + $0xb8] sm:$0xff]  }
  0x28   :  { %v4882_v34 = vld [vmem:[%s7238_s5 + $0x4] ss:$12 sps:$4 sm:$0xff]   ;;  %v4909_v36 = vld [vmem:[%s7236_s3 + $0xc8] sm:$0xff]   ;;  %v4918_v38 = vld [vmem:[%s7236_s3 + $0xd8] sm:$0xff]  }
  0x29   :  { %4376 = vmatpush3.bf16.msra.mxu1 %v4871_v17  ;;  %v4904_v35 = vld [vmem:[%s7236_s3 + $0xc0] sm:$0xff]   ;;  %v4913_v37 = vld [vmem:[%s7236_s3 + $0xd0] sm:$0xff]   ;;  %v4927_v40 = vld [vmem:[%s7236_s3 + $0xe8] sm:$0xff]  }
  0x2a   :  { %4401 = vmatprep.subr.bf16.mxu1 %v7251_v1  ;;  %4384 = vmatpush3.bf16.msra.mxu0 %v4873_v19  ;;  %v4922_v39 = vld [vmem:[%s7236_s3 + $0xe0] sm:$0xff]   ;;  %v4931_v41 = vld [vmem:[%s7236_s3 + $0xf0] sm:$0xff]   ;;  %v4885_v51 = vld [vmem:[%s7238_s5 + $0x1c] ss:$12 sps:$4 sm:$0xff]  }
  0x2b   :  { %4385 = vmatprep.subr.bf16.mxu0 %v7251_v1  ;;  %v3806_v42 = vld [vmem:[%s7237_s4 + $0x1] ss:$0 sm:$0xff]  ;;  %v4883_v52 = vld [vmem:[%s7238_s5 + $0x18] ss:$12 sps:$4 sm:$0xff]   ;;  %v4886_v55 = vld [vmem:[%s7238_s5 + $0x30] ss:$12 sps:$4 sm:$0xff]  }
  0x2c   :  { %v4880_v49 = vld [vmem:[%s7238_s5] ss:$12 sps:$4 sm:$0xff]   ;;  %v4889_v57 = vld [vmem:[%s7238_s5 + $0x48] ss:$12 sps:$4 sm:$0xff]   ;;  %v4894_v58 = vld [vmem:[%s7238_s5 + $0x64] ss:$12 sps:$4 sm:$0xff]  }
  0x2d   :  { %v4888_v54 = vld [vmem:[%s7238_s5 + $0x34] ss:$12 sps:$4 sm:$0xff]   ;;  %v4891_v56 = vld [vmem:[%s7238_s5 + $0x4c] ss:$12 sps:$4 sm:$0xff]   ;;  %v4897_v60 = vld [vmem:[%s7238_s5 + $0x7c] ss:$12 sps:$4 sm:$0xff]  }
  0x2e   :  { %4386 = vmatpush3.bf16.msra.mxu0 %v4874_v20  ;;  %v4892_v59 = vld [vmem:[%s7238_s5 + $0x60] ss:$12 sps:$4 sm:$0xff]   ;;  %v4895_v61 = vld [vmem:[%s7238_s5 + $0x78] ss:$12 sps:$4 sm:$0xff]   ;;  %v4898_v63 = vld [vmem:[%s7238_s5 + $0x90] ss:$12 sps:$4 sm:$0xff]  }
  0x2f   :  { %4387 = vmatprep.subr.bf16.mxu0 %v7251_v1  ;;  %v4900_v62 = vld [vmem:[%s7238_s5 + $0x94] ss:$12 sps:$4 sm:$0xff]   ;;  %v4903_v0 = vld [vmem:[%s7238_s5 + $0xac] ss:$12 sps:$4 sm:$0xff]   ;;  %v5608_v3 = vld [vmem:[%s7240_s7 + $0x4] ss:$12 sps:$4 sm:$0xff]  }
  0x30   :  { %v4901_v2 = vld [vmem:[%s7238_s5 + $0xa8] ss:$12 sps:$4 sm:$0xff]   ;;  %v5613_v4 = vld [vmem:[%s7234_s1] sm:$0xff]   ;;  %v5649_v10 = vld [vmem:[%s7240_s7 + $0x30] ss:$12 sps:$4 sm:$0xff]  }
  0x31   :  { %v5618_v5 = vld [vmem:[%s7240_s7] ss:$12 sps:$4 sm:$0xff]   ;;  %v5624_v6 = vld [vmem:[%s7240_s7 + $0x1c] ss:$12 sps:$4 sm:$0xff]   ;;  %v5631_v7 = vld [vmem:[%s7240_s7 + $0x18] ss:$12 sps:$4 sm:$0xff]  }
  0x32   :  { %4388 = vmatpush3.bf16.msra.mxu0 %v4875_v21  ;;  %v5638_v8 = vld [vmem:[%s7240_s7 + $0x34] ss:$12 sps:$4 sm:$0xff]   ;;  %v5643_v9 = vld [vmem:[%s7234_s1 + $0x8] sm:$0xff]   ;;  %v5669_v13 = vld [vmem:[%s7240_s7 + $0x64] ss:$12 sps:$4 sm:$0xff]  }
  0x33   :  { %4389 = vmatprep.subr.bf16.mxu0 %v7251_v1  ;;  %v5655_v11 = vld [vmem:[%s7240_s7 + $0x4c] ss:$12 sps:$4 sm:$0xff]   ;;  %v5662_v12 = vld [vmem:[%s7240_s7 + $0x48] ss:$12 sps:$4 sm:$0xff]   ;;  %v5711_v20 = vld [vmem:[%s7240_s7 + $0x90] ss:$12 sps:$4 sm:$0xff]  }
  0x34   :  { %v5674_v14 = vld [vmem:[%s7234_s1 + $0x10] sm:$0xff]   ;;  %v5680_v15 = vld [vmem:[%s7240_s7 + $0x60] ss:$12 sps:$4 sm:$0xff]   ;;  %v5686_v16 = vld [vmem:[%s7240_s7 + $0x7c] ss:$12 sps:$4 sm:$0xff]  }
  0x35   :  { %v5693_v17 = vld [vmem:[%s7240_s7 + $0x78] ss:$12 sps:$4 sm:$0xff]   ;;  %v5706_v19 = vld [vmem:[%s7240_s7 + $0x94] ss:$12 sps:$4 sm:$0xff]  }
  0x36   :  { %4390 = vmatpush3.bf16.msra.mxu0 %v4876_v22  ;;  %v5701_v18 = vld [vmem:[%s7234_s1 + $0x18] sm:$0xff]  }
  0x37   :  { %4391 = vmatprep.subr.bf16.mxu0 %v7251_v1  ;;  %v4936_v21 = vld [vmem:[%s7236_s3 + $0xf8] sm:$0xff]  }
  0x38   :  { %v5723_v22 = vld [vmem:[%s7240_s7 + $0xac] ss:$12 sps:$4 sm:$0xff]  }
  0x3a   :  { %4392 = vmatpush3.bf16.msra.mxu0 %v4877_v23  ;;  %v4939_v23 = vld [vmem:[%s7238_s5 + $0x8] ss:$12 sps:$4 sm:$0xff]  }
  0x3b   :  { %4393 = vmatprep.subr.bf16.mxu0 %v7251_v1 }
  0x3e   :  { %4394 = vmatpush3.bf16.msra.mxu0 %v4878_v32 }
  0x3f   :  { %4395 = vmatprep.subr.bf16.mxu0 %v7251_v1 }
  0x42   :  { %4396 = vmatpush3.bf16.msra.mxu0 %v4879_v33  ;;  %v4941_v33 = vld [vmem:[%s7238_s5 + $0x20] ss:$12 sps:$4 sm:$0xff]  }
  0x43   :  { %718 = vmatprep.subr.bf16.mxu0 %v4882_v34  ;;  %v4942_v34 = vld [vmem:[%s7238_s5 + $0x38] ss:$12 sps:$4 sm:$0xff]  }
  0xf5   :  { %v146_v25 = vpop.f32.mrb[0].mxu0 }
  0xf6   :  { %v147_v26 = vadd.f32 %v3780_v24, %v146_v25  ;;  %v4359_v27 = vpop.f32.mrb[1].mxu0  ;;  %v5731_v24 = vld [vmem:[%s7240_s7 + $0xa8] ss:$12 sps:$4 sm:$0xff]   ;;  %v3832_v25 = vld [vmem:[%s7237_s4 + $0x2] ss:$0 sm:$0xff] }
  0xf7   :  { %v149_v28 = vpop.f32.mrb[2].mxu0 }
  0xf8   :  { %v152_v29 = vmax.f32 %v147_v26, 0.0  ;;  %v4360_v30 = vpop.f32.mrb[3].mxu0 }
  0xfa   :  { %v153_v31 = vpack.c.bf16 %v152_v29, %v152_v29 }
  0xfc   :  { %4378 = vmatmul.mubr.bf16.vlgmr.msra.gmra.mrb[0].mxu1 %v153_v31 }
  0xfd   :  { %4417 = vmatprep.mubr.msk.bf16.mxu1 %vm5343_vm0, %v7251_v1  ;;  %4402 = vmatpush3.bf16.msra.mxu1 %v4904_v35  ;;  %v4943_v35 = vld [vmem:[%s7238_s5 + $0x50] ss:$12 sps:$4 sm:$0xff]  }
  0xfe   :  { %4403 = vmatprep.subr.bf16.mxu1 %v7251_v1 }
 0x101   :  { %4404 = vmatpush3.bf16.msra.mxu1 %v4909_v36  ;;  %v539_v36 = vlaneseq }
 0x102   :  { %4405 = vmatprep.subr.bf16.mxu1 %v7251_v1 }
 0x105   :  { %4406 = vmatpush3.bf16.msra.mxu1 %v4913_v37  ;;  %v4944_v37 = vld [vmem:[%s7238_s5 + $0x68] ss:$12 sps:$4 sm:$0xff]  }
 0x106   :  { %4407 = vmatprep.subr.bf16.mxu1 %v7251_v1 }
 0x109   :  { %4408 = vmatpush3.bf16.msra.mxu1 %v4918_v38  ;;  %v5770_v38 = vshrl.u32 %v539_v36, 7 }
 0x10a   :  { %4409 = vmatprep.subr.bf16.mxu1 %v7251_v1 }
 0x10b   :  { %7261 = vst [vmem:[#allocation15_spill] sm:$0xff] %v5770_v38 }
 0x10d   :  { %4410 = vmatpush3.bf16.msra.mxu1 %v4922_v39  ;;  %v4945_v39 = vld [vmem:[%s7238_s5 + $0x80] ss:$12 sps:$4 sm:$0xff]  }
 0x10e   :  { %4411 = vmatprep.subr.bf16.mxu1 %v7251_v1 }
 0x111   :  { %4412 = vmatpush3.bf16.msra.mxu1 %v4927_v40  ;;  %v5776_v40 = vsub.s32 0, %v5770_v38 }
 0x112   :  { %4413 = vmatprep.subr.bf16.mxu1 %v7251_v1 }
 0x113   :  { %7262 = vst [vmem:[#allocation16_spill] sm:$0xff] %v5776_v40 }
 0x115   :  { %4414 = vmatpush3.bf16.msra.mxu1 %v4931_v41  ;;  %v5781_v41 = vld [vmem:[%s7241_s8] sm:$0x3f] }
 0x116   :  { %4415 = vmatprep.subr.bf16.mxu1 %v7251_v1 }
 0x119   :  { %4416 = vmatpush3.bf16.msra.mxu1 %v4936_v21 }
 0x11a   :  { %4421 = vmatprep.subr.bf16.mxu1 %v4939_v23 }
 0x1cf   :  { %v261_v43 = vpop.f32.mrb[0].mxu1 }
 0x1d0   :  { %v262_v44 = vadd.f32 %v3806_v42, %v261_v43  ;;  %v4379_v45 = vpop.f32.mrb[1].mxu1  ;;  %v7247_v42 = vsub.s32 2, %v5770_v38  ;;  %v4946_v43 = vld [vmem:[%s7238_s5 + $0x98] ss:$12 sps:$4 sm:$0xff]  }
 0x1d1   :  { %v264_v46 = vpop.f32.mrb[2].mxu1 }
 0x1d2   :  { %v267_v47 = vmax.f32 %v262_v44, 0.0  ;;  %v4380_v48 = vpop.f32.mrb[3].mxu1  ;;  %v542_v44 = vrot.slane %v5781_v41, %v5776_v40  ;;  %v546_v45 = vrot.slane %v5781_v41, %v7247_v42  ;;  %v4947_v46 = vld [vmem:[%s7238_s5 + $0xb0] ss:$12 sps:$4 sm:$0xff]  }
 0x1d4   :  { %v268_v50 = vpack.c.bf16 %v267_v47, %v267_v47  ;;  %v5796_v47 = vrot.slane %v542_v44, %v5776_v40 }
 0x1d6   :  { %4398 = vmatmul.mubr.bf16.vlgmr.msra.gmra.mrb[4].mxu0 %v268_v50 }
 0x1d7   :  { %719 = vmatpush1.bf16.msra.mxu0 %v4880_v49  ;;  %750 = vmatprep.mubr.bf16.mxu0 %v7249_v53  ;;  %v5801_v49 = vrot.slane %v546_v45, %v5776_v40 }
 0x1d8   :  { %720 = vmatprep.subr.bf16.mxu0 %v4885_v51 }
 0x1db   :  { %721 = vmatpush1.bf16.msra.mxu0 %v4883_v52 }
 0x1dc   :  { %722 = vmatprep.subr.bf16.mxu0 %v4888_v54 }
 0x1df   :  { %723 = vmatpush1.bf16.msra.mxu0 %v4886_v55  ;;  %v5811_v55 = vld [vmem:[%s7240_s7 + $0x8] ss:$12 sps:$4 sm:$0xff]  }
 0x1e0   :  { %724 = vmatprep.subr.bf16.mxu0 %v4891_v56 }
 0x1e3   :  { %725 = vmatpush1.bf16.msra.mxu0 %v4889_v57  ;;  %v5822_v57 = vld [vmem:[%s7240_s7 + $0x20] ss:$12 sps:$4 sm:$0xff]  }
 0x1e4   :  { %726 = vmatprep.subr.bf16.mxu0 %v4894_v58 }
 0x1e7   :  { %727 = vmatpush1.bf16.msra.mxu0 %v4892_v59 }
 0x1e8   :  { %728 = vmatprep.subr.bf16.mxu0 %v4897_v60 }
 0x1eb   :  { %729 = vmatpush1.bf16.msra.mxu0 %v4895_v61 }
 0x1ec   :  { %730 = vmatprep.subr.bf16.mxu0 %v4900_v62 }
 0x1ef   :  { %731 = vmatpush1.bf16.msra.mxu0 %v4898_v63 }
 0x1f0   :  { %732 = vmatprep.subr.bf16.mxu0 %v4903_v0 }
 0x1f3   :  { %733 = vmatpush1.bf16.msra.mxu0 %v4901_v2  ;;  %v5839_v2 = vld [vmem:[%s7240_s7 + $0x38] ss:$12 sps:$4 sm:$0xff]  }
 0x1f4   :  { %1073 = vmatprep.subr.bf16.mxu0 %v5608_v3 }
 0x1f6   :  { %751 = vmatmul.mubr.bf16.vlgmr.msra.gmra.mrb[8].mxu0 %v5613_v4 }
 0x1f7   :  { %1074 = vmatpush1.bf16.msra.mxu0 %v5618_v5  ;;  %760 = vmatprep.mubr.bf16.mxu0 %v7249_v53 }
 0x1f8   :  { %1075 = vmatprep.subr.bf16.mxu0 %v5624_v6 }
 0x1fb   :  { %1076 = vmatpush1.bf16.msra.mxu0 %v5631_v7 }
 0x1fc   :  { %1077 = vmatprep.subr.bf16.mxu0 %v5638_v8 }
 0x1fe   :  { %761 = vmatmul.mubr.bf16.gmra.mrb[12].mxu0 %v5643_v9 }
 0x1ff   :  { %1078 = vmatpush1.bf16.msra.mxu0 %v5649_v10  ;;  %770 = vmatprep.mubr.bf16.mxu0 %v7249_v53 }
 0x200   :  { %1079 = vmatprep.subr.bf16.mxu0 %v5655_v11 }
 0x203   :  { %1080 = vmatpush1.bf16.msra.mxu0 %v5662_v12 }
 0x204   :  { %1081 = vmatprep.subr.bf16.mxu0 %v5669_v13 }
 0x206   :  { %771 = vmatmul.mubr.bf16.gmra.mrb[16].mxu0 %v5674_v14 }
 0x207   :  { %1082 = vmatpush1.bf16.msra.mxu0 %v5680_v15  ;;  %780 = vmatprep.mubr.bf16.mxu0 %v7249_v53 }
 0x208   :  { %1083 = vmatprep.subr.bf16.mxu0 %v5686_v16 }
 0x20b   :  { %1084 = vmatpush1.bf16.msra.mxu0 %v5693_v17 }
 0x20c   :  { %1085 = vmatprep.subr.bf16.mxu0 %v5706_v19 }
 0x20e   :  { %781 = vmatmul.mubr.bf16.gmra.mrb[20].mxu0 %v5701_v18 }
 0x20f   :  { %1086 = vmatpush1.bf16.msra.mxu0 %v5711_v20  ;;  %1105 = vmatprep.mubr.bf16.mxu0 %v7249_v53 }
 0x210   :  { %1087 = vmatprep.subr.bf16.mxu0 %v5723_v22 }
 0x213   :  { %1088 = vmatpush1.bf16.msra.mxu0 %v5731_v24 }
 0x214   :  { %1182 = vmatprep.subr.bf16.mxu0 %v5608_v3 }
 0x216   :  { %1106 = vmatmul.mubr.bf16.vlgmr.msra.gmra.mrb[24].mxu0 %v7249_v53 }
 0x217   :  { %1183 = vmatpush1.bf16.msra.mxu0 %v5618_v5  ;;  %1214 = vmatprep.mubr.bf16.mxu0 %v7249_v53 }
 0x218   :  { %1184 = vmatprep.subr.bf16.mxu0 %v5624_v6 }
 0x21b   :  { %1185 = vmatpush1.bf16.msra.mxu0 %v5631_v7 }
 0x21c   :  { %1186 = vmatprep.subr.bf16.mxu0 %v5638_v8 }
 0x21f   :  { %1187 = vmatpush1.bf16.msra.mxu0 %v5649_v10 }
 0x220   :  { %1188 = vmatprep.subr.bf16.mxu0 %v5655_v11 }
 0x223   :  { %1189 = vmatpush1.bf16.msra.mxu0 %v5662_v12 }
 0x224   :  { %1190 = vmatprep.subr.bf16.mxu0 %v5669_v13 }
 0x227   :  { %1191 = vmatpush1.bf16.msra.mxu0 %v5680_v15 }
 0x228   :  { %1192 = vmatprep.subr.bf16.mxu0 %v5686_v16 }
 0x22b   :  { %1193 = vmatpush1.bf16.msra.mxu0 %v5693_v17 }
 0x22c   :  { %1194 = vmatprep.subr.bf16.mxu0 %v5706_v19 }
 0x22f   :  { %1195 = vmatpush1.bf16.msra.mxu0 %v5711_v20 }
 0x230   :  { %1196 = vmatprep.subr.bf16.mxu0 %v5723_v22 }
 0x233   :  { %1197 = vmatpush1.bf16.msra.mxu0 %v5731_v24 }
 0x234   :  { %1292 = vmatprep.subr.bf16.mxu0 %v5608_v3 }
 0x2a9   :  { %v376_v26 = vpop.f32.mrb[4].mxu0 }
 0x2aa   :  { %v377_v27 = vadd.f32 %v3832_v25, %v376_v26  ;;  %v4399_v28 = vpop.f32.mrb[5].mxu0 }
 0x2ab   :  { %v379_v29 = vpop.f32.mrb[6].mxu0  ;;  %v5868_v28 = vld [vmem:[%s7240_s7 + $0x68] ss:$12 sps:$4 sm:$0xff]  }
 0x2ac   :  { %v382_v30 = vmax.f32 %v377_v27, 0.0  ;;  %v4400_v31 = vpop.f32.mrb[7].mxu0 }
 0x2ad   :  { %v5885_v31 = vld [vmem:[%s7240_s7 + $0x98] ss:$12 sps:$4 sm:$0xff]  }
 0x2ae   :  { %v383_v32 = vpack.c.bf16 %v382_v30, %v382_v30  ;;  %v5878_v30 = vld [vmem:[%s7240_s7 + $0x80] ss:$12 sps:$4 sm:$0xff]  }
 0x2b0   :  { %4418 = vmatmul.mubr.bf16.vlgmr.msra.gmra.mrb[4].mxu1 %v383_v32  ;;  %v5892_v32 = vld [vmem:[%s7240_s7 + $0xb0] ss:$12 sps:$4 sm:$0xff]  }
 0x2b1   :  { %4422 = vmatpush3.bf16.msra.mxu1 %v4939_v23  ;;  %4437 = vmatprep.mubr.bf16.mxu1 %v5613_v4 }
 0x2b2   :  { %4423 = vmatprep.subr.bf16.mxu1 %v4941_v33 }
 0x2b5   :  { %4424 = vmatpush3.bf16.msra.mxu1 %v4941_v33 }
 0x2b6   :  { %4425 = vmatprep.subr.bf16.mxu1 %v4942_v34 }
 0x2b9   :  { %4426 = vmatpush3.bf16.msra.mxu1 %v4942_v34 }
 0x2ba   :  { %4427 = vmatprep.subr.bf16.mxu1 %v4943_v35 }
 0x2bd   :  { %4428 = vmatpush3.bf16.msra.mxu1 %v4943_v35 }
 0x2be   :  { %4429 = vmatprep.subr.bf16.mxu1 %v4944_v37 }
 0x2c1   :  { %4430 = vmatpush3.bf16.msra.mxu1 %v4944_v37  ;;  %v5916_v37 = vsub.s32 1, %v5770_v38 }
 0x2c2   :  { %4431 = vmatprep.subr.bf16.mxu1 %v4945_v39 }
 0x2c3   :  { %7263 = vst [vmem:[#allocation17_spill] sm:$0xff] %v5916_v37  ;;  %v915_v44 = vrot.slane %v5781_v41, %v5916_v37 }
 0x2c5   :  { %4432 = vmatpush3.bf16.msra.mxu1 %v4945_v39  ;;  %v7246_v39 = vsub.s32 3, %v5770_v38 }
 0x2c6   :  { %4433 = vmatprep.subr.bf16.mxu1 %v4946_v43 }
 0x2c7   :  { %v919_v45 = vrot.slane %v5781_v41, %v7246_v39 }
 0x2c9   :  { %4434 = vmatpush3.bf16.msra.mxu1 %v4946_v43  ;;  %v5798_v48 = vpop.f32.mrb[8].mxu0 }
 0x2ca   :  { %4435 = vmatprep.subr.bf16.mxu1 %v4947_v46  ;;  %v5803_v50 = vpop.f32.mrb[9].mxu0 }
 0x2cb   :  { %v756_v51 = vpop.f32.mrb[10].mxu0 }
 0x2cc   :  { %v5806_v52 = vadd.f32 %v756_v51, %v5796_v47  ;;  %v758_v54 = vpop.f32.mrb[11].mxu0 }
 0x2cd   :  { %4436 = vmatpush3.bf16.msra.mxu1 %v4947_v46  ;;  %v5814_v56 = vadd.f32 %v758_v54, %v5801_v49  ;;  %v753_v46 = vadd.f32 %v5798_v48, %v5796_v47 }
 0x2ce   :  { %4445 = vmatprep.subr.bf16.mxu1 %v7251_v1 }
 0x2d0   :  { %4438 = vmatmul.mubr.bf16.vlgmr.msra.gmra.mrb[8].mxu1 %v5643_v9  ;;  %v5850_v9 = vld [vmem:[%s7240_s7 + $0x50] ss:$12 sps:$4 sm:$0xff]  }
 0x2d1   :  { %4446 = vmatpush3.bf16.msra.mxu1 %v5811_v55  ;;  %4441 = vmatprep.mubr.bf16.mxu1 %v5674_v14  ;;  %v762_v58 = vpop.f32.mrb[12].mxu0 }
 0x2d2   :  { %4447 = vmatprep.subr.bf16.mxu1 %v7251_v1  ;;  %v5827_v59 = vadd.f32 %v762_v58, %v5796_v47  ;;  %v764_v60 = vpop.f32.mrb[13].mxu0  ;;  %v755_v58 = vadd.f32 %v5803_v50, %v5801_v49 }
 0x2d3   :  { %v5830_v61 = vadd.f32 %v764_v60, %v5801_v49  ;;  %v766_v62 = vpop.f32.mrb[14].mxu0 }
 0x2d4   :  { %v5833_v63 = vadd.f32 %v766_v62, %v5796_v47  ;;  %v768_v0 = vpop.f32.mrb[15].mxu0  ;;  %v5937_v62 = vrot.slane %v915_v44, %v5916_v37 }
 0x2d5   :  { %4448 = vmatpush3.bf16.msra.mxu1 %v5822_v57  ;;  %v5842_v4 = vadd.f32 %v768_v0, %v5801_v49 }
 0x2d6   :  { %4449 = vmatprep.subr.bf16.mxu1 %v7251_v1 }
 0x2d8   :  { %4442 = vmatmul.mubr.bf16.gmra.mrb[12].mxu1 %v5701_v18 }
 0x2d9   :  { %4450 = vmatpush3.bf16.msra.mxu1 %v5839_v2  ;;  %4461 = vmatprep.mubr.msk.bf16.mxu1 %vm5343_vm0, %v7251_v1  ;;  %v772_v14 = vpop.f32.mrb[16].mxu0 }
 0x2da   :  { %4451 = vmatprep.subr.bf16.mxu1 %v7251_v1  ;;  %v5856_v21 = vadd.f32 %v772_v14, %v5796_v47  ;;  %v774_v23 = vpop.f32.mrb[17].mxu0  ;;  %v5940_v14 = vrot.slane %v919_v45, %v5916_v37 }
 0x2db   :  { %v5859_v25 = vadd.f32 %v774_v23, %v5801_v49  ;;  %v776_v18 = vpop.f32.mrb[18].mxu0 }
 0x2dc   :  { %v5862_v26 = vadd.f32 %v776_v18, %v5796_v47  ;;  %v778_v27 = vpop.f32.mrb[19].mxu0 }
 0x2dd   :  { %4452 = vmatpush3.bf16.msra.mxu1 %v5850_v9  ;;  %v5871_v29 = vadd.f32 %v778_v27, %v5801_v49 }
 0x2de   :  { %4453 = vmatprep.subr.bf16.mxu1 %v7251_v1 }
 0x2e1   :  { %4454 = vmatpush3.bf16.msra.mxu1 %v5868_v28  ;;  %v782_v33 = vpop.f32.mrb[20].mxu0 }
 0x2e2   :  { %4455 = vmatprep.subr.bf16.mxu1 %v7251_v1  ;;  %v5908_v34 = vadd.f32 %v782_v33, %v5796_v47  ;;  %v784_v35 = vpop.f32.mrb[21].mxu0  ;;  %v3858_v33 = vld [vmem:[%s7237_s4 + $0x3] ss:$0 sm:$0xff] }
 0x2e3   :  { %v5912_v36 = vadd.f32 %v784_v35, %v5801_v49  ;;  %v786_v43 = vpop.f32.mrb[22].mxu0 }
 0x2e4   :  { %v5928_v51 = vadd.f32 %v786_v43, %v5796_v47  ;;  %v788_v54 = vpop.f32.mrb[23].mxu0 }
 0x2e5   :  { %4456 = vmatpush3.bf16.msra.mxu1 %v5878_v30  ;;  %v5934_v60 = vadd.f32 %v788_v54, %v5801_v49 }
 0x2e6   :  { %4457 = vmatprep.subr.bf16.mxu1 %v7251_v1  ;;  %7264 = vst [vmem:[#allocation18_spill] sm:$0xff] %v5928_v51 }
 0x2e7   :  { %7265 = vst [vmem:[#allocation19_spill] sm:$0xff] %v5934_v60 }
 0x2e9   :  { %4458 = vmatpush3.bf16.msra.mxu1 %v5885_v31  ;;  %v1107_v0 = vpop.f32.mrb[24].mxu0 }
 0x2ea   :  { %4459 = vmatprep.subr.bf16.mxu1 %v7251_v1  ;;  %v1109_v47 = vpop.f32.mrb[25].mxu0  ;;  %v1108_v48 = vadd.f32 %v1107_v0, %v5937_v62 }
 0x2eb   :  { %v1110_v23 = vadd.f32 %v1109_v47, %v5940_v14  ;;  %v1111_v18 = vpop.f32.mrb[26].mxu0 }
 0x2ec   :  { %v1112_v27 = vpop.f32.mrb[27].mxu0  ;;  %v1154_v49 = vadd.f32 %v1108_v48, %v753_v46  ;;  %v7248_v46 = vsub.s32 4, %v5770_v38 }
 0x2ed   :  { %4460 = vmatpush3.bf16.msra.mxu1 %v5892_v32  ;;  %v1161_v50 = vadd.f32 %v1110_v23, %v755_v58 }
 0x2ee   :  { %4465 = vmatprep.subr.bf16.mxu1 %v7251_v1  ;;  %v550_v58 = vrot.slane %v5781_v41, %v7248_v46  ;;  %v3919_v27 = vmul.f32 -1.442695, %v1154_v49 }
 0x2ef   :  { %v3920_v49 = vmul.f32 -1.442695, %v1161_v50 }
 0x2f0   :  { %4462 = vmatmul.mubr.bf16.vlgmr.msra.gmra.mrb[16].mxu1 %v7249_v53  ;;  %v565_v0 = vrot.slane %v550_v58, %v5776_v40  ;;  %5044 = vpow2.f32 %v3919_v27 }
 0x2f1   :  { %4466 = vmatpush3.bf16.msra.mxu1 %v5811_v55  ;;  %4481 = vmatprep.mubr.msk.bf16.mxu1 %vm5343_vm0, %v7251_v1  ;;  %5046 = vpow2.f32 %v3920_v49 }
 0x2f2   :  { %4467 = vmatprep.subr.bf16.mxu1 %v7251_v1 }
 0x2f5   :  { %4468 = vmatpush3.bf16.msra.mxu1 %v5822_v57 }
 0x2f6   :  { %4469 = vmatprep.subr.bf16.mxu1 %v7251_v1 }
 0x2f9   :  { %4470 = vmatpush3.bf16.msra.mxu1 %v5839_v2 }
 0x2fa   :  { %4471 = vmatprep.subr.bf16.mxu1 %v7251_v1 }
 0x2fd   :  { %4472 = vmatpush3.bf16.msra.mxu1 %v5850_v9 }
 0x2fe   :  { %4473 = vmatprep.subr.bf16.mxu1 %v7251_v1 }
 0x301   :  { %4474 = vmatpush3.bf16.msra.mxu1 %v5868_v28 }
 0x302   :  { %4475 = vmatprep.subr.bf16.mxu1 %v7251_v1 }
 0x305   :  { %4476 = vmatpush3.bf16.msra.mxu1 %v5878_v30 }
 0x306   :  { %4477 = vmatprep.subr.bf16.mxu1 %v7251_v1 }
 0x309   :  { %4478 = vmatpush3.bf16.msra.mxu1 %v5885_v31 }
 0x30a   :  { %4479 = vmatprep.subr.bf16.mxu1 %v7251_v1 }
 0x30d   :  { %4480 = vmatpush3.bf16.msra.mxu1 %v5892_v32 }
 0x30e   :  { %4485 = vmatprep.subr.bf16.mxu1 %v7251_v1  ;;  %v5045_v1 = vpop.eup %5044 }
 0x383   :  { %v491_v35 = vpop.f32.mrb[4].mxu1 }
 0x384   :  { %v5952_v43 = vadd.f32 %v3858_v33, %v491_v35  ;;  %v4419_v44 = vpop.f32.mrb[5].mxu1 }
 0x385   :  { %v494_v45 = vpop.f32.mrb[6].mxu1 }
 0x386   :  { %7266 = vst [vmem:[#allocation20_spill] sm:$0xff] %v5952_v43  ;;  %v4420_v54 = vpop.f32.mrb[7].mxu1  ;;  %3683 = vst.msk [vmem:[#allocation5] sm:$0x3] %vm3682_vm1, %v5952_v43  ;;  %v7258_v43 = vsub.s32 5, %v5770_v38 }
 0x388   :  { %v923_v27 = vrot.slane %v5781_v41, %v7258_v43 }
 0x3a3   :  { %v4439_v47 = vpop.f32.mrb[8].mxu1 }
 0x3a4   :  { %v5961_v48 = vadd.f32 %v4439_v47, %v565_v0  ;;  %v825_v23 = vpop.f32.mrb[9].mxu1 }
 0x3a5   :  { %v4440_v18 = vpop.f32.mrb[10].mxu1  ;;  %v826_v50 = vadd.f32 %v825_v23, %v565_v0 }
 0x3a6   :  { %v5963_v33 = vadd.f32 %v4440_v18, %v565_v0  ;;  %v828_v35 = vpop.f32.mrb[11].mxu1  ;;  %v1158_v18 = vadd.f32 1.0, %v5045_v1 }
 0x3a7   :  { %v5965_v44 = vadd.f32 %v828_v35, %v565_v0 }
 0x3a8   :  { %5048 = vrcp.f32 %v1158_v18 }
 0x3ab   :  { %v4443_v45 = vpop.f32.mrb[12].mxu1 }
 0x3ac   :  { %v5967_v54 = vadd.f32 %v4443_v45, %v565_v0  ;;  %v841_v39 = vpop.f32.mrb[13].mxu1 }
 0x3ad   :  { %v5969_v42 = vadd.f32 %v841_v39, %v565_v0  ;;  %v4444_v46 = vpop.f32.mrb[14].mxu1  ;;  %v5980_v39 = vrot.slane %v923_v27, %v5916_v37 }
 0x3ae   :  { %7267 = vst [vmem:[#allocation21_spill] sm:$0xff] %v5967_v54  ;;  %v5971_v58 = vadd.f32 %v4444_v46, %v565_v0  ;;  %v844_v47 = vpop.f32.mrb[15].mxu1  ;;  %v5047_v46 = vpop.eup %5046 }
 0x3af   :  { %v5973_v53 = vadd.f32 %v844_v47, %v565_v0  ;;  %v1165_v51 = vadd.f32 1.0, %v5047_v46 }
 0x3b0   :  { %7268 = vst [vmem:[#allocation22_spill] sm:$0xff] %v5971_v58 }
 0x3b2   :  { %v5049_v40 = vpop.eup %5048 }
 0x3c3   :  { %v1148_v35 = vpop.f32.mrb[16].mxu1 }
 0x3c4   :  { %v1149_v45 = vadd.f32 %v1148_v35, %v5980_v39  ;;  %v4463_v47 = vpop.f32.mrb[17].mxu1 }
 0x3c5   :  { %v1151_v58 = vpop.f32.mrb[18].mxu1 }
 0x3c6   :  { %v1168_v1 = vmul.f32 %v5049_v40, %v1149_v45  ;;  %v4464_v60 = vpop.f32.mrb[19].mxu1  ;;  %v7269_v40 = vmov 0.0  }
 0x3c8   :  { %v1169_v49 = vadd.f32 %v1168_v1, %v826_v50 }
 0x3ca   :  { %5050 = vtanh.f32 %v1169_v49 }
 0x3cb   :  { %5052 = vrcp.f32 %v1165_v51  ;;  %v7270_v51 = vmov 0  }
 0x3d4   :  { %v5051_v18 = vpop.eup %5050 }
 0x3d5   :  { %v1171_v38 = vsub.f32 0.0, %v5051_v18  ;;  %v5053_v41 = vpop.eup %5052 }
 0x3d7   :  { %v1172_v43 = vmul.f32 %v5053_v41, %v1171_v38 }
 0x3d9   :  { %v5983_v27 = vadd.f32 %v5051_v18, %v1172_v43 }
 0x3db   :  { %v1181_v37 = vpack.c.bf16 %v5983_v27, %v5983_v27 }
 0x3dd   :  { %1215 = vmatmul.mubr.bf16.vlgmr.msra.gmra.mrb[28].mxu0 %v1181_v37  ;;  %4482 = vmatmul.mubr.bf16.vlgmr.msra.gmra.mrb[20].mxu1 %v1181_v37 }
 0x3de   :  { %1293 = vmatpush1.bf16.msra.mxu0 %v5618_v5  ;;  %4486 = vmatpush3.bf16.msra.mxu1 %v5811_v55 }
 0x3df   :  { %1294 = vmatprep.subr.bf16.mxu0 %v5624_v6  ;;  %4487 = vmatprep.subr.bf16.mxu1 %v7269_v40 }
 0x3e0   :  { %1324 = vmatprep.mubr.bf16.mxu0 %v7270_v51  ;;  %4501 = vmatprep.mubr.msk.bf16.mxu1 %vm5343_vm0, %v7269_v40 }
 0x3e2   :  { %1295 = vmatpush1.bf16.msra.mxu0 %v5631_v7  ;;  %4488 = vmatpush3.bf16.msra.mxu1 %v5822_v57 }
 0x3e3   :  { %1296 = vmatprep.subr.bf16.mxu0 %v5638_v8  ;;  %4489 = vmatprep.subr.bf16.mxu1 %v7269_v40 }
 0x3e6   :  { %1297 = vmatpush1.bf16.msra.mxu0 %v5649_v10  ;;  %4490 = vmatpush3.bf16.msra.mxu1 %v5839_v2 }
 0x3e7   :  { %1298 = vmatprep.subr.bf16.mxu0 %v5655_v11  ;;  %4491 = vmatprep.subr.bf16.mxu1 %v7269_v40 }
 0x3ea   :  { %1299 = vmatpush1.bf16.msra.mxu0 %v5662_v12  ;;  %4492 = vmatpush3.bf16.msra.mxu1 %v5850_v9 }
 0x3eb   :  { %1300 = vmatprep.subr.bf16.mxu0 %v5669_v13  ;;  %4493 = vmatprep.subr.bf16.mxu1 %v7269_v40 }
 0x3ee   :  { %1301 = vmatpush1.bf16.msra.mxu0 %v5680_v15  ;;  %4494 = vmatpush3.bf16.msra.mxu1 %v5868_v28 }
 0x3ef   :  { %1302 = vmatprep.subr.bf16.mxu0 %v5686_v16  ;;  %4495 = vmatprep.subr.bf16.mxu1 %v7269_v40 }
 0x3f2   :  { %1303 = vmatpush1.bf16.msra.mxu0 %v5693_v17  ;;  %4496 = vmatpush3.bf16.msra.mxu1 %v5878_v30 }
 0x3f3   :  { %1304 = vmatprep.subr.bf16.mxu0 %v5706_v19  ;;  %4497 = vmatprep.subr.bf16.mxu1 %v7269_v40 }
 0x3f6   :  { %1305 = vmatpush1.bf16.msra.mxu0 %v5711_v20  ;;  %4498 = vmatpush3.bf16.msra.mxu1 %v5885_v31 }
 0x3f7   :  { %1306 = vmatprep.subr.bf16.mxu0 %v5723_v22  ;;  %4499 = vmatprep.subr.bf16.mxu1 %v7269_v40 }
 0x3fa   :  { %1307 = vmatpush1.bf16.msra.mxu0 %v5731_v24  ;;  %4500 = vmatpush3.bf16.msra.mxu1 %v5892_v32 }
 0x3fb   :  { %1402 = vmatprep.subr.bf16.mxu0 %v5608_v3  ;;  %4505 = vmatprep.subr.bf16.mxu1 %v7269_v40 }
 0x4b0   :  { %v1216_v38 = vpop.f32.mrb[28].mxu0  ;;  %v1257_v37 = vpop.f32.mrb[20].mxu1 }
 0x4b1   :  { %v1217_v60 = vadd.f32 %v1216_v38, %v5937_v62  ;;  %v1218_v43 = vpop.f32.mrb[29].mxu0  ;;  %v4483_v0 = vpop.f32.mrb[21].mxu1 }
 0x4b2   :  { %v1219_v23 = vadd.f32 %v1218_v43, %v5940_v14  ;;  %v1220_v58 = vpop.f32.mrb[30].mxu0  ;;  %v1260_v35 = vpop.f32.mrb[22].mxu1  ;;  %v1258_v0 = vadd.f32 %v1257_v37, %v5980_v39 }
 0x4b3   :  { %v1263_v46 = vadd.f32 %v1217_v60, %v5806_v52  ;;  %v1221_v45 = vpop.f32.mrb[31].mxu0  ;;  %v4484_v47 = vpop.f32.mrb[23].mxu1 }
 0x4b4   :  { %v1270_v50 = vadd.f32 %v1219_v23, %v5814_v56 }
 0x4b5   :  { %v3921_v1 = vmul.f32 -1.442695, %v1263_v46 }
 0x4b6   :  { %v3922_v49 = vmul.f32 -1.442695, %v1270_v50 }
 0x4b7   :  { %5054 = vpow2.f32 %v3921_v1 }
 0x4b8   :  { %5056 = vpow2.f32 %v3922_v49 }
 0x4c1   :  { %v5055_v18 = vpop.eup %5054 }
 0x4c2   :  { %v1267_v41 = vadd.f32 1.0, %v5055_v18  ;;  %v5057_v38 = vpop.eup %5056 }
 0x4c3   :  { %v1274_v35 = vadd.f32 1.0, %v5057_v38 }
 0x4c4   :  { %5058 = vrcp.f32 %v1267_v41 }
 0x4ce   :  { %v5059_v54 = vpop.eup %5058 }
 0x4cf   :  { %v1277_v43 = vmul.f32 %v5059_v54, %v1258_v0 }
 0x4d1   :  { %v1278_v58 = vadd.f32 %v1277_v43, %v5965_v44 }
 0x4d3   :  { %5060 = vtanh.f32 %v1278_v58 }
 0x4d4   :  { %5062 = vrcp.f32 %v1274_v35 }
 0x4dd   :  { %v5061_v52 = vpop.eup %5060 }
 0x4de   :  { %v1280_v56 = vsub.f32 %v5983_v27, %v5061_v52  ;;  %v5063_v60 = vpop.eup %5062 }
 0x4e0   :  { %v1281_v23 = vmul.f32 %v5063_v60, %v1280_v56 }
 0x4e2   :  { %v6029_v46 = vadd.f32 %v5061_v52, %v1281_v23 }
 0x4e4   :  { %v1291_v45 = vpack.c.bf16 %v6029_v46, %v6029_v46 }
 0x4e6   :  { %1325 = vmatmul.mubr.bf16.vlgmr.msra.gmra.mrb[32].mxu0 %v1291_v45  ;;  %4502 = vmatmul.mubr.bf16.vlgmr.msra.gmra.mrb[24].mxu1 %v1291_v45 }
 0x4e7   :  { %1403 = vmatpush1.bf16.msra.mxu0 %v5618_v5  ;;  %4506 = vmatpush3.bf16.msra.mxu1 %v5811_v55 }
 0x4e8   :  { %1404 = vmatprep.subr.bf16.mxu0 %v5624_v6  ;;  %4507 = vmatprep.subr.bf16.mxu1 %v7269_v40 }
 0x4e9   :  { %1434 = vmatprep.mubr.bf16.mxu0 %v7270_v51  ;;  %4521 = vmatprep.mubr.msk.bf16.mxu1 %vm5343_vm0, %v7269_v40 }
 0x4eb   :  { %1405 = vmatpush1.bf16.msra.mxu0 %v5631_v7  ;;  %4508 = vmatpush3.bf16.msra.mxu1 %v5822_v57 }
 0x4ec   :  { %1406 = vmatprep.subr.bf16.mxu0 %v5638_v8  ;;  %4509 = vmatprep.subr.bf16.mxu1 %v7269_v40 }
 0x4ef   :  { %1407 = vmatpush1.bf16.msra.mxu0 %v5649_v10  ;;  %4510 = vmatpush3.bf16.msra.mxu1 %v5839_v2 }
 0x4f0   :  { %1408 = vmatprep.subr.bf16.mxu0 %v5655_v11  ;;  %4511 = vmatprep.subr.bf16.mxu1 %v7269_v40 }
 0x4f3   :  { %1409 = vmatpush1.bf16.msra.mxu0 %v5662_v12  ;;  %4512 = vmatpush3.bf16.msra.mxu1 %v5850_v9 }
 0x4f4   :  { %1410 = vmatprep.subr.bf16.mxu0 %v5669_v13  ;;  %4513 = vmatprep.subr.bf16.mxu1 %v7269_v40 }
 0x4f7   :  { %1411 = vmatpush1.bf16.msra.mxu0 %v5680_v15  ;;  %4514 = vmatpush3.bf16.msra.mxu1 %v5868_v28 }
 0x4f8   :  { %1412 = vmatprep.subr.bf16.mxu0 %v5686_v16  ;;  %4515 = vmatprep.subr.bf16.mxu1 %v7269_v40 }
 0x4fb   :  { %1413 = vmatpush1.bf16.msra.mxu0 %v5693_v17  ;;  %4516 = vmatpush3.bf16.msra.mxu1 %v5878_v30 }
 0x4fc   :  { %1414 = vmatprep.subr.bf16.mxu0 %v5706_v19  ;;  %4517 = vmatprep.subr.bf16.mxu1 %v7269_v40 }
 0x4ff   :  { %1415 = vmatpush1.bf16.msra.mxu0 %v5711_v20  ;;  %4518 = vmatpush3.bf16.msra.mxu1 %v5885_v31 }
 0x500   :  { %1416 = vmatprep.subr.bf16.mxu0 %v5723_v22  ;;  %4519 = vmatprep.subr.bf16.mxu1 %v7269_v40 }
 0x503   :  { %1417 = vmatpush1.bf16.msra.mxu0 %v5731_v24  ;;  %4520 = vmatpush3.bf16.msra.mxu1 %v5892_v32 }
 0x504   :  { %1512 = vmatprep.subr.bf16.mxu0 %v5608_v3  ;;  %4525 = vmatprep.subr.bf16.mxu1 %v7269_v40 }
 0x5b9   :  { %v1326_v44 = vpop.f32.mrb[32].mxu0  ;;  %v1367_v54 = vpop.f32.mrb[24].mxu1 }
 0x5ba   :  { %v1327_v37 = vadd.f32 %v1326_v44, %v5937_v62  ;;  %v1328_v47 = vpop.f32.mrb[33].mxu0  ;;  %v4503_v50 = vpop.f32.mrb[25].mxu1  ;;  %v1368_v23 = vadd.f32 %v1367_v54, %v5980_v39 }
 0x5bb   :  { %v1329_v1 = vadd.f32 %v1328_v47, %v5940_v14  ;;  %v1330_v49 = vpop.f32.mrb[34].mxu0  ;;  %v1370_v18 = vpop.f32.mrb[26].mxu1 }
 0x5bc   :  { %v1373_v41 = vadd.f32 %v1327_v37, %v5827_v59  ;;  %v1331_v38 = vpop.f32.mrb[35].mxu0  ;;  %v4504_v0 = vpop.f32.mrb[27].mxu1 }
 0x5bd   :  { %v1380_v43 = vadd.f32 %v1329_v1, %v5830_v61 }
 0x5be   :  { %v3923_v58 = vmul.f32 -1.442695, %v1373_v41 }
 0x5bf   :  { %v3924_v35 = vmul.f32 -1.442695, %v1380_v43 }
 0x5c0   :  { %5064 = vpow2.f32 %v3923_v58 }
 0x5c1   :  { %5066 = vpow2.f32 %v3924_v35 }
 0x5ca   :  { %v5065_v52 = vpop.eup %5064 }
 0x5cb   :  { %v1377_v56 = vadd.f32 1.0, %v5065_v52  ;;  %v5067_v60 = vpop.eup %5066 }
 0x5cc   :  { %v1384_v50 = vadd.f32 1.0, %v5067_v60 }
 0x5cd   :  { %5068 = vrcp.f32 %v1377_v56 }
 0x5d7   :  { %v5069_v45 = vpop.eup %5068 }
 0x5d8   :  { %v1387_v44 = vmul.f32 %v5069_v45, %v1368_v23 }
 0x5da   :  { %v1388_v47 = vadd.f32 %v1387_v44, %v5961_v48 }
 0x5dc   :  { %5070 = vtanh.f32 %v1388_v47 }
 0x5dd   :  { %5072 = vrcp.f32 %v1384_v50 }
 0x5e6   :  { %v5071_v59 = vpop.eup %5070 }
 0x5e7   :  { %v1390_v61 = vsub.f32 %v6029_v46, %v5071_v59  ;;  %v5073_v37 = vpop.eup %5072 }
 0x5e9   :  { %v1391_v1 = vmul.f32 %v5073_v37, %v1390_v61 }
 0x5eb   :  { %v6075_v49 = vadd.f32 %v5071_v59, %v1391_v1 }
 0x5ed   :  { %v1401_v18 = vpack.c.bf16 %v6075_v49, %v6075_v49 }
 0x5ef   :  { %1435 = vmatmul.mubr.bf16.vlgmr.msra.gmra.mrb[36].mxu0 %v1401_v18  ;;  %4522 = vmatmul.mubr.bf16.vlgmr.msra.gmra.mrb[28].mxu1 %v1401_v18 }
 0x5f0   :  { %1513 = vmatpush1.bf16.msra.mxu0 %v5618_v5  ;;  %4526 = vmatpush3.bf16.msra.mxu1 %v5811_v55 }
 0x5f1   :  { %1514 = vmatprep.subr.bf16.mxu0 %v5624_v6  ;;  %4527 = vmatprep.subr.bf16.mxu1 %v7269_v40 }
 0x5f2   :  { %1544 = vmatprep.mubr.bf16.mxu0 %v7270_v51  ;;  %4541 = vmatprep.mubr.msk.bf16.mxu1 %vm5343_vm0, %v7269_v40 }
 0x5f4   :  { %1515 = vmatpush1.bf16.msra.mxu0 %v5631_v7  ;;  %4528 = vmatpush3.bf16.msra.mxu1 %v5822_v57 }
 0x5f5   :  { %1516 = vmatprep.subr.bf16.mxu0 %v5638_v8  ;;  %4529 = vmatprep.subr.bf16.mxu1 %v7269_v40 }
 0x5f8   :  { %1517 = vmatpush1.bf16.msra.mxu0 %v5649_v10  ;;  %4530 = vmatpush3.bf16.msra.mxu1 %v5839_v2 }
 0x5f9   :  { %1518 = vmatprep.subr.bf16.mxu0 %v5655_v11  ;;  %4531 = vmatprep.subr.bf16.mxu1 %v7269_v40 }
 0x5fc   :  { %1519 = vmatpush1.bf16.msra.mxu0 %v5662_v12  ;;  %4532 = vmatpush3.bf16.msra.mxu1 %v5850_v9 }
 0x5fd   :  { %1520 = vmatprep.subr.bf16.mxu0 %v5669_v13  ;;  %4533 = vmatprep.subr.bf16.mxu1 %v7269_v40 }
 0x600   :  { %1521 = vmatpush1.bf16.msra.mxu0 %v5680_v15  ;;  %4534 = vmatpush3.bf16.msra.mxu1 %v5868_v28 }
 0x601   :  { %1522 = vmatprep.subr.bf16.mxu0 %v5686_v16  ;;  %4535 = vmatprep.subr.bf16.mxu1 %v7269_v40 }
 0x604   :  { %1523 = vmatpush1.bf16.msra.mxu0 %v5693_v17  ;;  %4536 = vmatpush3.bf16.msra.mxu1 %v5878_v30 }
 0x605   :  { %1524 = vmatprep.subr.bf16.mxu0 %v5706_v19  ;;  %4537 = vmatprep.subr.bf16.mxu1 %v7269_v40 }
 0x608   :  { %1525 = vmatpush1.bf16.msra.mxu0 %v5711_v20  ;;  %4538 = vmatpush3.bf16.msra.mxu1 %v5885_v31 }
 0x609   :  { %1526 = vmatprep.subr.bf16.mxu0 %v5723_v22  ;;  %4539 = vmatprep.subr.bf16.mxu1 %v7269_v40 }
 0x60c   :  { %1527 = vmatpush1.bf16.msra.mxu0 %v5731_v24  ;;  %4540 = vmatpush3.bf16.msra.mxu1 %v5892_v32 }
 0x60d   :  { %1622 = vmatprep.subr.bf16.mxu0 %v5608_v3  ;;  %4545 = vmatprep.subr.bf16.mxu1 %v7269_v40 }
 0x6c2   :  { %v1436_v48 = vpop.f32.mrb[36].mxu0  ;;  %v1477_v54 = vpop.f32.mrb[28].mxu1 }
 0x6c3   :  { %v1437_v41 = vadd.f32 %v1436_v48, %v5937_v62  ;;  %v1438_v38 = vpop.f32.mrb[37].mxu0  ;;  %v4523_v0 = vpop.f32.mrb[29].mxu1  ;;  %v1478_v61 = vadd.f32 %v1477_v54, %v5980_v39 }
 0x6c4   :  { %v1439_v43 = vadd.f32 %v1438_v38, %v5940_v14  ;;  %v1440_v58 = vpop.f32.mrb[38].mxu0  ;;  %v1480_v35 = vpop.f32.mrb[30].mxu1 }
 0x6c5   :  { %v1483_v52 = vadd.f32 %v1437_v41, %v5833_v63  ;;  %v1441_v56 = vpop.f32.mrb[39].mxu0  ;;  %v4524_v60 = vpop.f32.mrb[31].mxu1 }
 0x6c6   :  { %v1490_v23 = vadd.f32 %v1439_v43, %v5842_v4 }
 0x6c7   :  { %v3925_v45 = vmul.f32 -1.442695, %v1483_v52 }
 0x6c8   :  { %v3926_v44 = vmul.f32 -1.442695, %v1490_v23 }
 0x6c9   :  { %5074 = vpow2.f32 %v3925_v45 }
 0x6ca   :  { %5076 = vpow2.f32 %v3926_v44 }
 0x6d3   :  { %v5075_v47 = vpop.eup %5074 }
 0x6d4   :  { %v1487_v50 = vadd.f32 1.0, %v5075_v47  ;;  %v5077_v59 = vpop.eup %5076  ;;  %v6174_v47 = vld [vmem:[%s7240_s7] ss:$12 sps:$4 sm:$0xff]  }
 0x6d5   :  { %v1494_v48 = vadd.f32 1.0, %v5077_v59  ;;  %v6198_v59 = vld [vmem:[%s7240_s7 + $0x34] ss:$12 sps:$4 sm:$0xff]  }
 0x6d6   :  { %5078 = vrcp.f32 %v1487_v50  ;;  %v6191_v50 = vld [vmem:[%s7240_s7 + $0x18] ss:$12 sps:$4 sm:$0xff]  }
 0x6e0   :  { %v5079_v37 = vpop.eup %5078 }
 0x6e1   :  { %v1497_v1 = vmul.f32 %v5079_v37, %v1478_v61  ;;  %v6205_v61 = vld [vmem:[%s7240_s7 + $0x30] ss:$12 sps:$4 sm:$0xff]   ;;  %v6212_v37 = vld [vmem:[%s7240_s7 + $0x4c] ss:$12 sps:$4 sm:$0xff]  }
 0x6e3   :  { %v1498_v18 = vadd.f32 %v1497_v1, %v5963_v33  ;;  %v6219_v1 = vld [vmem:[%s7240_s7 + $0x48] ss:$12 sps:$4 sm:$0xff]  }
 0x6e5   :  { %5080 = vtanh.f32 %v1498_v18  ;;  %v6226_v18 = vld [vmem:[%s7240_s7 + $0x64] ss:$12 sps:$4 sm:$0xff]  }
 0x6e6   :  { %5082 = vrcp.f32 %v1494_v48  ;;  %v6233_v48 = vld [vmem:[%s7240_s7 + $0x60] ss:$12 sps:$4 sm:$0xff]  }
 0x6ef   :  { %v5081_v63 = vpop.eup %5080 }
 0x6f0   :  { %v1500_v4 = vsub.f32 %v6075_v49, %v5081_v63  ;;  %v5083_v41 = vpop.eup %5082 }
 0x6f2   :  { %v1501_v38 = vmul.f32 %v5083_v41, %v1500_v4  ;;  %v6247_v4 = vld [vmem:[%s7240_s7 + $0x78] ss:$12 sps:$4 sm:$0xff]   ;;  %v6254_v41 = vld [vmem:[%s7240_s7 + $0x94] ss:$12 sps:$4 sm:$0xff]  }
 0x6f4   :  { %v6121_v0 = vadd.f32 %v5081_v63, %v1501_v38  ;;  %v6240_v63 = vld [vmem:[%s7240_s7 + $0x7c] ss:$12 sps:$4 sm:$0xff]  }
 0x6f5   :  { %v6261_v38 = vld [vmem:[%s7240_s7 + $0x90] ss:$12 sps:$4 sm:$0xff]  }
 0x6f6   :  { %v1511_v43 = vpack.c.bf16 %v6121_v0, %v6121_v0 }
 0x6f8   :  { %1545 = vmatmul.mubr.bf16.vlgmr.msra.gmra.mrb[40].mxu0 %v1511_v43  ;;  %4542 = vmatmul.mubr.bf16.vlgmr.msra.gmra.mrb[32].mxu1 %v1511_v43  ;;  %v6268_v43 = vld [vmem:[%s7240_s7 + $0xac] ss:$12 sps:$4 sm:$0xff]  }
 0x6f9   :  { %1623 = vmatpush1.bf16.msra.mxu0 %v5618_v5  ;;  %4546 = vmatpush3.bf16.msra.mxu1 %v5811_v55 }
 0x6fa   :  { %1624 = vmatprep.subr.bf16.mxu0 %v5624_v6  ;;  %4547 = vmatprep.subr.bf16.mxu1 %v7269_v40 }
 0x6fb   :  { %1654 = vmatprep.mubr.bf16.mxu0 %v7270_v51  ;;  %4561 = vmatprep.mubr.msk.bf16.mxu1 %vm5343_vm0, %v7269_v40 }
 0x6fd   :  { %1625 = vmatpush1.bf16.msra.mxu0 %v5631_v7  ;;  %4548 = vmatpush3.bf16.msra.mxu1 %v5822_v57 }
 0x6fe   :  { %1626 = vmatprep.subr.bf16.mxu0 %v5638_v8  ;;  %4549 = vmatprep.subr.bf16.mxu1 %v7269_v40 }
 0x701   :  { %1627 = vmatpush1.bf16.msra.mxu0 %v5649_v10  ;;  %4550 = vmatpush3.bf16.msra.mxu1 %v5839_v2 }
 0x702   :  { %1628 = vmatprep.subr.bf16.mxu0 %v5655_v11  ;;  %4551 = vmatprep.subr.bf16.mxu1 %v7269_v40 }
 0x705   :  { %1629 = vmatpush1.bf16.msra.mxu0 %v5662_v12  ;;  %4552 = vmatpush3.bf16.msra.mxu1 %v5850_v9 }
 0x706   :  { %1630 = vmatprep.subr.bf16.mxu0 %v5669_v13  ;;  %4553 = vmatprep.subr.bf16.mxu1 %v7269_v40 }
 0x709   :  { %1631 = vmatpush1.bf16.msra.mxu0 %v5680_v15  ;;  %4554 = vmatpush3.bf16.msra.mxu1 %v5868_v28 }
 0x70a   :  { %1632 = vmatprep.subr.bf16.mxu0 %v5686_v16  ;;  %4555 = vmatprep.subr.bf16.mxu1 %v7269_v40 }
 0x70d   :  { %1633 = vmatpush1.bf16.msra.mxu0 %v5693_v17  ;;  %4556 = vmatpush3.bf16.msra.mxu1 %v5878_v30 }
 0x70e   :  { %1634 = vmatprep.subr.bf16.mxu0 %v5706_v19  ;;  %4557 = vmatprep.subr.bf16.mxu1 %v7269_v40 }
 0x711   :  { %1635 = vmatpush1.bf16.msra.mxu0 %v5711_v20  ;;  %4558 = vmatpush3.bf16.msra.mxu1 %v5885_v31 }
 0x712   :  { %1636 = vmatprep.subr.bf16.mxu0 %v5723_v22  ;;  %4559 = vmatprep.subr.bf16.mxu1 %v7269_v40 }
 0x715   :  { %1637 = vmatpush1.bf16.msra.mxu0 %v5731_v24  ;;  %4560 = vmatpush3.bf16.msra.mxu1 %v5892_v32 }
 0x716   :  { %1732 = vmatprep.subr.bf16.mxu0 %v5608_v3  ;;  %4565 = vmatprep.subr.bf16.mxu1 %v7269_v40 }
 0x7cb   :  { %v1546_v5 = vpop.f32.mrb[40].mxu0  ;;  %v1587_v6 = vpop.f32.mrb[32].mxu1 }
 0x7cc   :  { %v1547_v7 = vadd.f32 %v1546_v5, %v5937_v62  ;;  %v1548_v8 = vpop.f32.mrb[41].mxu0  ;;  %v4543_v10 = vpop.f32.mrb[33].mxu1  ;;  %v1588_v54 = vadd.f32 %v1587_v6, %v5980_v39  ;;  %v6275_v5 = vld [vmem:[%s7240_s7 + $0xa8] ss:$12 sps:$4 sm:$0xff]   ;;  %v5223_v6 = vld [vmem:[%s7240_s7 + $0x4] ss:$12 sps:$4 sm:$0xff]  }
 0x7cd   :  { %v1549_v11 = vadd.f32 %v1548_v8, %v5940_v14  ;;  %v1550_v12 = vpop.f32.mrb[42].mxu0  ;;  %v1590_v13 = vpop.f32.mrb[34].mxu1 }
 0x7ce   :  { %v1593_v15 = vadd.f32 %v1547_v7, %v5856_v21  ;;  %v1551_v16 = vpop.f32.mrb[43].mxu0  ;;  %v4544_v17 = vpop.f32.mrb[35].mxu1 }
 0x7cf   :  { %v1600_v19 = vadd.f32 %v1549_v11, %v5859_v25 }
 0x7d0   :  { %v3927_v20 = vmul.f32 -1.442695, %v1593_v15 }
 0x7d1   :  { %v3928_v3 = vmul.f32 -1.442695, %v1600_v19 }
 0x7d2   :  { %5084 = vpow2.f32 %v3927_v20 }
 0x7d3   :  { %5086 = vpow2.f32 %v3928_v3 }
 0x7dc   :  { %v5085_v22 = vpop.eup %5084 }
 0x7dd   :  { %v1597_v24 = vadd.f32 1.0, %v5085_v22  ;;  %v5087_v33 = vpop.eup %5086 }
 0x7de   :  { %v1604_v56 = vadd.f32 1.0, %v5087_v33 }
 0x7df   :  { %5088 = vrcp.f32 %v1597_v24 }
 0x7e9   :  { %v5089_v58 = vpop.eup %5088 }
 0x7ea   :  { %v1607_v35 = vmul.f32 %v5089_v58, %v1588_v54 }
 0x7ec   :  { %v1608_v52 = vadd.f32 %v1607_v35, %v5969_v42  ;;  %v6181_v42 = vld [vmem:[%s7240_s7 + $0x1c] ss:$12 sps:$4 sm:$0xff]  }
 0x7ee   :  { %5090 = vtanh.f32 %v1608_v52 }
 0x7ef   :  { %5092 = vrcp.f32 %v1604_v56 }
 0x7f8   :  { %v5091_v21 = vpop.eup %5090 }
 0x7f9   :  { %v1610_v25 = vsub.f32 %v6121_v0, %v5091_v21  ;;  %v5093_v60 = vpop.eup %5092 }
 0x7fb   :  { %v1611_v23 = vmul.f32 %v5093_v60, %v1610_v25 }
 0x7fd   :  { %v6167_v45 = vadd.f32 %v5091_v21, %v1611_v23 }
 0x7ff   :  { %v1621_v44 = vpack.c.bf16 %v6167_v45, %v6167_v45 }
 0x801   :  { %1655 = vmatmul.mubr.bf16.vlgmr.msra.gmra.mrb[44].mxu0 %v1621_v44  ;;  %4562 = vmatmul.mubr.bf16.vlgmr.msra.gmra.mrb[36].mxu1 %v1621_v44 }
 0x802   :  { %1733 = vmatpush1.bf16.msra.mxu0 %v6174_v47  ;;  %4566 = vmatpush3.bf16.msra.mxu1 %v5811_v55 }
 0x803   :  { %1734 = vmatprep.subr.bf16.mxu0 %v6181_v42  ;;  %4567 = vmatprep.subr.bf16.mxu1 %v7269_v40 }
 0x804   :  { %1764 = vmatprep.mubr.bf16.mxu0 %v7270_v51  ;;  %4581 = vmatprep.mubr.msk.bf16.mxu1 %vm5343_vm0, %v7269_v40 }
 0x806   :  { %1735 = vmatpush1.bf16.msra.mxu0 %v6191_v50  ;;  %4568 = vmatpush3.bf16.msra.mxu1 %v5822_v57 }
 0x807   :  { %1736 = vmatprep.subr.bf16.mxu0 %v6198_v59  ;;  %4569 = vmatprep.subr.bf16.mxu1 %v7269_v40 }
 0x80a   :  { %1737 = vmatpush1.bf16.msra.mxu0 %v6205_v61  ;;  %4570 = vmatpush3.bf16.msra.mxu1 %v5839_v2 }
 0x80b   :  { %1738 = vmatprep.subr.bf16.mxu0 %v6212_v37  ;;  %4571 = vmatprep.subr.bf16.mxu1 %v7269_v40 }
 0x80e   :  { %1739 = vmatpush1.bf16.msra.mxu0 %v6219_v1  ;;  %4572 = vmatpush3.bf16.msra.mxu1 %v5850_v9 }
 0x80f   :  { %1740 = vmatprep.subr.bf16.mxu0 %v6226_v18  ;;  %4573 = vmatprep.subr.bf16.mxu1 %v7269_v40 }
 0x812   :  { %1741 = vmatpush1.bf16.msra.mxu0 %v6233_v48  ;;  %4574 = vmatpush3.bf16.msra.mxu1 %v5868_v28 }
 0x813   :  { %1742 = vmatprep.subr.bf16.mxu0 %v6240_v63  ;;  %4575 = vmatprep.subr.bf16.mxu1 %v7269_v40 }
 0x816   :  { %1743 = vmatpush1.bf16.msra.mxu0 %v6247_v4  ;;  %4576 = vmatpush3.bf16.msra.mxu1 %v5878_v30 }
 0x817   :  { %1744 = vmatprep.subr.bf16.mxu0 %v6254_v41  ;;  %4577 = vmatprep.subr.bf16.mxu1 %v7269_v40 }
 0x81a   :  { %1745 = vmatpush1.bf16.msra.mxu0 %v6261_v38  ;;  %4578 = vmatpush3.bf16.msra.mxu1 %v5885_v31 }
 0x81b   :  { %1746 = vmatprep.subr.bf16.mxu0 %v6268_v43  ;;  %4579 = vmatprep.subr.bf16.mxu1 %v7269_v40 }
 0x81e   :  { %1747 = vmatpush1.bf16.msra.mxu0 %v6275_v5  ;;  %4580 = vmatpush3.bf16.msra.mxu1 %v5892_v32 }
 0x81f   :  { %1842 = vmatprep.subr.bf16.mxu0 %v5223_v6  ;;  %4585 = vmatprep.subr.bf16.mxu1 %v7269_v40 }
 0x8d4   :  { %v1656_v7 = vpop.f32.mrb[44].mxu0  ;;  %v1697_v8 = vpop.f32.mrb[36].mxu1 }
 0x8d5   :  { %v1657_v10 = vadd.f32 %v1656_v7, %v5937_v62  ;;  %v1658_v11 = vpop.f32.mrb[45].mxu0  ;;  %v4563_v12 = vpop.f32.mrb[37].mxu1  ;;  %v1698_v35 = vadd.f32 %v1697_v8, %v5980_v39 }
 0x8d6   :  { %v1659_v13 = vadd.f32 %v1658_v11, %v5940_v14  ;;  %v1660_v15 = vpop.f32.mrb[46].mxu0  ;;  %v1700_v16 = vpop.f32.mrb[38].mxu1  ;;  %v4956_v12 = vld [vmem:[%s7239_s6] ss:$12 sps:$4 sm:$0xff]  }
 0x8d7   :  { %v1703_v17 = vadd.f32 %v1657_v10, %v5862_v26  ;;  %v1661_v19 = vpop.f32.mrb[47].mxu0  ;;  %v4564_v20 = vpop.f32.mrb[39].mxu1  ;;  %v4962_v15 = vld [vmem:[%s7239_s6 + $0x1c] ss:$12 sps:$4 sm:$0xff]   ;;  %v4963_v16 = vld [vmem:[%s7239_s6 + $0x20] ss:$12 sps:$4 sm:$0xff]  }
 0x8d8   :  { %v1710_v3 = vadd.f32 %v1659_v13, %v5871_v29  ;;  %v4960_v19 = vld [vmem:[%s7239_s6 + $0x18] ss:$12 sps:$4 sm:$0xff]   ;;  %v4966_v20 = vld [vmem:[%s7239_s6 + $0x34] ss:$12 sps:$4 sm:$0xff]  }
 0x8d9   :  { %v3929_v22 = vmul.f32 -1.442695, %v1703_v17  ;;  %v1953_v17 = vpack.c.bf16 %v6029_v46, %v5983_v27  ;;  %v4964_v27 = vld [vmem:[%s7239_s6 + $0x30] ss:$12 sps:$4 sm:$0xff]   ;;  %v4970_v46 = vld [vmem:[%s7239_s6 + $0x4c] ss:$12 sps:$4 sm:$0xff]  }
 0x8da   :  { %v3930_v24 = vmul.f32 -1.442695, %v1710_v3  ;;  %v4967_v3 = vld [vmem:[%s7239_s6 + $0x38] ss:$12 sps:$4 sm:$0xff]  }
 0x8db   :  { %5094 = vpow2.f32 %v3929_v22  ;;  %v4971_v22 = vld [vmem:[%s7239_s6 + $0x50] ss:$12 sps:$4 sm:$0xff]  }
 0x8dc   :  { %5096 = vpow2.f32 %v3930_v24  ;;  %v4968_v24 = vld [vmem:[%s7239_s6 + $0x48] ss:$12 sps:$4 sm:$0xff]  }
 0x8e5   :  { %v5095_v33 = vpop.eup %5094 }
 0x8e6   :  { %v1707_v54 = vadd.f32 1.0, %v5095_v33  ;;  %v5097_v58 = vpop.eup %5096  ;;  %v4974_v33 = vld [vmem:[%s7239_s6 + $0x64] ss:$12 sps:$4 sm:$0xff]  }
 0x8e7   :  { %v1714_v25 = vadd.f32 1.0, %v5097_v58  ;;  %v4972_v58 = vld [vmem:[%s7239_s6 + $0x60] ss:$12 sps:$4 sm:$0xff]  }
 0x8e8   :  { %5098 = vrcp.f32 %v1707_v54  ;;  %v4975_v54 = vld [vmem:[%s7239_s6 + $0x68] ss:$12 sps:$4 sm:$0xff]  }
 0x8f2   :  { %v5099_v52 = vpop.eup %5098 }
 0x8f3   :  { %v1717_v56 = vmul.f32 %v5099_v52, %v1698_v35  ;;  %v4978_v35 = vld [vmem:[%s7239_s6 + $0x7c] ss:$12 sps:$4 sm:$0xff]   ;;  %v4979_v52 = vld [vmem:[%s7239_s6 + $0x80] ss:$12 sps:$4 sm:$0xff]  }
 0x8f5   :  { %v1718_v21 = vadd.f32 %v1717_v56, %v5973_v53  ;;  %v4958_v53 = vld [vmem:[%s7239_s6 + $0x4] ss:$12 sps:$4 sm:$0xff]  }
 0x8f6   :  { %v4976_v56 = vld [vmem:[%s7239_s6 + $0x78] ss:$12 sps:$4 sm:$0xff]  }
 0x8f7   :  { %5100 = vtanh.f32 %v1718_v21  ;;  %v4982_v21 = vld [vmem:[%s7239_s6 + $0x94] ss:$12 sps:$4 sm:$0xff]  }
 0x8f8   :  { %5102 = vrcp.f32 %v1714_v25  ;;  %v4983_v25 = vld [vmem:[%s7239_s6 + $0x98] ss:$12 sps:$4 sm:$0xff]  }
 0x901   :  { %v5101_v26 = vpop.eup %5100 }
 0x902   :  { %v1720_v29 = vsub.f32 %v6167_v45, %v5101_v26  ;;  %v5103_v60 = vpop.eup %5102 }
 0x904   :  { %v1721_v23 = vmul.f32 %v5103_v60, %v1720_v29  ;;  %v4986_v29 = vld [vmem:[%s7239_s6 + $0xac] ss:$12 sps:$4 sm:$0xff]   ;;  %v4987_v60 = vld [vmem:[%s7239_s6 + $0xb0] ss:$12 sps:$4 sm:$0xff]  }
 0x906   :  { %v6290_v44 = vadd.f32 %v5101_v26, %v1721_v23  ;;  %v4980_v26 = vld [vmem:[%s7239_s6 + $0x90] ss:$12 sps:$4 sm:$0xff]   ;;  %v4984_v23 = vld [vmem:[%s7239_s6 + $0xa8] ss:$12 sps:$4 sm:$0xff]  }
 0x908   :  { %v1731_v6 = vpack.c.bf16 %v6290_v44, %v6290_v44 }
 0x90a   :  { %1765 = vmatmul.mubr.bf16.vlgmr.msra.gmra.mrb[48].mxu0 %v1731_v6  ;;  %4582 = vmatmul.mubr.bf16.vlgmr.msra.gmra.mrb[40].mxu1 %v1731_v6  ;;  %v1954_v6 = vpack.c.bf16 %v6121_v0, %v6075_v49  ;;  %v6424_v49 = vld [vmem:[%s7240_s7 + $0xc4] ss:$12 sps:$4 sm:$0xff]   ;;  %v6429_v0 = vld [vmem:[%s7240_s7 + $0xc0] ss:$12 sps:$4 sm:$0xff]  }
 0x90b   :  { %1843 = vmatpush1.bf16.msra.mxu0 %v6174_v47  ;;  %4586 = vmatpush3.bf16.msra.mxu1 %v5811_v55  ;;  %v4959_v55 = vld [vmem:[%s7239_s6 + $0x8] ss:$12 sps:$4 sm:$0xff]  }
 0x90c   :  { %1844 = vmatprep.subr.bf16.mxu0 %v6181_v42  ;;  %4587 = vmatprep.subr.bf16.mxu1 %v7269_v40 }
 0x90d   :  { %1874 = vmatprep.mubr.bf16.mxu0 %v7270_v51  ;;  %4601 = vmatprep.mubr.msk.bf16.mxu1 %vm5343_vm0, %v7269_v40 }
 0x90f   :  { %1845 = vmatpush1.bf16.msra.mxu0 %v6191_v50  ;;  %4588 = vmatpush3.bf16.msra.mxu1 %v5822_v57 }
 0x910   :  { %1846 = vmatprep.subr.bf16.mxu0 %v6198_v59  ;;  %4589 = vmatprep.subr.bf16.mxu1 %v7269_v40 }
 0x913   :  { %1847 = vmatpush1.bf16.msra.mxu0 %v6205_v61  ;;  %4590 = vmatpush3.bf16.msra.mxu1 %v5839_v2 }
 0x914   :  { %1848 = vmatprep.subr.bf16.mxu0 %v6212_v37  ;;  %4591 = vmatprep.subr.bf16.mxu1 %v7269_v40 }
 0x917   :  { %1849 = vmatpush1.bf16.msra.mxu0 %v6219_v1  ;;  %4592 = vmatpush3.bf16.msra.mxu1 %v5850_v9 }
 0x918   :  { %1850 = vmatprep.subr.bf16.mxu0 %v6226_v18  ;;  %4593 = vmatprep.subr.bf16.mxu1 %v7269_v40 }
 0x91b   :  { %1851 = vmatpush1.bf16.msra.mxu0 %v6233_v48  ;;  %4594 = vmatpush3.bf16.msra.mxu1 %v5868_v28 }
 0x91c   :  { %1852 = vmatprep.subr.bf16.mxu0 %v6240_v63  ;;  %4595 = vmatprep.subr.bf16.mxu1 %v7269_v40 }
 0x91f   :  { %1853 = vmatpush1.bf16.msra.mxu0 %v6247_v4  ;;  %4596 = vmatpush3.bf16.msra.mxu1 %v5878_v30 }
 0x920   :  { %1854 = vmatprep.subr.bf16.mxu0 %v6254_v41  ;;  %4597 = vmatprep.subr.bf16.mxu1 %v7269_v40 }
 0x923   :  { %1855 = vmatpush1.bf16.msra.mxu0 %v6261_v38  ;;  %4598 = vmatpush3.bf16.msra.mxu1 %v5885_v31 }
 0x924   :  { %1856 = vmatprep.subr.bf16.mxu0 %v6268_v43  ;;  %4599 = vmatprep.subr.bf16.mxu1 %v7269_v40  ;;  %v7271_v43 = vld [vmem:[#allocation21_spill] sm:$0xff] }
 0x927   :  { %1857 = vmatpush1.bf16.msra.mxu0 %v6275_v5  ;;  %4600 = vmatpush3.bf16.msra.mxu1 %v5892_v32 }
 0x928   :  { %2147 = vmatprep.subr.bf16.mxu0 %v4958_v53  ;;  %4605 = vmatprep.subr.bf16.mxu1 %v4959_v55  ;;  %v1955_v53 = vpack.c.bf16 %v6290_v44, %v6167_v45  ;;  %v6436_v45 = vld [vmem:[%s7240_s7 + $0xdc] ss:$12 sps:$4 sm:$0xff]  }
 0x9dd   :  { %v1766_v57 = vpop.f32.mrb[48].mxu0  ;;  %v1807_v2 = vpop.f32.mrb[40].mxu1 }
 0x9de   :  { %v1767_v9 = vadd.f32 %v1766_v57, %v5937_v62  ;;  %v1768_v28 = vpop.f32.mrb[49].mxu0  ;;  %v4583_v30 = vpop.f32.mrb[41].mxu1  ;;  %v1808_v4 = vadd.f32 %v1807_v2, %v5980_v39  ;;  %v6453_v57 = vld [vmem:[%s7240_s7 + $0xf0] ss:$12 sps:$4 sm:$0xff]   ;;  %v6460_v2 = vld [vmem:[%s7240_s7 + $0x10c] ss:$12 sps:$4 sm:$0xff]  }
 0x9df   :  { %v1769_v31 = vadd.f32 %v1768_v28, %v5940_v14  ;;  %v1770_v47 = vpop.f32.mrb[50].mxu0  ;;  %v1810_v32 = vpop.f32.mrb[42].mxu1  ;;  %v6472_v28 = vld [vmem:[%s7240_s7 + $0x124] ss:$12 sps:$4 sm:$0xff]   ;;  %v6477_v30 = vld [vmem:[%s7240_s7 + $0x120] ss:$12 sps:$4 sm:$0xff]  }
 0x9e0   :  { %v1813_v42 = vadd.f32 %v1767_v9, %v5908_v34  ;;  %v1771_v50 = vpop.f32.mrb[51].mxu0  ;;  %v4584_v59 = vpop.f32.mrb[43].mxu1  ;;  %v6465_v9 = vld [vmem:[%s7240_s7 + $0x108] ss:$12 sps:$4 sm:$0xff]   ;;  %v6489_v47 = vld [vmem:[%s7240_s7 + $0x138] ss:$12 sps:$4 sm:$0xff]  }
 0x9e1   :  { %v1820_v61 = vadd.f32 %v1769_v31, %v5912_v36  ;;  %v6484_v31 = vld [vmem:[%s7240_s7 + $0x13c] ss:$12 sps:$4 sm:$0xff]   ;;  %v6496_v32 = vld [vmem:[%s7240_s7 + $0x154] ss:$12 sps:$4 sm:$0xff]   ;;  %v6512_v59 = vld [vmem:[%s7240_s7 + $0x16c] ss:$12 sps:$4 sm:$0xff]  }
 0x9e2   :  { %v3931_v37 = vmul.f32 -1.442695, %v1813_v42  ;;  %v6502_v42 = vld [vmem:[%s7240_s7 + $0x150] ss:$12 sps:$4 sm:$0xff]   ;;  %v6507_v50 = vld [vmem:[%s7240_s7 + $0xc8] ss:$12 sps:$4 sm:$0xff]  }
 0x9e3   :  { %v3932_v1 = vmul.f32 -1.442695, %v1820_v61  ;;  %v6519_v61 = vld [vmem:[%s7240_s7 + $0x168] ss:$12 sps:$4 sm:$0xff]  }
 0x9e4   :  { %5104 = vpow2.f32 %v3931_v37  ;;  %v6524_v37 = vld [vmem:[%s7240_s7 + $0xe0] ss:$12 sps:$4 sm:$0xff]  }
 0x9e5   :  { %5106 = vpow2.f32 %v3932_v1  ;;  %v6535_v1 = vld [vmem:[%s7240_s7 + $0xf8] ss:$12 sps:$4 sm:$0xff]  }
 0x9ee   :  { %v5105_v18 = vpop.eup %5104 }
 0x9ef   :  { %v1817_v48 = vadd.f32 1.0, %v5105_v18  ;;  %v5107_v63 = vpop.eup %5106  ;;  %v6541_v18 = vld [vmem:[%s7240_s7 + $0x110] ss:$12 sps:$4 sm:$0xff]  }
 0x9f0   :  { %v1824_v7 = vadd.f32 1.0, %v5107_v63  ;;  %v6555_v63 = vld [vmem:[%s7240_s7 + $0x140] ss:$12 sps:$4 sm:$0xff]  }
 0x9f1   :  { %5108 = vrcp.f32 %v1817_v48  ;;  %v6548_v48 = vld [vmem:[%s7240_s7 + $0x128] ss:$12 sps:$4 sm:$0xff]  }
 0x9fb   :  { %v5109_v41 = vpop.eup %5108 }
 0x9fc   :  { %v1827_v38 = vmul.f32 %v5109_v41, %v1808_v4  ;;  %v6562_v4 = vld [vmem:[%s7240_s7 + $0x158] ss:$12 sps:$4 sm:$0xff]   ;;  %v6569_v41 = vld [vmem:[%s7240_s7 + $0x170] ss:$12 sps:$4 sm:$0xff]  }
 0x9fe   :  { %v1828_v5 = vadd.f32 %v1827_v38, %v7271_v43 }
 0xa00   :  { %5110 = vtanh.f32 %v1828_v5 }
 0xa01   :  { %5112 = vrcp.f32 %v1824_v7 }
 0xa0a   :  { %v5111_v34 = vpop.eup %5110 }
 0xa0b   :  { %v1830_v36 = vsub.f32 %v6290_v44, %v5111_v34  ;;  %v5113_v8 = vpop.eup %5112  ;;  %v6441_v44 = vld [vmem:[%s7240_s7 + $0xd8] ss:$12 sps:$4 sm:$0xff]  }
 0xa0d   :  { %v1831_v10 = vmul.f32 %v5113_v8, %v1830_v36 }
 0xa0f   :  { %v6340_v11 = vadd.f32 %v5111_v34, %v1831_v10 }
 0xa11   :  { %v1841_v13 = vpack.c.bf16 %v6340_v11, %v6340_v11 }
 0xa13   :  { %1875 = vmatmul.mubr.bf16.vlgmr.msra.gmra.mrb[52].mxu0 %v1841_v13  ;;  %4602 = vmatmul.mubr.bf16.vlgmr.msra.gmra.mrb[44].mxu1 %v1841_v13 }
 0xa14   :  { %2148 = vmatpush1.bf16.msra.mxu0 %v4956_v12  ;;  %4606 = vmatpush3.bf16.msra.mxu1 %v4959_v55  ;;  %v6448_v55 = vld [vmem:[%s7240_s7 + $0xf4] ss:$12 sps:$4 sm:$0xff]  }
 0xa15   :  { %4621 = vmatprep.mubr.bf16.mxu1 %v1953_v17  ;;  %2149 = vmatprep.subr.bf16.mxu0 %v4962_v15  ;;  %v7272_v12 = vld [vmem:[#allocation18_spill] sm:$0xff] }
 0xa16   :  { %4607 = vmatprep.subr.bf16.mxu1 %v4963_v16  ;;  %2179 = vmatprep.mubr.bf16.mxu0 %v7270_v51 }
 0xa18   :  { %2150 = vmatpush1.bf16.msra.mxu0 %v4960_v19  ;;  %4608 = vmatpush3.bf16.msra.mxu1 %v4963_v16 }
 0xa19   :  { %2151 = vmatprep.subr.bf16.mxu0 %v4966_v20  ;;  %4609 = vmatprep.subr.bf16.mxu1 %v4967_v3 }
 0xa1c   :  { %2152 = vmatpush1.bf16.msra.mxu0 %v4964_v27  ;;  %4610 = vmatpush3.bf16.msra.mxu1 %v4967_v3 }
 0xa1d   :  { %2153 = vmatprep.subr.bf16.mxu0 %v4970_v46  ;;  %4611 = vmatprep.subr.bf16.mxu1 %v4971_v22 }
 0xa20   :  { %2154 = vmatpush1.bf16.msra.mxu0 %v4968_v24  ;;  %4612 = vmatpush3.bf16.msra.mxu1 %v4971_v22 }
 0xa21   :  { %2155 = vmatprep.subr.bf16.mxu0 %v4974_v33  ;;  %4613 = vmatprep.subr.bf16.mxu1 %v4975_v54 }
 0xa24   :  { %2156 = vmatpush1.bf16.msra.mxu0 %v4972_v58  ;;  %4614 = vmatpush3.bf16.msra.mxu1 %v4975_v54  ;;  %v7274_v58 = vld [vmem:[#allocation22_spill] sm:$0xff] }
 0xa25   :  { %2157 = vmatprep.subr.bf16.mxu0 %v4978_v35  ;;  %4615 = vmatprep.subr.bf16.mxu1 %v4979_v52 }
 0xa28   :  { %2158 = vmatpush1.bf16.msra.mxu0 %v4976_v56  ;;  %4616 = vmatpush3.bf16.msra.mxu1 %v4979_v52 }
 0xa29   :  { %2159 = vmatprep.subr.bf16.mxu0 %v4982_v21  ;;  %4617 = vmatprep.subr.bf16.mxu1 %v4983_v25 }
 0xa2c   :  { %2160 = vmatpush1.bf16.msra.mxu0 %v4980_v26  ;;  %4618 = vmatpush3.bf16.msra.mxu1 %v4983_v25 }
 0xa2d   :  { %2161 = vmatprep.subr.bf16.mxu0 %v4986_v29  ;;  %4619 = vmatprep.subr.bf16.mxu1 %v4987_v60 }
 0xa30   :  { %2162 = vmatpush1.bf16.msra.mxu0 %v4984_v23  ;;  %4620 = vmatpush3.bf16.msra.mxu1 %v4987_v60 }
 0xa31   :  { %4629 = vmatprep.subr.bf16.mxu1 %v7269_v40  ;;  %2500 = vmatprep.subr.bf16.mxu0 %v6424_v49 }
 0xa33   :  { %2180 = vmatmul.mubr.bf16.vlgmr.msra.gmra.mrb[56].mxu0 %v1953_v17  ;;  %4622 = vmatmul.mubr.bf16.vlgmr.msra.gmra.mrb[48].mxu1 %v1954_v6  ;;  %v7273_v17 = vld [vmem:[#allocation19_spill] sm:$0xff] }
 0xa34   :  { %4625 = vmatprep.mubr.bf16.mxu1 %v1955_v53  ;;  %2189 = vmatprep.mubr.bf16.mxu0 %v7270_v51 }
 0xa35   :  { %2501 = vmatpush1.bf16.msra.mxu0 %v6429_v0  ;;  %4630 = vmatpush3.bf16.msra.mxu1 %v6507_v50 }
 0xa36   :  { %2502 = vmatprep.subr.bf16.mxu0 %v6436_v45  ;;  %4631 = vmatprep.subr.bf16.mxu1 %v7269_v40 }
 0xa39   :  { %2503 = vmatpush1.bf16.msra.mxu0 %v6441_v44  ;;  %4632 = vmatpush3.bf16.msra.mxu1 %v6524_v37 }
 0xa3a   :  { %2504 = vmatprep.subr.bf16.mxu0 %v6448_v55  ;;  %4633 = vmatprep.subr.bf16.mxu1 %v7269_v40 }
 0xa3b   :  { %2190 = vmatmul.mubr.bf16.gmra.mrb[60].mxu0 %v1954_v6 }
 0xa3c   :  { %2199 = vmatprep.mubr.bf16.mxu0 %v7270_v51 }
 0xa3d   :  { %2505 = vmatpush1.bf16.msra.mxu0 %v6453_v57  ;;  %4634 = vmatpush3.bf16.msra.mxu1 %v6535_v1 }
 0xa3e   :  { %2506 = vmatprep.subr.bf16.mxu0 %v6460_v2  ;;  %4635 = vmatprep.subr.bf16.mxu1 %v7269_v40 }
 0xa41   :  { %2507 = vmatpush1.bf16.msra.mxu0 %v6465_v9  ;;  %4636 = vmatpush3.bf16.msra.mxu1 %v6541_v18 }
 0xa42   :  { %2508 = vmatprep.subr.bf16.mxu0 %v6472_v28  ;;  %4637 = vmatprep.subr.bf16.mxu1 %v7269_v40 }
 0xa43   :  { %2200 = vmatmul.mubr.bf16.gmra.mrb[64].mxu0 %v1955_v53 }
 0xa44   :  { %2209 = vmatprep.mubr.bf16.mxu0 %v7270_v51 }
 0xa45   :  { %2509 = vmatpush1.bf16.msra.mxu0 %v6477_v30  ;;  %4638 = vmatpush3.bf16.msra.mxu1 %v6548_v48 }
 0xa46   :  { %2510 = vmatprep.subr.bf16.mxu0 %v6484_v31  ;;  %4639 = vmatprep.subr.bf16.mxu1 %v7269_v40 }
 0xa49   :  { %2511 = vmatpush1.bf16.msra.mxu0 %v6489_v47  ;;  %4640 = vmatpush3.bf16.msra.mxu1 %v6555_v63 }
 0xa4a   :  { %2512 = vmatprep.subr.bf16.mxu0 %v6496_v32  ;;  %4641 = vmatprep.subr.bf16.mxu1 %v7269_v40 }
 0xa4d   :  { %2513 = vmatpush1.bf16.msra.mxu0 %v6502_v42  ;;  %4642 = vmatpush3.bf16.msra.mxu1 %v6562_v4 }
 0xa4e   :  { %2514 = vmatprep.subr.bf16.mxu0 %v6512_v59  ;;  %4643 = vmatprep.subr.bf16.mxu1 %v7269_v40 }
 0xa51   :  { %2515 = vmatpush1.bf16.msra.mxu0 %v6519_v61  ;;  %4644 = vmatpush3.bf16.msra.mxu1 %v6569_v41 }
 0xa52   :  { %2605 = vmatprep.subr.bf16.mxu0 %v6424_v49  ;;  %4649 = vmatprep.subr.bf16.mxu1 %v7269_v40 }
 0xae6   :  { %v1876_v38 = vpop.f32.mrb[52].mxu0  ;;  %v1917_v43 = vpop.f32.mrb[44].mxu1 }
 0xae7   :  { %v1877_v5 = vadd.f32 %v1876_v38, %v5937_v62  ;;  %v1878_v7 = vpop.f32.mrb[53].mxu0  ;;  %v4603_v34 = vpop.f32.mrb[45].mxu1  ;;  %v1918_v22 = vadd.f32 %v1917_v43, %v5980_v39 }
 0xae8   :  { %v1879_v36 = vadd.f32 %v1878_v7, %v5940_v14  ;;  %v1880_v8 = vpop.f32.mrb[54].mxu0  ;;  %v1920_v10 = vpop.f32.mrb[46].mxu1 }
 0xae9   :  { %v1923_v13 = vadd.f32 %v1877_v5, %v7272_v12  ;;  %v1881_v15 = vpop.f32.mrb[55].mxu0  ;;  %v4604_v16 = vpop.f32.mrb[47].mxu1 }
 0xaea   :  { %v1930_v19 = vadd.f32 %v1879_v36, %v7273_v17  ;;  %v7281_v17 = vld [vmem:[#allocation16_spill] sm:$0xff] }
 0xaeb   :  { %v3933_v20 = vmul.f32 -1.442695, %v1923_v13 }
 0xaec   :  { %v3934_v3 = vmul.f32 -1.442695, %v1930_v19 }
 0xaed   :  { %5114 = vpow2.f32 %v3933_v20 }
 0xaee   :  { %5116 = vpow2.f32 %v3934_v3 }
 0xaf7   :  { %v5115_v27 = vpop.eup %5114 }
 0xaf8   :  { %v1927_v46 = vadd.f32 1.0, %v5115_v27  ;;  %v5117_v62 = vpop.eup %5116  ;;  %v7284_v27 = vld [vmem:[#allocation17_spill] sm:$0xff] }
 0xaf9   :  { %v1934_v52 = vadd.f32 1.0, %v5117_v62  ;;  %v7285_v62 = vld [vmem:[#allocation15_spill] sm:$0xff] }
 0xafa   :  { %5118 = vrcp.f32 %v1927_v46 }
 0xb04   :  { %v5119_v24 = vpop.eup %5118 }
 0xb05   :  { %v1937_v14 = vmul.f32 %v5119_v24, %v1918_v22  ;;  %v7286_v22 = vsub.s32 2, %v7285_v62 }
 0xb06   :  { %v6579_v33 = vpop.f32.mrb[56].mxu0  ;;  %v6581_v54 = vpop.f32.mrb[48].mxu1 }
 0xb07   :  { %v1938_v35 = vadd.f32 %v1937_v14, %v7274_v58  ;;  %v6584_v56 = vpop.f32.mrb[57].mxu0  ;;  %v6586_v21 = vpop.f32.mrb[49].mxu1 }
 0xb08   :  { %v6588_v25 = vpop.f32.mrb[58].mxu0  ;;  %v6590_v26 = vpop.f32.mrb[50].mxu1 }
 0xb09   :  { %5120 = vtanh.f32 %v1938_v35  ;;  %v6592_v29 = vpop.f32.mrb[59].mxu0  ;;  %v6594_v39 = vpop.f32.mrb[51].mxu1  ;;  %v7289_v35 = vsub.s32 3, %v7285_v62 }
 0xb0a   :  { %5122 = vrcp.f32 %v1934_v52 }
 0xb0e   :  { %v6596_v60 = vpop.f32.mrb[60].mxu0 }
 0xb0f   :  { %v6598_v23 = vpop.f32.mrb[61].mxu0 }
 0xb10   :  { %v6600_v6 = vpop.f32.mrb[62].mxu0 }
 0xb11   :  { %v6602_v53 = vpop.f32.mrb[63].mxu0 }
 0xb13   :  { %v5121_v38 = vpop.eup %5120 }
 0xb14   :  { %v1940_v43 = vsub.f32 %v6340_v11, %v5121_v38  ;;  %v5123_v5 = vpop.eup %5122 }
 0xb16   :  { %v6605_v7 = vpop.f32.mrb[64].mxu0  ;;  %v1941_v34 = vmul.f32 %v5123_v5, %v1940_v43 }
 0xb17   :  { %7275 = vst [vmem:[#allocation21_spill] sm:$0xff] %v6605_v7  ;;  %v6607_v36 = vpop.f32.mrb[65].mxu0 }
 0xb18   :  { %7276 = vst [vmem:[#allocation18_spill] sm:$0xff] %v6607_v36  ;;  %v6609_v8 = vpop.f32.mrb[66].mxu0  ;;  %v1942_v10 = vadd.f32 %v5121_v38, %v1941_v34 }
 0xb19   :  { %7277 = vst [vmem:[#allocation19_spill] sm:$0xff] %v6609_v8  ;;  %v6611_v12 = vpop.f32.mrb[67].mxu0 }
 0xb1a   :  { %7278 = vst [vmem:[#allocation22_spill] sm:$0xff] %v6611_v12  ;;  %v1956_v13 = vpack.c.bf16 %v1942_v10, %v6340_v11  ;;  %v3935_v11 = vld [vmem:[%s7241_s8 + $0x6] sm:$0x3f] }
 0xb1b   :  { %v1995_v19 = vrot.slane %v3935_v11, %v7281_v17  ;;  %v2345_v46 = vrot.slane %v3935_v11, %v7284_v27  ;;  %v1999_v24 = vrot.slane %v3935_v11, %v7286_v22  ;;  %v2349_v52 = vrot.slane %v3935_v11, %v7289_v35 }
 0xb1c   :  { %2210 = vmatmul.mubr.bf16.gmra.mrb[68].mxu0 %v1956_v13  ;;  %4626 = vmatmul.mubr.bf16.gmra.mrb[52].mxu1 %v1956_v13 }
 0xb1d   :  { %2532 = vmatprep.mubr.bf16.mxu0 %v7270_v51  ;;  %4645 = vmatprep.mubr.msk.bf16.mxu1 %vm5343_vm0, %v7269_v40  ;;  %v6680_v5 = vrot.slane %v1995_v19, %v7281_v17  ;;  %v6683_v34 = vrot.slane %v2345_v46, %v7284_v27  ;;  %v6686_v10 = vrot.slane %v1999_v24, %v7281_v17 }
 0xb1e   :  { %v6689_v13 = vrot.slane %v2349_v52, %v7284_v27 }
 0xb1f   :  { %v2182_v35 = vadd.f32 %v6579_v33, %v6680_v5  ;;  %v2184_v19 = vadd.f32 %v6584_v56, %v6686_v10  ;;  %v7293_v56 = vsub.s32 4, %v7285_v62 }
 0xb21   :  { %v2003_v7 = vrot.slane %v3935_v11, %v7293_v56 }
 0xb24   :  { %2533 = vmatmul.mubr.bf16.vlgmr.msra.gmra.mrb[72].mxu0 %v7270_v51  ;;  %4646 = vmatmul.mubr.bf16.vlgmr.msra.gmra.mrb[56].mxu1 %v7270_v51 }
 0xb25   :  { %2606 = vmatpush1.bf16.msra.mxu0 %v6429_v0  ;;  %4650 = vmatpush3.bf16.msra.mxu1 %v6507_v50 }
 0xb26   :  { %2607 = vmatprep.subr.bf16.mxu0 %v6436_v45  ;;  %4651 = vmatprep.subr.bf16.mxu1 %v7269_v40 }
 0xb27   :  { %2637 = vmatprep.mubr.bf16.mxu0 %v7270_v51  ;;  %4665 = vmatprep.mubr.msk.bf16.mxu1 %vm5343_vm0, %v7269_v40 }
 0xb29   :  { %2608 = vmatpush1.bf16.msra.mxu0 %v6441_v44  ;;  %4652 = vmatpush3.bf16.msra.mxu1 %v6524_v37 }
 0xb2a   :  { %2609 = vmatprep.subr.bf16.mxu0 %v6448_v55  ;;  %4653 = vmatprep.subr.bf16.mxu1 %v7269_v40 }
 0xb2d   :  { %2610 = vmatpush1.bf16.msra.mxu0 %v6453_v57  ;;  %4654 = vmatpush3.bf16.msra.mxu1 %v6535_v1 }
 0xb2e   :  { %2611 = vmatprep.subr.bf16.mxu0 %v6460_v2  ;;  %4655 = vmatprep.subr.bf16.mxu1 %v7269_v40 }
 0xb31   :  { %2612 = vmatpush1.bf16.msra.mxu0 %v6465_v9  ;;  %4656 = vmatpush3.bf16.msra.mxu1 %v6541_v18 }
 0xb32   :  { %2613 = vmatprep.subr.bf16.mxu0 %v6472_v28  ;;  %4657 = vmatprep.subr.bf16.mxu1 %v7269_v40 }
 0xb35   :  { %2614 = vmatpush1.bf16.msra.mxu0 %v6477_v30  ;;  %4658 = vmatpush3.bf16.msra.mxu1 %v6548_v48 }
 0xb36   :  { %2615 = vmatprep.subr.bf16.mxu0 %v6484_v31  ;;  %4659 = vmatprep.subr.bf16.mxu1 %v7269_v40 }
 0xb39   :  { %2616 = vmatpush1.bf16.msra.mxu0 %v6489_v47  ;;  %4660 = vmatpush3.bf16.msra.mxu1 %v6555_v63 }
 0xb3a   :  { %2617 = vmatprep.subr.bf16.mxu0 %v6496_v32  ;;  %4661 = vmatprep.subr.bf16.mxu1 %v7269_v40 }
 0xb3d   :  { %2618 = vmatpush1.bf16.msra.mxu0 %v6502_v42  ;;  %4662 = vmatpush3.bf16.msra.mxu1 %v6562_v4 }
 0xb3e   :  { %2619 = vmatprep.subr.bf16.mxu0 %v6512_v59  ;;  %4663 = vmatprep.subr.bf16.mxu1 %v7269_v40 }
 0xb41   :  { %2620 = vmatpush1.bf16.msra.mxu0 %v6519_v61  ;;  %4664 = vmatpush3.bf16.msra.mxu1 %v6569_v41 }
 0xb42   :  { %2710 = vmatprep.subr.bf16.mxu0 %v6424_v49  ;;  %4669 = vmatprep.subr.bf16.mxu1 %v7269_v40 }
 0xbef   :  { %v6657_v15 = vpop.f32.mrb[68].mxu0  ;;  %v6659_v16 = vpop.f32.mrb[52].mxu1 }
 0xbf0   :  { %7279 = vst [vmem:[#allocation23_spill] sm:$0xff] %v6657_v15  ;;  %7280 = vst [vmem:[#allocation24_spill] sm:$0xff] %v6659_v16  ;;  %v6662_v20 = vpop.f32.mrb[69].mxu0  ;;  %v6664_v3 = vpop.f32.mrb[53].mxu1 }
 0xbf1   :  { %7282 = vst [vmem:[#allocation16_spill] sm:$0xff] %v6662_v20  ;;  %7283 = vst [vmem:[#allocation25_spill] sm:$0xff] %v6664_v3  ;;  %v6669_v14 = vpop.f32.mrb[70].mxu0  ;;  %v6671_v58 = vpop.f32.mrb[54].mxu1 }
 0xbf2   :  { %7287 = vst [vmem:[#allocation17_spill] sm:$0xff] %v6669_v14  ;;  %7288 = vst [vmem:[#allocation15_spill] sm:$0xff] %v6671_v58  ;;  %v6675_v38 = vpop.f32.mrb[71].mxu0  ;;  %v6677_v43 = vpop.f32.mrb[55].mxu1 }
 0xbf3   :  { %7290 = vst [vmem:[#allocation26_spill] sm:$0xff] %v6675_v38  ;;  %7291 = vst [vmem:[#allocation27_spill] sm:$0xff] %v6677_v43 }
 0xbf7   :  { %v2534_v22 = vpop.f32.mrb[72].mxu0  ;;  %v2575_v58 = vpop.f32.mrb[56].mxu1 }
 0xbf8   :  { %v2535_v38 = vadd.f32 %v2534_v22, %v6683_v34  ;;  %v2536_v14 = vpop.f32.mrb[73].mxu0  ;;  %v4647_v16 = vpop.f32.mrb[57].mxu1  ;;  %v7292_v22 = vsub.s32 5, %v7285_v62 }
 0xbf9   :  { %v2537_v46 = vadd.f32 %v2536_v14, %v6689_v13  ;;  %v2538_v20 = vpop.f32.mrb[74].mxu0  ;;  %v2578_v24 = vpop.f32.mrb[58].mxu1  ;;  %v6705_v14 = vrot.slane %v2003_v7, %v7281_v17 }
 0xbfa   :  { %v2581_v15 = vadd.f32 %v2535_v38, %v2182_v35  ;;  %v2539_v43 = vpop.f32.mrb[75].mxu0  ;;  %v4648_v52 = vpop.f32.mrb[59].mxu1  ;;  %v2353_v16 = vrot.slane %v3935_v11, %v7292_v22 }
 0xbfb   :  { %v2588_v12 = vadd.f32 %v2537_v46, %v2184_v19 }
 0xbfc   :  { %v4016_v8 = vmul.f32 -1.442695, %v2581_v15  ;;  %v6702_v20 = vrot.slane %v2353_v16, %v7284_v27 }
 0xbfd   :  { %v4017_v3 = vmul.f32 -1.442695, %v2588_v12 }
 0xbfe   :  { %5124 = vpow2.f32 %v4016_v8  ;;  %v2576_v15 = vadd.f32 %v2575_v58, %v6702_v20  ;;  %v2186_v58 = vadd.f32 %v6588_v25, %v6680_v5 }
 0xbff   :  { %5126 = vpow2.f32 %v4017_v3 }
 0xc08   :  { %v5125_v36 = vpop.eup %5124 }
 0xc09   :  { %v2585_v33 = vadd.f32 1.0, %v5125_v36  ;;  %v5127_v8 = vpop.eup %5126  ;;  %v2255_v36 = vadd.f32 %v6586_v21, %v6705_v14 }
 0xc0a   :  { %v2592_v38 = vadd.f32 1.0, %v5127_v8 }
 0xc0b   :  { %5128 = vrcp.f32 %v2585_v33  ;;  %v2188_v33 = vadd.f32 %v6592_v29, %v6686_v10  ;;  %v2258_v29 = vadd.f32 %v6594_v39, %v6705_v14 }
 0xc15   :  { %v5129_v12 = vpop.eup %5128 }
 0xc16   :  { %v2595_v3 = vmul.f32 %v5129_v12, %v2576_v15 }
 0xc18   :  { %v2596_v43 = vadd.f32 %v2595_v3, %v2255_v36 }
 0xc1a   :  { %5130 = vtanh.f32 %v2596_v43 }
 0xc1b   :  { %5132 = vrcp.f32 %v2592_v38 }
 0xc24   :  { %v5131_v62 = vpop.eup %5130 }
 0xc25   :  { %v2598_v11 = vsub.f32 0.0, %v5131_v62  ;;  %v5133_v35 = vpop.eup %5132 }
 0xc27   :  { %v2599_v27 = vmul.f32 %v5133_v35, %v2598_v11 }
 0xc29   :  { %v6710_v19 = vadd.f32 %v5131_v62, %v2599_v27 }
 0xc2b   :  { %v2604_v7 = vpack.c.bf16 %v6710_v19, %v6710_v19 }
 0xc2d   :  { %2638 = vmatmul.mubr.bf16.vlgmr.msra.gmra.mrb[76].mxu0 %v2604_v7  ;;  %4666 = vmatmul.mubr.bf16.vlgmr.msra.gmra.mrb[60].mxu1 %v2604_v7 }
 0xc2e   :  { %2711 = vmatpush1.bf16.msra.mxu0 %v6429_v0  ;;  %4670 = vmatpush3.bf16.msra.mxu1 %v6507_v50 }
 0xc2f   :  { %2712 = vmatprep.subr.bf16.mxu0 %v6436_v45  ;;  %4671 = vmatprep.subr.bf16.mxu1 %v7269_v40 }
 0xc30   :  { %2742 = vmatprep.mubr.bf16.mxu0 %v7270_v51  ;;  %4685 = vmatprep.mubr.msk.bf16.mxu1 %vm5343_vm0, %v7269_v40 }
 0xc32   :  { %2713 = vmatpush1.bf16.msra.mxu0 %v6441_v44  ;;  %4672 = vmatpush3.bf16.msra.mxu1 %v6524_v37 }
 0xc33   :  { %2714 = vmatprep.subr.bf16.mxu0 %v6448_v55  ;;  %4673 = vmatprep.subr.bf16.mxu1 %v7269_v40 }
 0xc36   :  { %2715 = vmatpush1.bf16.msra.mxu0 %v6453_v57  ;;  %4674 = vmatpush3.bf16.msra.mxu1 %v6535_v1 }
 0xc37   :  { %2716 = vmatprep.subr.bf16.mxu0 %v6460_v2  ;;  %4675 = vmatprep.subr.bf16.mxu1 %v7269_v40 }
 0xc3a   :  { %2717 = vmatpush1.bf16.msra.mxu0 %v6465_v9  ;;  %4676 = vmatpush3.bf16.msra.mxu1 %v6541_v18 }
 0xc3b   :  { %2718 = vmatprep.subr.bf16.mxu0 %v6472_v28  ;;  %4677 = vmatprep.subr.bf16.mxu1 %v7269_v40 }
 0xc3e   :  { %2719 = vmatpush1.bf16.msra.mxu0 %v6477_v30  ;;  %4678 = vmatpush3.bf16.msra.mxu1 %v6548_v48 }
 0xc3f   :  { %2720 = vmatprep.subr.bf16.mxu0 %v6484_v31  ;;  %4679 = vmatprep.subr.bf16.mxu1 %v7269_v40 }
 0xc42   :  { %2721 = vmatpush1.bf16.msra.mxu0 %v6489_v47  ;;  %4680 = vmatpush3.bf16.msra.mxu1 %v6555_v63 }
 0xc43   :  { %2722 = vmatprep.subr.bf16.mxu0 %v6496_v32  ;;  %4681 = vmatprep.subr.bf16.mxu1 %v7269_v40 }
 0xc46   :  { %2723 = vmatpush1.bf16.msra.mxu0 %v6502_v42  ;;  %4682 = vmatpush3.bf16.msra.mxu1 %v6562_v4 }
 0xc47   :  { %2724 = vmatprep.subr.bf16.mxu0 %v6512_v59  ;;  %4683 = vmatprep.subr.bf16.mxu1 %v7269_v40 }
 0xc4a   :  { %2725 = vmatpush1.bf16.msra.mxu0 %v6519_v61  ;;  %4684 = vmatpush3.bf16.msra.mxu1 %v6569_v41 }
 0xc4b   :  { %2815 = vmatprep.subr.bf16.mxu0 %v6424_v49  ;;  %4689 = vmatprep.subr.bf16.mxu1 %v7269_v40 }
 0xd00   :  { %v2639_v21 = vpop.f32.mrb[76].mxu0  ;;  %v2680_v17 = vpop.f32.mrb[60].mxu1 }
 0xd01   :  { %v2640_v46 = vadd.f32 %v2639_v21, %v6683_v34  ;;  %v2641_v24 = vpop.f32.mrb[77].mxu0  ;;  %v4667_v52 = vpop.f32.mrb[61].mxu1  ;;  %v2681_v11 = vadd.f32 %v2680_v17, %v6702_v20  ;;  %v2192_v17 = vadd.f32 %v6596_v60, %v6680_v5 }
 0xd02   :  { %v2642_v22 = vadd.f32 %v2641_v24, %v6689_v13  ;;  %v2643_v16 = vpop.f32.mrb[78].mxu0  ;;  %v2683_v56 = vpop.f32.mrb[62].mxu1 }
 0xd03   :  { %v2686_v15 = vadd.f32 %v2640_v46, %v2186_v58  ;;  %v2644_v8 = vpop.f32.mrb[79].mxu0  ;;  %v4668_v12 = vpop.f32.mrb[63].mxu1 }
 0xd04   :  { %v2693_v36 = vadd.f32 %v2642_v22, %v2188_v33  ;;  %v2194_v8 = vadd.f32 %v6598_v23, %v6686_v10  ;;  %v2263_v23 = vadd.f32 %v6581_v54, %v6705_v14 }
 0xd05   :  { %v4018_v3 = vmul.f32 -1.442695, %v2686_v15 }
 0xd06   :  { %v4019_v38 = vmul.f32 -1.442695, %v2693_v36 }
 0xd07   :  { %5134 = vpow2.f32 %v4018_v3 }
 0xd08   :  { %5136 = vpow2.f32 %v4019_v38 }
 0xd11   :  { %v5135_v43 = vpop.eup %5134 }
 0xd12   :  { %v2690_v25 = vadd.f32 1.0, %v5135_v43  ;;  %v5137_v62 = vpop.eup %5136 }
 0xd13   :  { %v2697_v21 = vadd.f32 1.0, %v5137_v62 }
 0xd14   :  { %5138 = vrcp.f32 %v2690_v25 }
 0xd1e   :  { %v5139_v35 = vpop.eup %5138 }
 0xd1f   :  { %v2700_v27 = vmul.f32 %v5139_v35, %v2681_v11 }
 0xd21   :  { %v2701_v7 = vadd.f32 %v2700_v27, %v2258_v29 }
 0xd23   :  { %5140 = vtanh.f32 %v2701_v7 }
 0xd24   :  { %5142 = vrcp.f32 %v2697_v21 }
 0xd2d   :  { %v5141_v58 = vpop.eup %5140 }
 0xd2e   :  { %v2703_v46 = vsub.f32 %v6710_v19, %v5141_v58  ;;  %v5143_v24 = vpop.eup %5142 }
 0xd30   :  { %v2704_v52 = vmul.f32 %v5143_v24, %v2703_v46 }
 0xd32   :  { %v6759_v33 = vadd.f32 %v5141_v58, %v2704_v52 }
 0xd34   :  { %v2709_v22 = vpack.c.bf16 %v6759_v33, %v6759_v33 }
 0xd36   :  { %2743 = vmatmul.mubr.bf16.vlgmr.msra.gmra.mrb[80].mxu0 %v2709_v22  ;;  %4686 = vmatmul.mubr.bf16.vlgmr.msra.gmra.mrb[64].mxu1 %v2709_v22 }
 0xd37   :  { %2816 = vmatpush1.bf16.msra.mxu0 %v6429_v0  ;;  %4690 = vmatpush3.bf16.msra.mxu1 %v6507_v50 }
 0xd38   :  { %2817 = vmatprep.subr.bf16.mxu0 %v6436_v45  ;;  %4691 = vmatprep.subr.bf16.mxu1 %v7269_v40 }
 0xd39   :  { %2847 = vmatprep.mubr.bf16.mxu0 %v7270_v51  ;;  %4705 = vmatprep.mubr.msk.bf16.mxu1 %vm5343_vm0, %v7269_v40 }
 0xd3b   :  { %2818 = vmatpush1.bf16.msra.mxu0 %v6441_v44  ;;  %4692 = vmatpush3.bf16.msra.mxu1 %v6524_v37 }
 0xd3c   :  { %2819 = vmatprep.subr.bf16.mxu0 %v6448_v55  ;;  %4693 = vmatprep.subr.bf16.mxu1 %v7269_v40 }
 0xd3f   :  { %2820 = vmatpush1.bf16.msra.mxu0 %v6453_v57  ;;  %4694 = vmatpush3.bf16.msra.mxu1 %v6535_v1 }
 0xd40   :  { %2821 = vmatprep.subr.bf16.mxu0 %v6460_v2  ;;  %4695 = vmatprep.subr.bf16.mxu1 %v7269_v40 }
 0xd43   :  { %2822 = vmatpush1.bf16.msra.mxu0 %v6465_v9  ;;  %4696 = vmatpush3.bf16.msra.mxu1 %v6541_v18 }
 0xd44   :  { %2823 = vmatprep.subr.bf16.mxu0 %v6472_v28  ;;  %4697 = vmatprep.subr.bf16.mxu1 %v7269_v40 }
 0xd47   :  { %2824 = vmatpush1.bf16.msra.mxu0 %v6477_v30  ;;  %4698 = vmatpush3.bf16.msra.mxu1 %v6548_v48 }
 0xd48   :  { %2825 = vmatprep.subr.bf16.mxu0 %v6484_v31  ;;  %4699 = vmatprep.subr.bf16.mxu1 %v7269_v40 }
 0xd4b   :  { %2826 = vmatpush1.bf16.msra.mxu0 %v6489_v47  ;;  %4700 = vmatpush3.bf16.msra.mxu1 %v6555_v63 }
 0xd4c   :  { %2827 = vmatprep.subr.bf16.mxu0 %v6496_v32  ;;  %4701 = vmatprep.subr.bf16.mxu1 %v7269_v40 }
 0xd4f   :  { %2828 = vmatpush1.bf16.msra.mxu0 %v6502_v42  ;;  %4702 = vmatpush3.bf16.msra.mxu1 %v6562_v4 }
 0xd50   :  { %2829 = vmatprep.subr.bf16.mxu0 %v6512_v59  ;;  %4703 = vmatprep.subr.bf16.mxu1 %v7269_v40 }
 0xd53   :  { %2830 = vmatpush1.bf16.msra.mxu0 %v6519_v61  ;;  %4704 = vmatpush3.bf16.msra.mxu1 %v6569_v41 }
 0xd54   :  { %2920 = vmatprep.subr.bf16.mxu0 %v6424_v49  ;;  %4709 = vmatprep.subr.bf16.mxu1 %v7269_v40 }
 0xe09   :  { %v2744_v39 = vpop.f32.mrb[80].mxu0  ;;  %v2785_v19 = vpop.f32.mrb[64].mxu1 }
 0xe0a   :  { %v2745_v16 = vadd.f32 %v2744_v39, %v6683_v34  ;;  %v2746_v56 = vpop.f32.mrb[81].mxu0  ;;  %v4687_v15 = vpop.f32.mrb[65].mxu1  ;;  %v2786_v7 = vadd.f32 %v2785_v19, %v6702_v20  ;;  %v2196_v19 = vadd.f32 %v6600_v6, %v6680_v5 }
 0xe0b   :  { %v2747_v12 = vadd.f32 %v2746_v56, %v6689_v13  ;;  %v2748_v36 = vpop.f32.mrb[82].mxu0  ;;  %v2788_v3 = vpop.f32.mrb[66].mxu1 }
 0xe0c   :  { %v2791_v38 = vadd.f32 %v2745_v16, %v2192_v17  ;;  %v2749_v43 = vpop.f32.mrb[83].mxu0  ;;  %v4688_v25 = vpop.f32.mrb[67].mxu1  ;;  %v2198_v36 = vadd.f32 %v6602_v53, %v6686_v10  ;;  %v2266_v53 = vadd.f32 %v6590_v26, %v6705_v14 }
 0xe0d   :  { %v2798_v62 = vadd.f32 %v2747_v12, %v2194_v8 }
 0xe0e   :  { %v4020_v11 = vmul.f32 -1.442695, %v2791_v38 }
 0xe0f   :  { %v4021_v35 = vmul.f32 -1.442695, %v2798_v62 }
 0xe10   :  { %5144 = vpow2.f32 %v4020_v11 }
 0xe11   :  { %5146 = vpow2.f32 %v4021_v35 }
 0xe1a   :  { %v5145_v29 = vpop.eup %5144 }
 0xe1b   :  { %v2795_v60 = vadd.f32 1.0, %v5145_v29  ;;  %v5147_v27 = vpop.eup %5146 }
 0xe1c   :  { %v2802_v24 = vadd.f32 1.0, %v5147_v27 }
 0xe1d   :  { %5148 = vrcp.f32 %v2795_v60 }
 0xe27   :  { %v5149_v21 = vpop.eup %5148 }
 0xe28   :  { %v2805_v58 = vmul.f32 %v5149_v21, %v2786_v7 }
 0xe2a   :  { %v2806_v46 = vadd.f32 %v2805_v58, %v2263_v23 }
 0xe2c   :  { %5150 = vtanh.f32 %v2806_v46 }
 0xe2d   :  { %5152 = vrcp.f32 %v2802_v24 }
 0xe36   :  { %v5151_v52 = vpop.eup %5150 }
 0xe37   :  { %v2808_v22 = vsub.f32 %v6759_v33, %v5151_v52  ;;  %v5153_v39 = vpop.eup %5152 }
 0xe39   :  { %v2809_v17 = vmul.f32 %v5153_v39, %v2808_v22 }
 0xe3b   :  { %v6808_v16 = vadd.f32 %v5151_v52, %v2809_v17 }
 0xe3d   :  { %v2814_v56 = vpack.c.bf16 %v6808_v16, %v6808_v16 }
 0xe3f   :  { %2848 = vmatmul.mubr.bf16.vlgmr.msra.gmra.mrb[84].mxu0 %v2814_v56  ;;  %4706 = vmatmul.mubr.bf16.vlgmr.msra.gmra.mrb[68].mxu1 %v2814_v56 }
 0xe40   :  { %2921 = vmatpush1.bf16.msra.mxu0 %v6429_v0  ;;  %4710 = vmatpush3.bf16.msra.mxu1 %v6507_v50 }
 0xe41   :  { %2922 = vmatprep.subr.bf16.mxu0 %v6436_v45  ;;  %4711 = vmatprep.subr.bf16.mxu1 %v7269_v40 }
 0xe42   :  { %2952 = vmatprep.mubr.bf16.mxu0 %v7270_v51  ;;  %4725 = vmatprep.mubr.msk.bf16.mxu1 %vm5343_vm0, %v7269_v40 }
 0xe44   :  { %2923 = vmatpush1.bf16.msra.mxu0 %v6441_v44  ;;  %4712 = vmatpush3.bf16.msra.mxu1 %v6524_v37 }
 0xe45   :  { %2924 = vmatprep.subr.bf16.mxu0 %v6448_v55  ;;  %4713 = vmatprep.subr.bf16.mxu1 %v7269_v40 }
 0xe48   :  { %2925 = vmatpush1.bf16.msra.mxu0 %v6453_v57  ;;  %4714 = vmatpush3.bf16.msra.mxu1 %v6535_v1 }
 0xe49   :  { %2926 = vmatprep.subr.bf16.mxu0 %v6460_v2  ;;  %4715 = vmatprep.subr.bf16.mxu1 %v7269_v40 }
 0xe4c   :  { %2927 = vmatpush1.bf16.msra.mxu0 %v6465_v9  ;;  %4716 = vmatpush3.bf16.msra.mxu1 %v6541_v18 }
 0xe4d   :  { %2928 = vmatprep.subr.bf16.mxu0 %v6472_v28  ;;  %4717 = vmatprep.subr.bf16.mxu1 %v7269_v40 }
 0xe50   :  { %2929 = vmatpush1.bf16.msra.mxu0 %v6477_v30  ;;  %4718 = vmatpush3.bf16.msra.mxu1 %v6548_v48 }
 0xe51   :  { %2930 = vmatprep.subr.bf16.mxu0 %v6484_v31  ;;  %4719 = vmatprep.subr.bf16.mxu1 %v7269_v40 }
 0xe54   :  { %2931 = vmatpush1.bf16.msra.mxu0 %v6489_v47  ;;  %4720 = vmatpush3.bf16.msra.mxu1 %v6555_v63 }
 0xe55   :  { %2932 = vmatprep.subr.bf16.mxu0 %v6496_v32  ;;  %4721 = vmatprep.subr.bf16.mxu1 %v7269_v40 }
 0xe58   :  { %2933 = vmatpush1.bf16.msra.mxu0 %v6502_v42  ;;  %4722 = vmatpush3.bf16.msra.mxu1 %v6562_v4 }
 0xe59   :  { %2934 = vmatprep.subr.bf16.mxu0 %v6512_v59  ;;  %4723 = vmatprep.subr.bf16.mxu1 %v7269_v40 }
 0xe5c   :  { %2935 = vmatpush1.bf16.msra.mxu0 %v6519_v61  ;;  %4724 = vmatpush3.bf16.msra.mxu1 %v6569_v41 }
 0xe5d   :  { %3025 = vmatprep.subr.bf16.mxu0 %v6424_v49  ;;  %4729 = vmatprep.subr.bf16.mxu1 %v7269_v40 }
 0xf12   :  { %v2849_v54 = vpop.f32.mrb[84].mxu0  ;;  %v2890_v33 = vpop.f32.mrb[68].mxu1 }
 0xf13   :  { %v2850_v15 = vadd.f32 %v2849_v54, %v6683_v34  ;;  %v2851_v8 = vpop.f32.mrb[85].mxu0  ;;  %v4707_v12 = vpop.f32.mrb[69].mxu1  ;;  %v2891_v21 = vadd.f32 %v2890_v33, %v6702_v20  ;;  %v7294_v33 = vld [vmem:[#allocation21_spill] sm:$0xff] }
 0xf14   :  { %v2852_v3 = vadd.f32 %v2851_v8, %v6689_v13  ;;  %v2853_v38 = vpop.f32.mrb[86].mxu0  ;;  %v2893_v43 = vpop.f32.mrb[70].mxu1 }
 0xf15   :  { %v2896_v25 = vadd.f32 %v2850_v15, %v2196_v19  ;;  %v2854_v62 = vpop.f32.mrb[87].mxu0  ;;  %v4708_v11 = vpop.f32.mrb[71].mxu1  ;;  %v2202_v19 = vadd.f32 %v7294_v33, %v6680_v5 }
 0xf16   :  { %v2903_v35 = vadd.f32 %v2852_v3, %v2198_v36  ;;  %v7295_v36 = vld [vmem:[#allocation18_spill] sm:$0xff] }
 0xf17   :  { %v4022_v29 = vmul.f32 -1.442695, %v2896_v25  ;;  %v2204_v3 = vadd.f32 %v7295_v36, %v6686_v10 }
 0xf18   :  { %v4023_v60 = vmul.f32 -1.442695, %v2903_v35 }
 0xf19   :  { %5154 = vpow2.f32 %v4022_v29 }
 0xf1a   :  { %5156 = vpow2.f32 %v4023_v60 }
 0xf23   :  { %v5155_v27 = vpop.eup %5154 }
 0xf24   :  { %v2900_v6 = vadd.f32 1.0, %v5155_v27  ;;  %v5157_v7 = vpop.eup %5156 }
 0xf25   :  { %v2907_v24 = vadd.f32 1.0, %v5157_v7 }
 0xf26   :  { %5158 = vrcp.f32 %v2900_v6 }
 0xf30   :  { %v5159_v23 = vpop.eup %5158 }
 0xf31   :  { %v2910_v58 = vmul.f32 %v5159_v23, %v2891_v21 }
 0xf33   :  { %v2911_v46 = vadd.f32 %v2910_v58, %v2266_v53  ;;  %v7296_v53 = vld [vmem:[#allocation25_spill] sm:$0xff] }
 0xf34   :  { %v2271_v58 = vadd.f32 %v7296_v53, %v6705_v14  ;;  %v5236_v53 = vld [vmem:[%s7240_s7 + $0x124] ss:$12 sps:$4 sm:$0xff]  }
 0xf35   :  { %5160 = vtanh.f32 %v2911_v46 }
 0xf36   :  { %5162 = vrcp.f32 %v2907_v24 }
 0xf3f   :  { %v5161_v52 = vpop.eup %5160 }
 0xf40   :  { %v2913_v22 = vsub.f32 %v6808_v16, %v5161_v52  ;;  %v5163_v39 = vpop.eup %5162 }
 0xf42   :  { %v2914_v17 = vmul.f32 %v5163_v39, %v2913_v22 }
 0xf44   :  { %v6857_v56 = vadd.f32 %v5161_v52, %v2914_v17 }
 0xf46   :  { %v2919_v54 = vpack.c.bf16 %v6857_v56, %v6857_v56 }
 0xf48   :  { %2953 = vmatmul.mubr.bf16.vlgmr.msra.gmra.mrb[88].mxu0 %v2919_v54  ;;  %4726 = vmatmul.mubr.bf16.vlgmr.msra.gmra.mrb[72].mxu1 %v2919_v54 }
 0xf49   :  { %3026 = vmatpush1.bf16.msra.mxu0 %v6429_v0  ;;  %4730 = vmatpush3.bf16.msra.mxu1 %v6507_v50 }
 0xf4a   :  { %3027 = vmatprep.subr.bf16.mxu0 %v6436_v45  ;;  %4731 = vmatprep.subr.bf16.mxu1 %v7269_v40 }
 0xf4b   :  { %3057 = vmatprep.mubr.bf16.mxu0 %v7270_v51  ;;  %4745 = vmatprep.mubr.msk.bf16.mxu1 %vm5343_vm0, %v7269_v40 }
 0xf4d   :  { %3028 = vmatpush1.bf16.msra.mxu0 %v6441_v44  ;;  %4732 = vmatpush3.bf16.msra.mxu1 %v6524_v37 }
 0xf4e   :  { %3029 = vmatprep.subr.bf16.mxu0 %v6448_v55  ;;  %4733 = vmatprep.subr.bf16.mxu1 %v7269_v40 }
 0xf51   :  { %3030 = vmatpush1.bf16.msra.mxu0 %v6453_v57  ;;  %4734 = vmatpush3.bf16.msra.mxu1 %v6535_v1 }
 0xf52   :  { %3031 = vmatprep.subr.bf16.mxu0 %v6460_v2  ;;  %4735 = vmatprep.subr.bf16.mxu1 %v7269_v40 }
 0xf55   :  { %3032 = vmatpush1.bf16.msra.mxu0 %v6465_v9  ;;  %4736 = vmatpush3.bf16.msra.mxu1 %v6541_v18 }
 0xf56   :  { %3033 = vmatprep.subr.bf16.mxu0 %v6472_v28  ;;  %4737 = vmatprep.subr.bf16.mxu1 %v7269_v40 }
 0xf59   :  { %3034 = vmatpush1.bf16.msra.mxu0 %v6477_v30  ;;  %4738 = vmatpush3.bf16.msra.mxu1 %v6548_v48 }
 0xf5a   :  { %3035 = vmatprep.subr.bf16.mxu0 %v6484_v31  ;;  %4739 = vmatprep.subr.bf16.mxu1 %v7269_v40 }
 0xf5d   :  { %3036 = vmatpush1.bf16.msra.mxu0 %v6489_v47  ;;  %4740 = vmatpush3.bf16.msra.mxu1 %v6555_v63 }
 0xf5e   :  { %3037 = vmatprep.subr.bf16.mxu0 %v6496_v32  ;;  %4741 = vmatprep.subr.bf16.mxu1 %v7269_v40 }
 0xf61   :  { %3038 = vmatpush1.bf16.msra.mxu0 %v6502_v42  ;;  %4742 = vmatpush3.bf16.msra.mxu1 %v6562_v4 }
 0xf62   :  { %3039 = vmatprep.subr.bf16.mxu0 %v6512_v59  ;;  %4743 = vmatprep.subr.bf16.mxu1 %v7269_v40 }
 0xf65   :  { %3040 = vmatpush1.bf16.msra.mxu0 %v6519_v61  ;;  %4744 = vmatpush3.bf16.msra.mxu1 %v6569_v41 }
 0xf66   :  { %3130 = vmatprep.subr.bf16.mxu0 %v6424_v49  ;;  %4749 = vmatprep.subr.bf16.mxu1 %v7269_v40 }
0x101b   :  { %v2954_v26 = vpop.f32.mrb[88].mxu0  ;;  %v2995_v16 = vpop.f32.mrb[72].mxu1 }
0x101c   :  { %v2955_v15 = vadd.f32 %v2954_v26, %v6683_v34  ;;  %v2956_v8 = vpop.f32.mrb[89].mxu0  ;;  %v4727_v12 = vpop.f32.mrb[73].mxu1  ;;  %v2996_v21 = vadd.f32 %v2995_v16, %v6702_v20  ;;  %v7299_v16 = vld [vmem:[#allocation27_spill] sm:$0xff] }
0x101d   :  { %v2957_v38 = vadd.f32 %v2956_v8, %v6689_v13  ;;  %v2958_v43 = vpop.f32.mrb[90].mxu0  ;;  %v2998_v25 = vpop.f32.mrb[74].mxu1 }
0x101e   :  { %v3001_v62 = vadd.f32 %v2955_v15, %v2202_v19  ;;  %v2959_v49 = vpop.f32.mrb[91].mxu0  ;;  %v4728_v11 = vpop.f32.mrb[75].mxu1  ;;  %v2274_v19 = vadd.f32 %v7299_v16, %v6705_v14  ;;  %v7302_v16 = vld [vmem:[#allocation24_spill] sm:$0xff] }
0x101f   :  { %v3008_v35 = vadd.f32 %v2957_v38, %v2204_v3  ;;  %v5225_v49 = vld [vmem:[%s7240_s7 + $0xc0] ss:$12 sps:$4 sm:$0xff]   ;;  %v5226_v11 = vld [vmem:[%s7240_s7 + $0xc8] ss:$12 sps:$4 sm:$0xff]  }
0x1020   :  { %v4024_v29 = vmul.f32 -1.442695, %v3001_v62 }
0x1021   :  { %v4025_v60 = vmul.f32 -1.442695, %v3008_v35  ;;  %v5227_v35 = vld [vmem:[%s7240_s7 + $0xdc] ss:$12 sps:$4 sm:$0xff]  }
0x1022   :  { %5164 = vpow2.f32 %v4024_v29  ;;  %v5228_v29 = vld [vmem:[%s7240_s7 + $0xd8] ss:$12 sps:$4 sm:$0xff]  }
0x1023   :  { %5166 = vpow2.f32 %v4025_v60  ;;  %v5229_v60 = vld [vmem:[%s7240_s7 + $0xe0] ss:$12 sps:$4 sm:$0xff]  }
0x102c   :  { %v5165_v27 = vpop.eup %5164 }
0x102d   :  { %v3005_v6 = vadd.f32 1.0, %v5165_v27  ;;  %v5167_v7 = vpop.eup %5166  ;;  %v5230_v27 = vld [vmem:[%s7240_s7 + $0xf4] ss:$12 sps:$4 sm:$0xff]  }
0x102e   :  { %v3012_v52 = vadd.f32 1.0, %v5167_v7  ;;  %v5233_v7 = vld [vmem:[%s7240_s7 + $0x10c] ss:$12 sps:$4 sm:$0xff]  }
0x102f   :  { %5168 = vrcp.f32 %v3005_v6  ;;  %v5232_v6 = vld [vmem:[%s7240_s7 + $0xf8] ss:$12 sps:$4 sm:$0xff]  }
0x1039   :  { %v5169_v23 = vpop.eup %5168 }
0x103a   :  { %v3015_v46 = vmul.f32 %v5169_v23, %v2996_v21  ;;  %v5234_v21 = vld [vmem:[%s7240_s7 + $0x108] ss:$12 sps:$4 sm:$0xff]   ;;  %v5235_v23 = vld [vmem:[%s7240_s7 + $0x110] ss:$12 sps:$4 sm:$0xff]  }
0x103c   :  { %v3016_v24 = vadd.f32 %v3015_v46, %v2271_v58  ;;  %v5237_v58 = vld [vmem:[%s7240_s7 + $0x120] ss:$12 sps:$4 sm:$0xff]   ;;  %v5238_v46 = vld [vmem:[%s7240_s7 + $0x128] ss:$12 sps:$4 sm:$0xff]  }
0x103e   :  { %5170 = vtanh.f32 %v3016_v24  ;;  %v5239_v24 = vld [vmem:[%s7240_s7 + $0x13c] ss:$12 sps:$4 sm:$0xff]  }
0x103f   :  { %5172 = vrcp.f32 %v3012_v52  ;;  %v5240_v52 = vld [vmem:[%s7240_s7 + $0x138] ss:$12 sps:$4 sm:$0xff]  }
0x1048   :  { %v5171_v22 = vpop.eup %5170 }
0x1049   :  { %v3018_v39 = vsub.f32 %v6857_v56, %v5171_v22  ;;  %v5173_v17 = vpop.eup %5172 }
0x104b   :  { %v3019_v54 = vmul.f32 %v5173_v17, %v3018_v39  ;;  %v5242_v39 = vld [vmem:[%s7240_s7 + $0x154] ss:$12 sps:$4 sm:$0xff]   ;;  %v5243_v17 = vld [vmem:[%s7240_s7 + $0x150] ss:$12 sps:$4 sm:$0xff]  }
0x104d   :  { %v6906_v26 = vadd.f32 %v5171_v22, %v3019_v54  ;;  %v5241_v22 = vld [vmem:[%s7240_s7 + $0x140] ss:$12 sps:$4 sm:$0xff]   ;;  %v5244_v54 = vld [vmem:[%s7240_s7 + $0x158] ss:$12 sps:$4 sm:$0xff]  }
0x104f   :  { %v3024_v33 = vpack.c.bf16 %v6906_v26, %v6906_v26 }
0x1051   :  { %3058 = vmatmul.mubr.bf16.vlgmr.msra.gmra.mrb[92].mxu0 %v3024_v33  ;;  %4746 = vmatmul.mubr.bf16.vlgmr.msra.gmra.mrb[76].mxu1 %v3024_v33  ;;  %v5246_v33 = vld [vmem:[%s7240_s7 + $0x168] ss:$12 sps:$4 sm:$0xff]  }
0x1052   :  { %3131 = vmatpush1.bf16.msra.mxu0 %v6429_v0  ;;  %4750 = vmatpush3.bf16.msra.mxu1 %v6507_v50  ;;  %v5224_v0 = vld [vmem:[%s7240_s7 + $0xc4] ss:$12 sps:$4 sm:$0xff]  }
0x1053   :  { %3132 = vmatprep.subr.bf16.mxu0 %v6436_v45  ;;  %4751 = vmatprep.subr.bf16.mxu1 %v7269_v40 }
0x1054   :  { %3162 = vmatprep.mubr.bf16.mxu0 %v7270_v51  ;;  %4765 = vmatprep.mubr.msk.bf16.mxu1 %vm5343_vm0, %v7269_v40 }
0x1056   :  { %3133 = vmatpush1.bf16.msra.mxu0 %v6441_v44  ;;  %4752 = vmatpush3.bf16.msra.mxu1 %v6524_v37 }
0x1057   :  { %3134 = vmatprep.subr.bf16.mxu0 %v6448_v55  ;;  %4753 = vmatprep.subr.bf16.mxu1 %v7269_v40  ;;  %v7297_v55 = vld [vmem:[#allocation19_spill] sm:$0xff] }
0x105a   :  { %3135 = vmatpush1.bf16.msra.mxu0 %v6453_v57  ;;  %4754 = vmatpush3.bf16.msra.mxu1 %v6535_v1  ;;  %v2206_v57 = vadd.f32 %v7297_v55, %v6680_v5  ;;  %v7300_v55 = vld [vmem:[#allocation23_spill] sm:$0xff] }
0x105b   :  { %3136 = vmatprep.subr.bf16.mxu0 %v6460_v2  ;;  %4755 = vmatprep.subr.bf16.mxu1 %v7269_v40 }
0x105e   :  { %3137 = vmatpush1.bf16.msra.mxu0 %v6465_v9  ;;  %4756 = vmatpush3.bf16.msra.mxu1 %v6541_v18 }
0x105f   :  { %3138 = vmatprep.subr.bf16.mxu0 %v6472_v28  ;;  %4757 = vmatprep.subr.bf16.mxu1 %v7269_v40 }
0x1062   :  { %3139 = vmatpush1.bf16.msra.mxu0 %v6477_v30  ;;  %4758 = vmatpush3.bf16.msra.mxu1 %v6548_v48  ;;  %v7298_v30 = vld [vmem:[#allocation22_spill] sm:$0xff] }
0x1063   :  { %3140 = vmatprep.subr.bf16.mxu0 %v6484_v31  ;;  %4759 = vmatprep.subr.bf16.mxu1 %v7269_v40  ;;  %v2208_v31 = vadd.f32 %v7298_v30, %v6686_v10  ;;  %v7301_v30 = vld [vmem:[#allocation16_spill] sm:$0xff] }
0x1066   :  { %3141 = vmatpush1.bf16.msra.mxu0 %v6489_v47  ;;  %4760 = vmatpush3.bf16.msra.mxu1 %v6555_v63 }
0x1067   :  { %3142 = vmatprep.subr.bf16.mxu0 %v6496_v32  ;;  %4761 = vmatprep.subr.bf16.mxu1 %v7269_v40 }
0x106a   :  { %3143 = vmatpush1.bf16.msra.mxu0 %v6502_v42  ;;  %4762 = vmatpush3.bf16.msra.mxu1 %v6562_v4 }
0x106b   :  { %3144 = vmatprep.subr.bf16.mxu0 %v6512_v59  ;;  %4763 = vmatprep.subr.bf16.mxu1 %v7269_v40 }
0x106e   :  { %3145 = vmatpush1.bf16.msra.mxu0 %v6519_v61  ;;  %4764 = vmatpush3.bf16.msra.mxu1 %v6569_v41 }
0x106f   :  { %3235 = vmatprep.subr.bf16.mxu0 %v5224_v0  ;;  %4769 = vmatprep.subr.bf16.mxu1 %v7269_v40  ;;  %v5247_v0 = vld [vmem:[%s7240_s7 + $0x170] ss:$12 sps:$4 sm:$0xff]  }
0x1124   :  { %v3059_v45 = vpop.f32.mrb[92].mxu0  ;;  %v3100_v44 = vpop.f32.mrb[76].mxu1 }
0x1125   :  { %v3060_v2 = vadd.f32 %v3059_v45, %v6683_v34  ;;  %v3061_v9 = vpop.f32.mrb[93].mxu0  ;;  %v4747_v28 = vpop.f32.mrb[77].mxu1  ;;  %v3101_v41 = vadd.f32 %v3100_v44, %v6702_v20 }
0x1126   :  { %v3062_v47 = vadd.f32 %v3061_v9, %v6689_v13  ;;  %v3063_v32 = vpop.f32.mrb[94].mxu0  ;;  %v3103_v42 = vpop.f32.mrb[78].mxu1 }
0x1127   :  { %v3106_v50 = vadd.f32 %v3060_v2, %v2206_v57  ;;  %v3064_v59 = vpop.f32.mrb[95].mxu0  ;;  %v4748_v61 = vpop.f32.mrb[79].mxu1  ;;  %v2212_v57 = vadd.f32 %v7300_v55, %v6680_v5 }
0x1128   :  { %v3113_v37 = vadd.f32 %v3062_v47, %v2208_v31  ;;  %v2214_v31 = vadd.f32 %v7301_v30, %v6686_v10 }
0x1129   :  { %v4026_v1 = vmul.f32 -1.442695, %v3106_v50 }
0x112a   :  { %v4027_v18 = vmul.f32 -1.442695, %v3113_v37 }
0x112b   :  { %5174 = vpow2.f32 %v4026_v1 }
0x112c   :  { %5176 = vpow2.f32 %v4027_v18 }
0x1135   :  { %v5175_v48 = vpop.eup %5174 }
0x1136   :  { %v3110_v63 = vadd.f32 1.0, %v5175_v48  ;;  %v5177_v4 = vpop.eup %5176 }
0x1137   :  { %v3117_v12 = vadd.f32 1.0, %v5177_v4 }
0x1138   :  { %5178 = vrcp.f32 %v3110_v63 }
0x1142   :  { %v5179_v56 = vpop.eup %5178 }
0x1143   :  { %v3120_v15 = vmul.f32 %v5179_v56, %v3101_v41 }
0x1145   :  { %v3121_v8 = vadd.f32 %v3120_v15, %v2274_v19  ;;  %v2279_v19 = vadd.f32 %v7302_v16, %v6705_v14  ;;  %v5038_v16 = vld [vmem:[%s7236_s3 + $0x190] sm:$0xff]  }
0x1147   :  { %5180 = vtanh.f32 %v3121_v8 }
0x1148   :  { %5182 = vrcp.f32 %v3117_v12 }
0x1151   :  { %v5181_v36 = vpop.eup %5180 }
0x1152   :  { %v3123_v3 = vsub.f32 %v6906_v26, %v5181_v36  ;;  %v5183_v38 = vpop.eup %5182  ;;  %v5245_v26 = vld [vmem:[%s7240_s7 + $0x16c] ss:$12 sps:$4 sm:$0xff]  }
0x1154   :  { %v3124_v43 = vmul.f32 %v5183_v38, %v3123_v3 }
0x1156   :  { %v6957_v25 = vadd.f32 %v5181_v36, %v3124_v43 }
0x1158   :  { %v3129_v62 = vpack.c.bf16 %v6957_v25, %v6957_v25 }
0x115a   :  { %3163 = vmatmul.mubr.bf16.vlgmr.msra.gmra.mrb[96].mxu0 %v3129_v62  ;;  %4766 = vmatmul.mubr.bf16.vlgmr.msra.gmra.mrb[80].mxu1 %v3129_v62 }
0x115b   :  { %3236 = vmatpush1.bf16.msra.mxu0 %v5225_v49  ;;  %4770 = vmatpush3.bf16.msra.mxu1 %v5226_v11  ;;  %v5020_v11 = vld [vmem:[%s7236_s3 + $0x100] sm:$0xff]  }
0x115c   :  { %3237 = vmatprep.subr.bf16.mxu0 %v5227_v35  ;;  %4771 = vmatprep.subr.bf16.mxu1 %v7269_v40  ;;  %v5022_v35 = vld [vmem:[%s7236_s3 + $0x110] sm:$0xff]  }
0x115d   :  { %3267 = vmatprep.mubr.bf16.mxu0 %v7270_v51  ;;  %4785 = vmatprep.mubr.msk.bf16.mxu1 %vm5343_vm0, %v7269_v40  ;;  %v5231_v51 = vld [vmem:[%s7240_s7 + $0xf0] ss:$12 sps:$4 sm:$0xff]  }
0x115f   :  { %3238 = vmatpush1.bf16.msra.mxu0 %v5228_v29  ;;  %4772 = vmatpush3.bf16.msra.mxu1 %v5229_v60  ;;  %v5023_v29 = vld [vmem:[%s7236_s3 + $0x118] sm:$0xff]   ;;  %v5024_v60 = vld [vmem:[%s7236_s3 + $0x120] sm:$0xff]  }
0x1160   :  { %3239 = vmatprep.subr.bf16.mxu0 %v5230_v27  ;;  %4773 = vmatprep.subr.bf16.mxu1 %v7269_v40  ;;  %v5025_v27 = vld [vmem:[%s7236_s3 + $0x128] sm:$0xff]  }
0x1163   :  { %3240 = vmatpush1.bf16.msra.mxu0 %v5231_v51  ;;  %4774 = vmatpush3.bf16.msra.mxu1 %v5232_v6  ;;  %v5026_v51 = vld [vmem:[%s7236_s3 + $0x130] sm:$0xff]   ;;  %v5027_v6 = vld [vmem:[%s7236_s3 + $0x138] sm:$0xff]  }
0x1164   :  { %3241 = vmatprep.subr.bf16.mxu0 %v5233_v7  ;;  %4775 = vmatprep.subr.bf16.mxu1 %v7269_v40  ;;  %v5028_v7 = vld [vmem:[%s7236_s3 + $0x140] sm:$0xff]  }
0x1167   :  { %3242 = vmatpush1.bf16.msra.mxu0 %v5234_v21  ;;  %4776 = vmatpush3.bf16.msra.mxu1 %v5235_v23  ;;  %v5029_v21 = vld [vmem:[%s7236_s3 + $0x148] sm:$0xff]   ;;  %v5030_v23 = vld [vmem:[%s7236_s3 + $0x150] sm:$0xff]  }
0x1168   :  { %3243 = vmatprep.subr.bf16.mxu0 %v5236_v53  ;;  %4777 = vmatprep.subr.bf16.mxu1 %v7269_v40  ;;  %v5031_v53 = vld [vmem:[%s7236_s3 + $0x158] sm:$0xff]  }
0x116b   :  { %3244 = vmatpush1.bf16.msra.mxu0 %v5237_v58  ;;  %4778 = vmatpush3.bf16.msra.mxu1 %v5238_v46  ;;  %v5032_v58 = vld [vmem:[%s7236_s3 + $0x160] sm:$0xff]   ;;  %v5033_v46 = vld [vmem:[%s7236_s3 + $0x168] sm:$0xff]  }
0x116c   :  { %3245 = vmatprep.subr.bf16.mxu0 %v5239_v24  ;;  %4779 = vmatprep.subr.bf16.mxu1 %v7269_v40 }
0x116f   :  { %3246 = vmatpush1.bf16.msra.mxu0 %v5240_v52  ;;  %4780 = vmatpush3.bf16.msra.mxu1 %v5241_v22  ;;  %v7303_v22 = vld [vmem:[#allocation17_spill] sm:$0xff] }
0x1170   :  { %3247 = vmatprep.subr.bf16.mxu0 %v5242_v39  ;;  %4781 = vmatprep.subr.bf16.mxu1 %v7269_v40  ;;  %v2216_v39 = vadd.f32 %v7303_v22, %v6680_v5 }
0x1173   :  { %3248 = vmatpush1.bf16.msra.mxu0 %v5243_v17  ;;  %4782 = vmatpush3.bf16.msra.mxu1 %v5244_v54 }
0x1174   :  { %3249 = vmatprep.subr.bf16.mxu0 %v5245_v26  ;;  %4783 = vmatprep.subr.bf16.mxu1 %v7269_v40 }
0x1177   :  { %3250 = vmatpush1.bf16.msra.mxu0 %v5246_v33  ;;  %4784 = vmatpush3.bf16.msra.mxu1 %v5247_v0  ;;  %v7304_v33 = vld [vmem:[#allocation26_spill] sm:$0xff] }
0x1178   :  { %4789 = vmatprep.subr.bf16.mxu0 %v7269_v40  ;;  %4809 = vmatprep.subr.bf16.mxu1 %v7269_v40  ;;  %v2218_v0 = vadd.f32 %v7304_v33, %v6686_v10  ;;  %v7305_v10 = vld [vmem:[#allocation15_spill] sm:$0xff] }
0x122d   :  { %v3164_v45 = vpop.f32.mrb[96].mxu0  ;;  %v3205_v44 = vpop.f32.mrb[80].mxu1 }
0x122e   :  { %v3165_v2 = vadd.f32 %v3164_v45, %v6683_v34  ;;  %v3166_v9 = vpop.f32.mrb[97].mxu0  ;;  %v4767_v28 = vpop.f32.mrb[81].mxu1  ;;  %v3206_v41 = vadd.f32 %v3205_v44, %v6702_v20 }
0x122f   :  { %v3167_v47 = vadd.f32 %v3166_v9, %v6689_v13  ;;  %v3168_v32 = vpop.f32.mrb[98].mxu0  ;;  %v3208_v42 = vpop.f32.mrb[82].mxu1 }
0x1230   :  { %v3211_v50 = vadd.f32 %v3165_v2, %v2212_v57  ;;  %v3169_v59 = vpop.f32.mrb[99].mxu0  ;;  %v4768_v61 = vpop.f32.mrb[83].mxu1 }
0x1231   :  { %v3218_v37 = vadd.f32 %v3167_v47, %v2214_v31 }
0x1232   :  { %v4028_v1 = vmul.f32 -1.442695, %v3211_v50 }
0x1233   :  { %v4029_v18 = vmul.f32 -1.442695, %v3218_v37 }
0x1234   :  { %5184 = vpow2.f32 %v4028_v1 }
0x1235   :  { %5186 = vpow2.f32 %v4029_v18 }
0x123e   :  { %v5185_v48 = vpop.eup %5184 }
0x123f   :  { %v3215_v63 = vadd.f32 1.0, %v5185_v48  ;;  %v5187_v4 = vpop.eup %5186 }
0x1240   :  { %v3222_v12 = vadd.f32 1.0, %v5187_v4 }
0x1241   :  { %5188 = vrcp.f32 %v3215_v63 }
0x124b   :  { %v5189_v56 = vpop.eup %5188 }
0x124c   :  { %v3225_v15 = vmul.f32 %v5189_v56, %v3206_v41  ;;  %v5036_v41 = vld [vmem:[%s7236_s3 + $0x180] sm:$0xff]   ;;  %v5037_v56 = vld [vmem:[%s7236_s3 + $0x188] sm:$0xff]  }
0x124e   :  { %v3226_v8 = vadd.f32 %v3225_v15, %v2279_v19  ;;  %v5039_v19 = vld [vmem:[%s7236_s3 + $0x198] sm:$0xff]   ;;  %v5040_v15 = vld [vmem:[%s7236_s3 + $0x1a0] sm:$0xff]  }
0x1250   :  { %5190 = vtanh.f32 %v3226_v8  ;;  %v5041_v8 = vld [vmem:[%s7236_s3 + $0x1a8] sm:$0xff]  }
0x1251   :  { %5192 = vrcp.f32 %v3222_v12  ;;  %v4049_v12 = vld [vmem:[%s7237_s4 + $0x4] ss:$0 sm:$0xff] }
0x125a   :  { %v5191_v36 = vpop.eup %5190 }
0x125b   :  { %v3228_v3 = vsub.f32 %v6957_v25, %v5191_v36  ;;  %v5193_v38 = vpop.eup %5192  ;;  %v5021_v25 = vld [vmem:[%s7236_s3 + $0x108] sm:$0xff]  }
0x125d   :  { %v3229_v43 = vmul.f32 %v5193_v38, %v3228_v3 }
0x125f   :  { %v7052_v62 = vadd.f32 %v5191_v36, %v3229_v43 }
0x1261   :  { %v3234_v49 = vpack.c.bf16 %v7052_v62, %v7052_v62 }
0x1263   :  { %3268 = vmatmul.mubr.bf16.vlgmr.msra.gmra.mrb[100].mxu0 %v3234_v49  ;;  %4786 = vmatmul.mubr.bf16.vlgmr.msra.gmra.mrb[84].mxu1 %v3234_v49 }
0x1264   :  { %4805 = vmatprep.mubr.msk.bf16.mxu0 %vm5343_vm0, %v7269_v40  ;;  %4825 = vmatprep.mubr.msk.bf16.mxu1 %vm5343_vm0, %v7269_v40 }
0x1265   :  { %4790 = vmatpush3.bf16.msra.mxu0 %v5020_v11  ;;  %4810 = vmatpush3.bf16.msra.mxu1 %v5028_v7 }
0x1266   :  { %4791 = vmatprep.subr.bf16.mxu0 %v7269_v40  ;;  %4811 = vmatprep.subr.bf16.mxu1 %v7269_v40 }
0x1269   :  { %4792 = vmatpush3.bf16.msra.mxu0 %v5021_v25  ;;  %4812 = vmatpush3.bf16.msra.mxu1 %v5029_v21  ;;  %v5042_v25 = vld [vmem:[%s7236_s3 + $0x1b0] sm:$0xff]  }
0x126a   :  { %4793 = vmatprep.subr.bf16.mxu0 %v7269_v40  ;;  %4813 = vmatprep.subr.bf16.mxu1 %v7269_v40 }
0x126d   :  { %4794 = vmatpush3.bf16.msra.mxu0 %v5022_v35  ;;  %4814 = vmatpush3.bf16.msra.mxu1 %v5030_v23  ;;  %v5043_v35 = vld [vmem:[%s7236_s3 + $0x1b8] sm:$0xff]  }
0x126e   :  { %4795 = vmatprep.subr.bf16.mxu0 %v7269_v40  ;;  %4815 = vmatprep.subr.bf16.mxu1 %v7269_v40 }
0x1271   :  { %4796 = vmatpush3.bf16.msra.mxu0 %v5023_v29  ;;  %4816 = vmatpush3.bf16.msra.mxu1 %v5031_v53  ;;  %v4075_v29 = vld [vmem:[%s7237_s4 + $0x5] ss:$0 sm:$0xff] }
0x1272   :  { %4797 = vmatprep.subr.bf16.mxu0 %v7269_v40  ;;  %4817 = vmatprep.subr.bf16.mxu1 %v7269_v40 }
0x1275   :  { %4798 = vmatpush3.bf16.msra.mxu0 %v5024_v60  ;;  %4818 = vmatpush3.bf16.msra.mxu1 %v5032_v58 }
0x1276   :  { %4799 = vmatprep.subr.bf16.mxu0 %v7269_v40  ;;  %4819 = vmatprep.subr.bf16.mxu1 %v7269_v40 }
0x1279   :  { %4800 = vmatpush3.bf16.msra.mxu0 %v5025_v27  ;;  %4820 = vmatpush3.bf16.msra.mxu1 %v5033_v46 }
0x127a   :  { %4801 = vmatprep.subr.bf16.mxu0 %v7269_v40  ;;  %4821 = vmatprep.subr.bf16.mxu1 %v7269_v40 }
0x127d   :  { %4802 = vmatpush3.bf16.msra.mxu0 %v5026_v51 }
0x127e   :  { %4803 = vmatprep.subr.bf16.mxu0 %v7269_v40 }
0x1281   :  { %4804 = vmatpush3.bf16.msra.mxu0 %v5027_v6 }
0x1282   :  { %4829 = vmatprep.subr.bf16.mxu0 %v7269_v40 }
0x1336   :  { %v3269_v24 = vpop.f32.mrb[100].mxu0  ;;  %v3310_v52 = vpop.f32.mrb[84].mxu1 }
0x1337   :  { %v3270_v17 = vadd.f32 %v3269_v24, %v6683_v34  ;;  %v3271_v54 = vpop.f32.mrb[101].mxu0  ;;  %v4787_v26 = vpop.f32.mrb[85].mxu1  ;;  %v3311_v32 = vadd.f32 %v3310_v52, %v6702_v20  ;;  %v5034_v20 = vld [vmem:[%s7236_s3 + $0x170] sm:$0xff]  }
0x1338   :  { %v3272_v45 = vadd.f32 %v3271_v54, %v6689_v13  ;;  %v3273_v44 = vpop.f32.mrb[102].mxu0  ;;  %v3313_v55 = vpop.f32.mrb[86].mxu1  ;;  %v2282_v13 = vadd.f32 %v7305_v10, %v6705_v14  ;;  %4822 = vmatpush3.bf16.msra.mxu1 %v5034_v20  ;;  %v5035_v14 = vld [vmem:[%s7236_s3 + $0x178] sm:$0xff]   ;;  %v7306_v52 = vld [vmem:[#allocation20_spill] sm:$0xff] }
0x1339   :  { %v3316_v57 = vadd.f32 %v3270_v17, %v2216_v39  ;;  %v3274_v2 = vpop.f32.mrb[103].mxu0  ;;  %v4788_v9 = vpop.f32.mrb[87].mxu1  ;;  %4823 = vmatprep.subr.bf16.mxu1 %v7269_v40  ;;  %v3686_v17 = vld [vmem:[%s7235_s2] sm:$0xff]  ;;  %s5345_s2 = smov [#allocation7]  }
0x133a   :  { %v3323_v28 = vadd.f32 %v3272_v45, %v2218_v0  ;;  %v3688_v45 = vsel %vm3687_vm2, %v3686_v17, 0.0 }
0x133b   :  { %v4030_v30 = vmul.f32 -1.442695, %v3316_v57 }
0x133c   :  { %v4031_v31 = vmul.f32 -1.442695, %v3323_v28  ;;  %4824 = vmatpush3.bf16.msra.mxu1 %v5035_v14 }
0x133d   :  { %5194 = vpow2.f32 %v4030_v30 }
0x133e   :  { %5196 = vpow2.f32 %v4031_v31 }
0x1347   :  { %v5195_v47 = vpop.eup %5194 }
0x1348   :  { %v3320_v5 = vadd.f32 1.0, %v5195_v47  ;;  %v5197_v34 = vpop.eup %5196 }
0x1349   :  { %v3327_v61 = vadd.f32 1.0, %v5197_v34 }
0x134a   :  { %5198 = vrcp.f32 %v3320_v5 }
0x1354   :  { %v5199_v42 = vpop.eup %5198 }
0x1355   :  { %v3330_v50 = vmul.f32 %v5199_v42, %v3311_v32 }
0x1357   :  { %v3331_v59 = vadd.f32 %v3330_v50, %v2282_v13 }
0x1359   :  { %5200 = vtanh.f32 %v3331_v59 }
0x135a   :  { %5202 = vrcp.f32 %v3327_v61 }
0x1363   :  { %v5201_v37 = vpop.eup %5200 }
0x1364   :  { %v3333_v1 = vsub.f32 %v7052_v62, %v5201_v37  ;;  %v5203_v18 = vpop.eup %5202 }
0x1366   :  { %v3334_v48 = vmul.f32 %v5203_v18, %v3333_v1 }
0x1368   :  { %v3335_v63 = vadd.f32 %v5201_v37, %v3334_v48 }
0x136a   :  { %v3336_v4 = vpack.c.bf16 %v3335_v63, %v3335_v63 }
0x136c   :  { %4806 = vmatmul.mubr.bf16.vlgmr.msra.gmra.mrb[104].mxu0 %v3336_v4 }
0x136d   :  { %4845 = vmatprep.mubr.msk.bf16.mxu0 %vm5343_vm0, %v7269_v40  ;;  %4830 = vmatpush3.bf16.msra.mxu0 %v5036_v41 }
0x136e   :  { %4831 = vmatprep.subr.bf16.mxu0 %v7269_v40 }
0x1371   :  { %4832 = vmatpush3.bf16.msra.mxu0 %v5037_v56 }
0x1372   :  { %4833 = vmatprep.subr.bf16.mxu0 %v7269_v40 }
0x1375   :  { %4834 = vmatpush3.bf16.msra.mxu0 %v5038_v16 }
0x1376   :  { %4835 = vmatprep.subr.bf16.mxu0 %v7269_v40 }
0x1379   :  { %4836 = vmatpush3.bf16.msra.mxu0 %v5039_v19 }
0x137a   :  { %4837 = vmatprep.subr.bf16.mxu0 %v7269_v40 }
0x137d   :  { %4838 = vmatpush3.bf16.msra.mxu0 %v5040_v15 }
0x137e   :  { %4839 = vmatprep.subr.bf16.mxu0 %v7269_v40 }
0x1381   :  { %4840 = vmatpush3.bf16.msra.mxu0 %v5041_v8 }
0x1382   :  { %4841 = vmatprep.subr.bf16.mxu0 %v7269_v40 }
0x1385   :  { %4842 = vmatpush3.bf16.msra.mxu0 %v5042_v25 }
0x1386   :  { %4843 = vmatprep.subr.bf16.mxu0 %v7269_v40  ;;  %v4101_v40 = vld [vmem:[%s7237_s4 + $0x6] ss:$0 sm:$0xff]  ;;  %s3734_s4 = sshll.u32 %s5345_s2, 4  ;;  %s3735_s4 = int_to_ptr.vmem [resolvable:$true] %s3734_s4 }
0x1387   :  { %s5248_s17 = scalar_lea.vmem %s3735_s4, 32  ;;  %p5253_p1 = scmp.lt.s32.totalorder %s3735_s4, %s3735_s4 }
0x1388   :  { %p5249_p0 = scmp.ne.s32.totalorder %s3735_s4, %s5248_s17  ;;  %p5254_p2 = scmp.lt.s32.totalorder %s5248_s17, %s5248_s17 }
0x1389   :  { %4844 = vmatpush3.bf16.msra.mxu0 %v5043_v35 }
0x138a   :  { %p5255_p3 = por %p5254_p2, %p5253_p1 }
0x138c   :  { %p5256_p4 = pnand %p5255_p3, %p5249_p0 }
0x143f   :  { %v3444_v36 = vpop.f32.mrb[104].mxu0 }
0x1440   :  { %v3445_v3 = vadd.f32 %v4049_v12, %v3444_v36  ;;  %v4807_v38 = vpop.f32.mrb[105].mxu0 }
0x1441   :  { %v3447_v43 = vpop.f32.mrb[106].mxu0 }
0x1442   :  { %v3450_v62 = vmax.f32 %v3445_v3, 0.0  ;;  %v4808_v49 = vpop.f32.mrb[107].mxu0 }
0x1444   :  { %v3451_v11 = vpack.c.bf16 %v3450_v62, %v3450_v62 }
0x1446   :  { %4826 = vmatmul.mubr.bf16.vlgmr.msra.gmra.mrb[88].mxu1 %v3451_v11 }
0x1519   :  { %v3559_v60 = vpop.f32.mrb[88].mxu1 }
0x151a   :  { %v3560_v27 = vadd.f32 %v4075_v29, %v3559_v60  ;;  %v4827_v51 = vpop.f32.mrb[89].mxu1 }
0x151b   :  { %v3562_v6 = vpop.f32.mrb[90].mxu1 }
0x151c   :  { %v3565_v7 = vmax.f32 %v3560_v27, 0.0  ;;  %v4828_v21 = vpop.f32.mrb[91].mxu1 }
0x151e   :  { %v3566_v23 = vpack.c.bf16 %v3565_v7, %v3565_v7 }
0x1520   :  { %4846 = vmatmul.mubr.bf16.vlgmr.msra.gmra.mrb[108].mxu0 %v3566_v23 }
0x15f3   :  { %v3674_v53 = vpop.f32.mrb[108].mxu0 }
0x15f4   :  { %v3675_v58 = vadd.f32 %v4101_v40, %v3674_v53  ;;  %v4847_v46 = vpop.f32.mrb[109].mxu0 }
0x15f5   :  { %v3677_v24 = vpop.f32.mrb[110].mxu0 }
0x15f6   :  { %v3680_v22 = vadd.f32 %v3675_v58, %v7306_v52  ;;  %v4848_v39 = vpop.f32.mrb[111].mxu0  ;;  %3684 = vst.msk [vmem:[#allocation7] sm:$0x3] %vm3682_vm1, %v3675_v58 }
0x15f8   :  { %v3681_v54 = vmul.f32 0.5, %v3680_v22 }
0x15fa   :  { %v3691_v26 = vsel %vm3687_vm2, %v3681_v54, -inf  ;;  %v3703_v33 = vmul.f32 %v3686_v17, %v3681_v54  ;;  %3685 = vst.msk [vmem:[#allocation9] sm:$0x3] %vm3682_vm1, %v3681_v54 }
0x15fb   :  { %3692 = vmax.xlane.f32.xlu0 %v3691_v26 }
0x15fc   :  { %v3704_v0 = vsel %vm3687_vm2, %v3703_v33, 0.0 }
0x15fd   :  { %3705 = vadd.xlane.f32.xlu1 %v3704_v0 }
0x1601   :  { %3689 = vadd.xlane.f32.xlu1 %v3688_v45 }
0x1688   :  { %v3693_v44 = vpop.xlane.xlu0 %3692 }
0x1689   :  { %v3694_v55 = vsub.f32 %v3681_v54, %v3693_v44 }
0x168b   :  { %v3695_v57 = vmul.f32 1.442695, %v3694_v55 }
0x168d   :  { %5204 = vpow2.f32 %v3695_v57 }
0x1697   :  { %v5205_v2 = vpop.eup %5204 }
0x1698   :  { %v3697_v9 = vsel %vm3687_vm2, %v5205_v2, 0.0 }
0x1699   :  { %3698 = vadd.xlane.f32.xlu0 %v3697_v9 }
0x169a   :  { %5259 = shalt.err (!%p5256_p4)
}
0x169b   :  { %s5260_s20 = scalar_lea.hbm %s7243_s10, 32 }
0x169c   :  { %p5261_p5 = scmp.ne.s32.totalorder %s7243_s10, %s5260_s20  ;;  %p5264_p6 = scmp.lt.u32.totalorder %s5260_s20, %s7243_s10 }
0x169e   :  { %p5266_p7 = pnand %p5264_p6, %p5261_p5 }
0x16a0   :  { %5269 = shalt.err (!%p5266_p7)
}
0x16a1   :  { %3737 = dma.vmem_to_hbm [thread:$0]  %s3735_s4, 32, %s7243_s10, [#allocation8]  }
0x16a2   :  { %s5270_s26 = scalar_lea.vmem %s3725_s0, 32  ;;  %p5275_p9 = scmp.lt.s32.totalorder %s3725_s0, %s3725_s0 }
0x16a3   :  { %p5271_p8 = scmp.ne.s32.totalorder %s3725_s0, %s5270_s26  ;;  %p5276_p10 = scmp.lt.s32.totalorder %s5270_s26, %s5270_s26 }
0x16a5   :  { %p5277_p11 = por %p5276_p10, %p5275_p9 }
0x16a7   :  { %p5278_p12 = pnand %p5277_p11, %p5271_p8 }
0x16a9   :  { %5281 = shalt.err (!%p5278_p12)
}
0x16aa   :  { %s5282_s8 = scalar_lea.hbm %s7242_s9, 32 }
0x16ab   :  { %p5283_p13 = scmp.ne.s32.totalorder %s7242_s9, %s5282_s8  ;;  %p5286_p0 = scmp.lt.u32.totalorder %s5282_s8, %s7242_s9 }
0x16ad   :  { %p5288_p1 = pnand %p5286_p0, %p5283_p13 }
0x16af   :  { %5291 = shalt.err (!%p5288_p1)
}
0x16b0   :  { %3727 = dma.vmem_to_hbm [thread:$0]  %s3725_s0, 32, %s7242_s9, [#allocation6]  }
0x16b1   :  { %s5347_s13 = smov [#allocation9]  }
0x16b2   :  { %s3744_s14 = sshll.u32 %s5347_s13, 4  ;;  %s3745_s14 = int_to_ptr.vmem [resolvable:$true] %s3744_s14 }
0x16b3   :  { %s5292_s3 = scalar_lea.vmem %s3745_s14, 32  ;;  %p5297_p3 = scmp.lt.s32.totalorder %s3745_s14, %s3745_s14 }
0x16b4   :  { %p5293_p2 = scmp.ne.s32.totalorder %s3745_s14, %s5292_s3  ;;  %p5298_p4 = scmp.lt.s32.totalorder %s5292_s3, %s5292_s3 }
0x16b6   :  { %p5299_p5 = por %p5298_p4, %p5297_p3 }
0x16b8   :  { %p5300_p6 = pnand %p5299_p5, %p5293_p2 }
0x16ba   :  { %5303 = shalt.err (!%p5300_p6)
}
0x16bb   :  { %s5304_s4 = scalar_lea.hbm %s7244_s11, 32 }
0x16bc   :  { %p5305_p7 = scmp.ne.s32.totalorder %s7244_s11, %s5304_s4  ;;  %p5308_p8 = scmp.lt.u32.totalorder %s5304_s4, %s7244_s11 }
0x16be   :  { %p5310_p9 = pnand %p5308_p8, %p5305_p7 }
0x16c0   :  { %5313 = shalt.err (!%p5310_p9)
}
0x16c1   :  { %3747 = dma.vmem_to_hbm [thread:$0]  %s3745_s14, 32, %s7244_s11, [#allocation8]   ;;  %v3706_v31 = vpop.xlane.xlu1 %3705  ;;  %vm3716_vm3 = vcmask 0  }
0x16c2   :  { %s5348_s20 = smov [#allocation10]  }
0x16c3   :  { %s3754_s21 = sshll.u32 %s5348_s20, 4  ;;  %s3755_s21 = int_to_ptr.vmem [resolvable:$true] %s3754_s21 }
0x16c4   :  { %s5314_s11 = scalar_lea.vmem %s3755_s21, 16  ;;  %s5318_s22 = scalar_lea.vmem %s3755_s21, 32 }
0x16c5   :  { %v3690_v34 = vpop.xlane.xlu1 %3689  ;;  %p5315_p10 = scmp.ne.s32.totalorder %s3755_s21, %s5314_s11  ;;  %p5319_p11 = scmp.lt.s32.totalorder %s3755_s21, %s3755_s21 }
0x16c6   :  { %p5320_p12 = scmp.lt.s32.totalorder %s5318_s22, %s5314_s11 }
0x16c8   :  { %p5321_p13 = por %p5320_p12, %p5319_p11 }
0x16ca   :  { %p5322_p0 = pnand %p5321_p13, %p5315_p10 }
0x1726   :  { %v3699_v28 = vpop.xlane.xlu0 %3698 }
0x1727   :  { %5206 = vlog2.f32 %v3699_v28 }
0x1731   :  { %v5207_v30 = vpop.eup %5206 }
0x1732   :  { %v3701_v47 = vmul.f32 0.6931472, %v5207_v30 }
0x1734   :  { %v3702_v5 = vadd.f32 %v3701_v47, %v3693_v44 }
0x1736   :  { %v3707_v32 = vsub.f32 %v3702_v5, %v3706_v31 }
0x1738   :  { %v3708_v42 = vmul.f32 %v3707_v32, %v3690_v34 }
0x173a   :  { %v3709_v10 = vrot.slane %v3708_v42, 4 }
0x173c   :  { %v3710_v13 = vadd.f32 %v3709_v10, %v3708_v42 }
0x173e   :  { %v3711_v50 = vrot.slane %v3710_v13, 2 }
0x1740   :  { %v3712_v59 = vadd.f32 %v3711_v50, %v3710_v13 }
0x1742   :  { %v3713_v61 = vrot.slane %v3712_v59, 1 }
0x1744   :  { %v3714_v37 = vadd.f32 %v3713_v61, %v3712_v59 }
0x1746   :  { %v3715_v1 = vmul.f32 0.5, %v3714_v37 }
0x1748   :  { %3717 = vst.msk [vmem:[#allocation10] sm:$0x1] %vm3716_vm3, %v3715_v1 }
0x1749   :  { %5325 = shalt.err (!%p5322_p0)
}
0x174a   :  { %s5326_s24 = scalar_lea.hbm %s7245_s12, 16 }
0x174b   :  { %p5327_p1 = scmp.ne.s32.totalorder %s7245_s12, %s5326_s24  ;;  %p5330_p2 = scmp.lt.u32.totalorder %s5326_s24, %s7245_s12 }
0x174d   :  { %p5332_p3 = pnand %p5330_p2, %p5327_p1 }
0x174f   :  { %5335 = shalt.err (!%p5332_p3)
}
0x1750   :  { %3757 = dma.vmem_to_hbm [thread:$0]  %s3755_s21, 16, %s7245_s12, [#allocation11]  }
0x1751   :  { %5336 = dma.done.wait [#allocation6], 32  }
0x1752   :  { %5337 = vsyncadd [#allocation6], 4294967264 }
0x1753   :  { %5338 = dma.done.wait [#allocation8], 64  }
0x1754   :  { %5339 = vsyncadd [#allocation8], 4294967232 }
0x1755   :  { %5340 = dma.done.wait [#allocation11], 16  }
0x1756   :  { %5341 = vsyncadd [#allocation11], 4294967280 }
0x1757   :  { %3770 = vsyncpa [#allocation6], 1 }
0x1758   :  { %3771 = vsyncpa [#allocation8], 1 }
0x1759   :  { %3772 = vsyncpa [#allocation11], 1 }

</bundles_post_ra>
